<compile_context>
chip_gen: v6e
topology: v6e:2x2x1
jax: 0.10.0
libtpu: 0.0.40
codegen_flags: <defaults>
</compile_context>

<pallas_src>
import functools

import jax
import jax.numpy as jnp
from jax.experimental import pallas as pl
from jax.experimental.pallas import tpu as pltpu


# ----------------------------- Pallas kernels ------------------------------

def _act(x, mode):
    if mode is None:
        return x
    if mode == "leaky":
        return jnp.where(x >= 0, x, 0.2 * x)
    if mode == "relu":
        return jnp.maximum(x, 0.0)
    if mode == "tanh":
        return jnp.tanh(x)
    raise ValueError(mode)


def _pre(a_ref, pre_act):
    # Pre-activation in f32 (v5e VPU has no bf16), MXU operand in bf16.
    if pre_act is None:
        return a_ref[...]
    return _act(a_ref[...].astype(jnp.float32), pre_act).astype(jnp.bfloat16)


def _gemm_kernel(pre_act, post_act, w_ref, a_ref, b_ref, o_ref):
    """out = post_act(W @ pre_act(A) + bias).  M-tiled, no norm."""
    a = _pre(a_ref, pre_act)
    y = jnp.dot(w_ref[...], a, preferred_element_type=jnp.float32) + b_ref[...]
    o_ref[...] = _act(y, post_act)


def _gemm_bn_kernel(pre_act, post_act, w_ref, a_ref, g_ref, be_ref, o_ref):
    """out = post_act(BN_train(W @ pre_act(A))).  Whole tensor in one block so the
    batch statistics (per output channel, over N*H*W lanes) are computed in-kernel."""
    a = _pre(a_ref, pre_act)
    y = jnp.dot(w_ref[...], a, preferred_element_type=jnp.float32)
    mean = jnp.mean(y, axis=1, keepdims=True)
    var = jnp.mean((y - mean) ** 2, axis=1, keepdims=True)   # biased, training mode
    y = (y - mean) * jax.lax.rsqrt(var + 1e-5) * g_ref[...] + be_ref[...]
    o_ref[...] = _act(y, post_act)


def _gemm_chain_kernel(pre_act, w1_ref, a_ref, b1_ref, w2_ref, b2_ref, o_ref):
    """Outermost up path: tanh(W2 @ (W1 @ pre_act(A) + b1) + b2).  M-tiled."""
    a = _pre(a_ref, pre_act)
    t = jnp.dot(w1_ref[...], a, preferred_element_type=jnp.float32) + b1_ref[...]
    t = jnp.dot(w2_ref[...], t.astype(jnp.bfloat16),
                preferred_element_type=jnp.float32) + b2_ref[...]
    o_ref[...] = jnp.tanh(t)


# ------------------------------ call wrappers -------------------------------

def _choose_tm(M):
    # >= 2 grid steps when possible (keeps both v7x TensorCores busy); tiles must
    # be lane-aligned (multiple of 128) unless the block covers the whole M.
    for tm in (1024, 512, 256, 128):
        if M % tm == 0 and M // tm >= 2:
            return tm
    return None


def fused_conv_gemm(wm, cols, bias=None, pre_act=None, post_act=None):
    Cout, K = wm.shape
    _, M = cols.shape
    if bias is None:
        bias = jnp.zeros((Cout,), jnp.float32)
    tm = _choose_tm(M)
    grid = (1,) if tm is None else (M // tm,)
    tmm = M if tm is None else tm
    return pl.pallas_call(
        functools.partial(_gemm_kernel, pre_act, post_act),
        out_shape=jax.ShapeDtypeStruct((Cout, M), jnp.float32),
        grid=grid,
        in_specs=[
            pl.BlockSpec((Cout, K), lambda i: (0, 0)),
            pl.BlockSpec((K, tmm), lambda i: (0, i)),
            pl.BlockSpec((Cout, 1), lambda i: (0, 0)),
        ],
        out_specs=pl.BlockSpec((Cout, tmm), lambda i: (0, i)),
        compiler_params=pltpu.CompilerParams(dimension_semantics=("parallel",)),
    )(wm.astype(jnp.bfloat16), cols.astype(jnp.bfloat16),
      bias.reshape(Cout, 1).astype(jnp.float32))


def fused_conv_bn_gemm(wm, cols, gamma, beta, pre_act=None, post_act=None):
    Cout, K = wm.shape
    _, M = cols.shape
    # Single block so training-mode BN statistics see the full (N,H,W) extent.
    return pl.pallas_call(
        functools.partial(_gemm_bn_kernel, pre_act, post_act),
        out_shape=jax.ShapeDtypeStruct((Cout, M), jnp.float32),
        grid=(1,),
        in_specs=[
            pl.BlockSpec((Cout, K), lambda i: (0, 0)),
            pl.BlockSpec((K, M), lambda i: (0, 0)),
            pl.BlockSpec((Cout, 1), lambda i: (0, 0)),
            pl.BlockSpec((Cout, 1), lambda i: (0, 0)),
        ],
        out_specs=pl.BlockSpec((Cout, M), lambda i: (0, 0)),
    )(wm.astype(jnp.bfloat16), cols.astype(jnp.bfloat16),
      gamma.reshape(Cout, 1).astype(jnp.float32),
      beta.reshape(Cout, 1).astype(jnp.float32))


def fused_chain_gemm(w1m, cols, b1, w2m, b2, pre_act="relu"):
    C1, K = w1m.shape
    C2, _ = w2m.shape
    _, M = cols.shape
    tm = _choose_tm(M)
    grid = (1,) if tm is None else (M // tm,)
    tmm = M if tm is None else tm
    return pl.pallas_call(
        functools.partial(_gemm_chain_kernel, pre_act),
        out_shape=jax.ShapeDtypeStruct((C2, M), jnp.float32),
        grid=grid,
        in_specs=[
            pl.BlockSpec((C1, K), lambda i: (0, 0)),
            pl.BlockSpec((K, tmm), lambda i: (0, i)),
            pl.BlockSpec((C1, 1), lambda i: (0, 0)),
            pl.BlockSpec((C2, C1), lambda i: (0, 0)),
            pl.BlockSpec((C2, 1), lambda i: (0, 0)),
        ],
        out_specs=pl.BlockSpec((C2, tmm), lambda i: (0, i)),
        compiler_params=pltpu.CompilerParams(dimension_semantics=("parallel",)),
    )(w1m.astype(jnp.bfloat16), cols.astype(jnp.bfloat16),
      b1.reshape(C1, 1).astype(jnp.float32),
      w2m.astype(jnp.bfloat16), b2.reshape(C2, 1).astype(jnp.float32))


# ---------------------- conv glue (channel-major im2col) --------------------

def _im2col_cm(x, kh, kw, stride):
    # x: (C, N, H, W) already padded -> (kh*kw*C, N*Ho*Wo), K ordered tap-major
    # (i, j, c) to match the reshaped PyTorch weights.
    # TODO(synk): move the tap gather inside the Pallas kernel to avoid the
    # kh*kw x HBM amplification of cols (cheap at these sizes, kept in XLA here).
    C, N, H, W = x.shape
    Ho = (H - kh) // stride + 1
    Wo = (W - kw) // stride + 1
    taps = []
    for i in range(kh):
        for j in range(kw):
            taps.append(x[:, :, i:i + stride * (Ho - 1) + 1:stride,
                              j:j + stride * (Wo - 1) + 1:stride])
    cols = jnp.stack(taps, axis=0)                       # (kh*kw, C, N, Ho, Wo)
    return cols.reshape(kh * kw * C, N * Ho * Wo), (N, Ho, Wo)


def _conv_wmat(w):
    # PyTorch Conv2d weight (Cout, Cin, kh, kw) -> (Cout, kh*kw*Cin), tap-major.
    Cout, Cin, kh, kw = w.shape
    return jnp.transpose(w, (0, 2, 3, 1)).reshape(Cout, kh * kw * Cin)


def _convT_to_conv_w(w):
    # ConvTranspose2d weight (Cin, Cout, kh, kw) -> equivalent Conv2d weight.
    return jnp.transpose(jnp.flip(w, axis=(2, 3)), (1, 0, 2, 3))


def _dilate_pad(x, stride, kh, kw, pad):
    C, N, H, W = x.shape
    Hd, Wd = (H - 1) * stride + 1, (W - 1) * stride + 1
    xd = jnp.zeros((C, N, Hd, Wd), x.dtype).at[:, :, ::stride, ::stride].set(x)
    p = kh - 1 - pad
    return jnp.pad(xd, ((0, 0), (0, 0), (p, p), (p, p)))


def conv2d_cm(x, w, bias=None, stride=2, pad=1, pre_act=None, bn=None):
    # x: (C, N, H, W); w: PyTorch Conv2d layout.  pre_act commutes with the zero
    # padding (leaky/relu of 0 is 0), so it is applied to cols inside the kernel.
    Cout = w.shape[0]
    kh, kw = w.shape[2], w.shape[3]
    if pad:
        x = jnp.pad(x, ((0, 0), (0, 0), (pad, pad), (pad, pad)))
    cols, (N, Ho, Wo) = _im2col_cm(x, kh, kw, stride)
    wm = _conv_wmat(w)
    if bn is not None:
        y = fused_conv_bn_gemm(wm, cols, bn[0], bn[1], pre_act=pre_act)
    else:
        y = fused_conv_gemm(wm, cols, bias, pre_act=pre_act)
    return y.reshape(Cout, N, Ho, Wo)


def conv_transpose2d_cm(x, w, stride=2, pad=1, pre_act=None, bn=None):
    # TODO(synk): replace dilate-then-conv with the stride^2 sub-filter
    # decomposition to drop the 4x zero-MAC redundancy (model is overhead-bound
    # at these sizes, so the simple equivalent-conv formulation is kept).
    Cout = w.shape[1]
    kh, kw = w.shape[2], w.shape[3]
    xdp = _dilate_pad(x, stride, kh, kw, pad)
    cols, (N, Ho, Wo) = _im2col_cm(xdp, kh, kw, 1)
    wm = _conv_wmat(_convT_to_conv_w(w))
    if bn is not None:
        y = fused_conv_bn_gemm(wm, cols, bn[0], bn[1], pre_act=pre_act)
    else:
        y = fused_conv_gemm(wm, cols, None, pre_act=pre_act)
    return y.reshape(Cout, N, Ho, Wo)


def outer_up_chain(x, up_w, up_b, conv_w, conv_b):
    # ReLU -> ConvTranspose2d(4,2,1)+bias -> 1x1 Conv2d+bias -> Tanh, fused.
    kh, kw = up_w.shape[2], up_w.shape[3]
    xdp = _dilate_pad(x, 2, kh, kw, 1)
    cols, (N, Ho, Wo) = _im2col_cm(xdp, kh, kw, 1)
    w1m = _conv_wmat(_convT_to_conv_w(up_w))                  # (ngf, 16*2ngf)
    w2m = conv_w.reshape(conv_w.shape[0], conv_w.shape[1])    # (out_nc, ngf)
    y = fused_chain_gemm(w1m, cols, up_b, w2m, conv_b, pre_act="relu")
    return y.reshape(w2m.shape[0], N, Ho, Wo)


# ---------------------- parameters (deterministic init) --------------------

def spectral_normalize(w, key, n_iter=30):
    # TODO(synk): PyTorch spectral_norm updates u/v buffers once per forward in
    # training mode; that stateful per-call drift is approximated by a converged
    # power-iteration estimate of sigma at init.
    wmat = w.reshape(w.shape[0], -1)
    u = jax.random.normal(key, (wmat.shape[0],), jnp.float32)
    u = u / (jnp.linalg.norm(u) + 1e-12)
    v = wmat.T @ u
    for _ in range(n_iter):
        v = wmat.T @ u
        v = v / (jnp.linalg.norm(v) + 1e-12)
        u = wmat @ v
        u = u / (jnp.linalg.norm(u) + 1e-12)
    sigma = u @ (wmat @ v)
    return w / sigma


def build_params(key, input_nc, output_nc, num_downs, ngf):
    specs = [dict(kind="inner", outer=8 * ngf, inner=8 * ngf, inp=8 * ngf)]
    for _ in range(num_downs - 5):
        specs.append(dict(kind="mid", outer=8 * ngf, inner=8 * ngf, inp=8 * ngf))
    specs.append(dict(kind="mid", outer=4 * ngf, inner=8 * ngf, inp=4 * ngf))
    specs.append(dict(kind="mid", outer=2 * ngf, inner=4 * ngf, inp=2 * ngf))
    specs.append(dict(kind="mid", outer=ngf, inner=2 * ngf, inp=ngf))
    specs.append(dict(kind="outer", outer=output_nc, inner=ngf, inp=input_nc))

    params = []
    for s in specs:
        key, *ks = jax.random.split(key, 9)
        outer, inner, inp = s["outer"], s["inner"], s["inp"]
        p = {}
        dw = 0.05 * jax.random.normal(ks[0], (inner, inp, 4, 4), jnp.float32)
        p["down_w"] = spectral_normalize(dw, ks[1])
        if s["kind"] == "inner":
            uw = 0.05 * jax.random.normal(ks[2], (inner, outer, 4, 4), jnp.float32)
            p["up_w"] = spectral_normalize(uw, ks[3])
            p["up_g"] = jnp.ones((outer,), jnp.float32)
            p["up_be"] = jnp.zeros((outer,), jnp.float32)
        elif s["kind"] == "mid":
            p["down_g"] = jnp.ones((inner,), jnp.float32)
            p["down_be"] = jnp.zeros((inner,), jnp.float32)
            uw = 0.05 * jax.random.normal(ks[2], (2 * inner, outer, 4, 4), jnp.float32)
            p["up_w"] = spectral_normalize(uw, ks[3])
            p["up_g"] = jnp.ones((outer,), jnp.float32)
            p["up_be"] = jnp.zeros((outer,), jnp.float32)
        else:  # outermost
            uw = 0.05 * jax.random.normal(ks[2], (2 * inner, inner, 4, 4), jnp.float32)
            p["up_w"] = spectral_normalize(uw, ks[3])
            p["up_b"] = 0.01 * jax.random.normal(ks[4], (inner,), jnp.float32)
            cw = 0.05 * jax.random.normal(ks[5], (outer, inner, 1, 1), jnp.float32)
            p["conv_w"] = spectral_normalize(cw, ks[6])
            p["conv_b"] = 0.01 * jax.random.normal(ks[7], (outer,), jnp.float32)
        params.append(p)
    return specs, params


# --------------------------------- forward ---------------------------------

def block_forward(x, idx, specs, params):
    s, p = specs[idx], params[idx]
    if s["kind"] == "outer":
        h = conv2d_cm(x, p["down_w"], stride=2, pad=1)              # downconv (no bias)
        h = block_forward(h, idx - 1, specs, params)                # submodule
        return outer_up_chain(h, p["up_w"], p["up_b"], p["conv_w"], p["conv_b"])
    # Non-outermost: inplace LeakyReLU(0.2, True) mutates x before torch.cat, so
    # the skip branch carries leaky_relu(x).  The conv-side leaky is fused into
    # the GEMM kernel (pre_act); the skip copy is left to XLA to fuse with concat.
    if s["kind"] == "mid":
        h = conv2d_cm(x, p["down_w"], stride=2, pad=1, pre_act="leaky",
                      bn=(p["down_g"], p["down_be"]))               # downconv + BN
        h = block_forward(h, idx - 1, specs, params)
    else:  # innermost
        h = conv2d_cm(x, p["down_w"], stride=2, pad=1, pre_act="leaky")
    h = conv_transpose2d_cm(h, p["up_w"], pre_act="relu",
                            bn=(p["up_g"], p["up_be"]))             # uprelu+upconv+BN
    xr = jnp.where(x >= 0, x, 0.2 * x)                              # skip = leaky(x)
    return jnp.concatenate([xr, h], axis=0)                         # channel axis


def unet_forward(x_nchw, specs, params):
    # NCHW -> channel-major (C, N, H, W): channels on sublanes, N*H*W on lanes so
    # every GEMM output is lane-dense.
    x = jnp.transpose(x_nchw, (1, 0, 2, 3))
    y = block_forward(x, len(specs) - 1, specs, params)
    return jnp.transpose(y, (1, 0, 2, 3))                           # back to NCHW


# ----------------------------------- main -----------------------------------

if __name__ == "__main__":
    key = jax.random.PRNGKey(0)
    kx, kp = jax.random.split(key)
    input_nc, output_nc = 3, 3
    num_downs, ngf = 5, 4           # spatial must be >= 2**num_downs
    x = jax.random.normal(kx, (2, input_nc, 32, 32), jnp.float32)

    specs, params = build_params(kp, input_nc, output_nc, num_downs, ngf)
    fwd = jax.jit(lambda xx: unet_forward(xx, specs, params))
    y = fwd(x)
    jax.block_until_ready(y)
    assert y.shape == (2, output_nc, 32, 32)
    assert bool(jnp.all(jnp.isfinite(y)))
    print("KERNEL_OK")
</pallas_src>

<mosaic_0001>
module attributes {stable_mosaic.version = 11 : i64} {
  func.func @_gemm_kernel(%arg0: i32, %arg1: memref<4x48xbf16, #tpu.memory_space<vmem>>, %arg2: memref<48x256xbf16, #tpu.memory_space<vmem>>, %arg3: memref<4x1xf32, #tpu.memory_space<vmem>>, %arg4: memref<4x256xf32, #tpu.memory_space<vmem>>) attributes {dimension_semantics = [#tpu.dimension_semantics<parallel>], iteration_bounds = array<i64: 2>, scalar_prefetch = 0 : i64, scratch_operands = 0 : i64, tpu.core_type = #tpu.core_type<tc>, window_params = [{pipeline_mode = #tpu.pipeline_mode<synchronous>, transform_indices = @transform_0, window_bounds = array<i64: 4, 48>}, {transform_indices = @transform_1, window_bounds = array<i64: 48, 256>}, {pipeline_mode = #tpu.pipeline_mode<synchronous>, transform_indices = @transform_2, window_bounds = array<i64: 4, 1>}, {transform_indices = @transform_3, window_bounds = array<i64: 4, 256>}]} {
    %c0 = arith.constant 0 : index
    %c0_0 = arith.constant 0 : index
    %0 = vector.load %arg2[%c0, %c0_0] : memref<48x256xbf16, #tpu.memory_space<vmem>>, vector<48x256xbf16>
    %c0_1 = arith.constant 0 : index
    %c0_2 = arith.constant 0 : index
    %1 = vector.load %arg1[%c0_1, %c0_2] : memref<4x48xbf16, #tpu.memory_space<vmem>>, vector<4x48xbf16>
    %cst = arith.constant dense<0.000000e+00> : vector<4x256xf32>
    %2 = tpu.matmul %1, %0, %cst {dimension_numbers = #tpu.dot_dimension_numbers<[1], [0], [0], [1], [0, 0, 1, 1], [], []>} : vector<4x48xbf16>, vector<48x256xbf16>, vector<4x256xf32> -> vector<4x256xf32>
    %c0_3 = arith.constant 0 : index
    %c0_4 = arith.constant 0 : index
    %3 = vector.load %arg3[%c0_3, %c0_4] : memref<4x1xf32, #tpu.memory_space<vmem>>, vector<4x1xf32>
    %4 = vector.broadcast %3 : vector<4x1xf32> to vector<4x256xf32>
    %5 = arith.addf %2, %4 : vector<4x256xf32>
    %c0_5 = arith.constant 0 : index
    %c0_6 = arith.constant 0 : index
    %6 = vector.load %arg4[%c0_5, %c0_6] : memref<4x256xf32, #tpu.memory_space<vmem>>, vector<4x256xf32>
    tpu.vector_store %arg4[%c0_5, %c0_6], %5 {strides = array<i32>} : memref<4x256xf32, #tpu.memory_space<vmem>>, vector<4x256xf32>,
    return
  }
  func.func @transform_0(%arg0: i32) -> (i32, i32) {
    %c0_i32 = arith.constant 0 : i32
    %c0_i32_0 = arith.constant 0 : i32
    %c0_i32_1 = arith.constant 0 : i32
    return %c0_i32, %c0_i32_0 : i32, i32
  }
  func.func @transform_1(%arg0: i32) -> (i32, i32) {
    %c0_i32 = arith.constant 0 : i32
    %c0_i32_0 = arith.constant 0 : i32
    return %c0_i32, %arg0 : i32, i32
  }
  func.func @transform_2(%arg0: i32) -> (i32, i32) {
    %c0_i32 = arith.constant 0 : i32
    %c0_i32_0 = arith.constant 0 : i32
    %c0_i32_1 = arith.constant 0 : i32
    return %c0_i32, %c0_i32_0 : i32, i32
  }
  func.func @transform_3(%arg0: i32) -> (i32, i32) {
    %c0_i32 = arith.constant 0 : i32
    %c0_i32_0 = arith.constant 0 : i32
    return %c0_i32, %arg0 : i32, i32
  }
}

module attributes {stable_mosaic.version = 11 : i64} {
  func.func @_gemm_bn_kernel(%arg0: i32, %arg1: memref<8x64xbf16, #tpu.memory_space<vmem>>, %arg2: memref<64x128xbf16, #tpu.memory_space<vmem>>, %arg3: memref<8x1xf32, #tpu.memory_space<vmem>>, %arg4: memref<8x1xf32, #tpu.memory_space<vmem>>, %arg5: memref<8x128xf32, #tpu.memory_space<vmem>>) attributes {dimension_semantics = [#tpu.dimension_semantics<arbitrary>], iteration_bounds = array<i64: 1>, scalar_prefetch = 0 : i64, scratch_operands = 0 : i64, tpu.core_type = #tpu.core_type<tc>, window_params = [{pipeline_mode = #tpu.pipeline_mode<synchronous>, transform_indices = @transform_0, window_bounds = array<i64: 8, 64>}, {pipeline_mode = #tpu.pipeline_mode<synchronous>, transform_indices = @transform_1, window_bounds = array<i64: 64, 128>}, {pipeline_mode = #tpu.pipeline_mode<synchronous>, transform_indices = @transform_2, window_bounds = array<i64: 8, 1>}, {pipeline_mode = #tpu.pipeline_mode<synchronous>, transform_indices = @transform_3, window_bounds = array<i64: 8, 1>}, {pipeline_mode = #tpu.pipeline_mode<synchronous>, transform_indices = @transform_4, window_bounds = array<i64: 8, 128>}]} {
    %c0 = arith.constant 0 : index
    %c0_0 = arith.constant 0 : index
    %0 = vector.load %arg2[%c0, %c0_0] : memref<64x128xbf16, #tpu.memory_space<vmem>>, vector<64x128xbf16>
    %1 = arith.extf %0 : vector<64x128xbf16> to vector<64x128xf32>
    %cst = arith.constant 0.000000e+00 : f32
    %2 = vector.broadcast %cst : f32 to vector<64x128xf32>
    %3 = arith.cmpf oge, %1, %2 : vector<64x128xf32>
    %cst_1 = arith.constant 2.000000e-01 : f32
    %4 = vector.broadcast %cst_1 : f32 to vector<64x128xf32>
    %5 = arith.mulf %4, %1 : vector<64x128xf32>
    %6 = arith.select %3, %1, %5 : vector<64x128xi1>, vector<64x128xf32>
    %7 = arith.truncf %6 : vector<64x128xf32> to vector<64x128xbf16>
    %c0_2 = arith.constant 0 : index
    %c0_3 = arith.constant 0 : index
    %8 = vector.load %arg1[%c0_2, %c0_3] : memref<8x64xbf16, #tpu.memory_space<vmem>>, vector<8x64xbf16>
    %cst_4 = arith.constant dense<0.000000e+00> : vector<8x128xf32>
    %9 = tpu.matmul %8, %7, %cst_4 {dimension_numbers = #tpu.dot_dimension_numbers<[1], [0], [0], [1], [0, 0, 1, 1], [], []>} : vector<8x64xbf16>, vector<64x128xbf16>, vector<8x128xf32> -> vector<8x128xf32>
    %cst_5 = arith.constant dense<0.000000e+00> : vector<8xf32>
    %10 = vector.multi_reduction <add>, %9, %cst_5 [1] : vector<8x128xf32> to vector<8xf32>
    %11 = vector.shape_cast %10 : vector<8xf32> to vector<8x1xf32>
    %cst_6 = arith.constant 1.280000e+02 : f32
    %12 = vector.broadcast %cst_6 : f32 to vector<8x1xf32>
    %13 = arith.divf %11, %12 : vector<8x1xf32>
    %14 = vector.broadcast %13 : vector<8x1xf32> to vector<8x128xf32>
    %15 = arith.subf %9, %14 : vector<8x128xf32>
    %16 = arith.mulf %15, %15 : vector<8x128xf32>
    %cst_7 = arith.constant dense<0.000000e+00> : vector<8xf32>
    %17 = vector.multi_reduction <add>, %16, %cst_7 [1] : vector<8x128xf32> to vector<8xf32>
    %18 = vector.shape_cast %17 : vector<8xf32> to vector<8x1xf32>
    %cst_8 = arith.constant 1.280000e+02 : f32
    %19 = vector.broadcast %cst_8 : f32 to vector<8x1xf32>
    %20 = arith.divf %18, %19 : vector<8x1xf32>
    %21 = vector.broadcast %13 : vector<8x1xf32> to vector<8x128xf32>
    %22 = arith.subf %9, %21 : vector<8x128xf32>
    %cst_9 = arith.constant 9.99999974E-6 : f32
    %23 = vector.broadcast %cst_9 : f32 to vector<8x1xf32>
    %24 = arith.addf %20, %23 : vector<8x1xf32>
    %25 = math.rsqrt %24 : vector<8x1xf32>
    %26 = vector.broadcast %25 : vector<8x1xf32> to vector<8x128xf32>
    %27 = arith.mulf %22, %26 : vector<8x128xf32>
    %c0_10 = arith.constant 0 : index
    %c0_11 = arith.constant 0 : index
    %28 = vector.load %arg3[%c0_10, %c0_11] : memref<8x1xf32, #tpu.memory_space<vmem>>, vector<8x1xf32>
    %29 = vector.broadcast %28 : vector<8x1xf32> to vector<8x128xf32>
    %30 = arith.mulf %27, %29 : vector<8x128xf32>
    %c0_12 = arith.constant 0 : index
    %c0_13 = arith.constant 0 : index
    %31 = vector.load %arg4[%c0_12, %c0_13] : memref<8x1xf32, #tpu.memory_space<vmem>>, vector<8x1xf32>
    %32 = vector.broadcast %31 : vector<8x1xf32> to vector<8x128xf32>
    %33 = arith.addf %30, %32 : vector<8x128xf32>
    %c0_14 = arith.constant 0 : index
    %c0_15 = arith.constant 0 : index
    %34 = vector.load %arg5[%c0_14, %c0_15] : memref<8x128xf32, #tpu.memory_space<vmem>>, vector<8x128xf32>
    tpu.vector_store %arg5[%c0_14, %c0_15], %33 {strides = array<i32>} : memref<8x128xf32, #tpu.memory_space<vmem>>, vector<8x128xf32>,
    return
  }
  func.func @transform_0(%arg0: i32) -> (i32, i32) {
    %c0_i32 = arith.constant 0 : i32
    %c0_i32_0 = arith.constant 0 : i32
    %c0_i32_1 = arith.constant 0 : i32
    return %c0_i32, %c0_i32_0 : i32, i32
  }
  func.func @transform_1(%arg0: i32) -> (i32, i32) {
    %c0_i32 = arith.constant 0 : i32
    %c0_i32_0 = arith.constant 0 : i32
    %c0_i32_1 = arith.constant 0 : i32
    return %c0_i32, %c0_i32_0 : i32, i32
  }
  func.func @transform_2(%arg0: i32) -> (i32, i32) {
    %c0_i32 = arith.constant 0 : i32
    %c0_i32_0 = arith.constant 0 : i32
    %c0_i32_1 = arith.constant 0 : i32
    return %c0_i32, %c0_i32_0 : i32, i32
  }
  func.func @transform_3(%arg0: i32) -> (i32, i32) {
    %c0_i32 = arith.constant 0 : i32
    %c0_i32_0 = arith.constant 0 : i32
    %c0_i32_1 = arith.constant 0 : i32
    return %c0_i32, %c0_i32_0 : i32, i32
  }
  func.func @transform_4(%arg0: i32) -> (i32, i32) {
    %c0_i32 = arith.constant 0 : i32
    %c0_i32_0 = arith.constant 0 : i32
    %c0_i32_1 = arith.constant 0 : i32
    return %c0_i32, %c0_i32_0 : i32, i32
  }
}

module attributes {stable_mosaic.version = 11 : i64} {
  func.func @_gemm_bn_kernel(%arg0: i32, %arg1: memref<16x128xbf16, #tpu.memory_space<vmem>>, %arg2: memref<128x32xbf16, #tpu.memory_space<vmem>>, %arg3: memref<16x1xf32, #tpu.memory_space<vmem>>, %arg4: memref<16x1xf32, #tpu.memory_space<vmem>>, %arg5: memref<16x32xf32, #tpu.memory_space<vmem>>) attributes {dimension_semantics = [#tpu.dimension_semantics<arbitrary>], iteration_bounds = array<i64: 1>, scalar_prefetch = 0 : i64, scratch_operands = 0 : i64, tpu.core_type = #tpu.core_type<tc>, window_params = [{pipeline_mode = #tpu.pipeline_mode<synchronous>, transform_indices = @transform_0, window_bounds = array<i64: 16, 128>}, {pipeline_mode = #tpu.pipeline_mode<synchronous>, transform_indices = @transform_1, window_bounds = array<i64: 128, 32>}, {pipeline_mode = #tpu.pipeline_mode<synchronous>, transform_indices = @transform_2, window_bounds = array<i64: 16, 1>}, {pipeline_mode = #tpu.pipeline_mode<synchronous>, transform_indices = @transform_3, window_bounds = array<i64: 16, 1>}, {pipeline_mode = #tpu.pipeline_mode<synchronous>, transform_indices = @transform_4, window_bounds = array<i64: 16, 32>}]} {
    %c0 = arith.constant 0 : index
    %c0_0 = arith.constant 0 : index
    %0 = vector.load %arg2[%c0, %c0_0] : memref<128x32xbf16, #tpu.memory_space<vmem>>, vector<128x32xbf16>
    %1 = arith.extf %0 : vector<128x32xbf16> to vector<128x32xf32>
    %cst = arith.constant 0.000000e+00 : f32
    %2 = vector.broadcast %cst : f32 to vector<128x32xf32>
    %3 = arith.cmpf oge, %1, %2 : vector<128x32xf32>
    %cst_1 = arith.constant 2.000000e-01 : f32
    %4 = vector.broadcast %cst_1 : f32 to vector<128x32xf32>
    %5 = arith.mulf %4, %1 : vector<128x32xf32>
    %6 = arith.select %3, %1, %5 : vector<128x32xi1>, vector<128x32xf32>
    %7 = arith.truncf %6 : vector<128x32xf32> to vector<128x32xbf16>
    %c0_2 = arith.constant 0 : index
    %c0_3 = arith.constant 0 : index
    %8 = vector.load %arg1[%c0_2, %c0_3] : memref<16x128xbf16, #tpu.memory_space<vmem>>, vector<16x128xbf16>
    %cst_4 = arith.constant dense<0.000000e+00> : vector<16x32xf32>
    %9 = tpu.matmul %8, %7, %cst_4 {dimension_numbers = #tpu.dot_dimension_numbers<[1], [0], [0], [1], [0, 0, 1, 1], [], []>} : vector<16x128xbf16>, vector<128x32xbf16>, vector<16x32xf32> -> vector<16x32xf32>
    %cst_5 = arith.constant dense<0.000000e+00> : vector<16xf32>
    %10 = vector.multi_reduction <add>, %9, %cst_5 [1] : vector<16x32xf32> to vector<16xf32>
    %11 = vector.shape_cast %10 : vector<16xf32> to vector<16x1xf32>
    %cst_6 = arith.constant 3.200000e+01 : f32
    %12 = vector.broadcast %cst_6 : f32 to vector<16x1xf32>
    %13 = arith.divf %11, %12 : vector<16x1xf32>
    %14 = vector.broadcast %13 : vector<16x1xf32> to vector<16x32xf32>
    %15 = arith.subf %9, %14 : vector<16x32xf32>
    %16 = arith.mulf %15, %15 : vector<16x32xf32>
    %cst_7 = arith.constant dense<0.000000e+00> : vector<16xf32>
    %17 = vector.multi_reduction <add>, %16, %cst_7 [1] : vector<16x32xf32> to vector<16xf32>
    %18 = vector.shape_cast %17 : vector<16xf32> to vector<16x1xf32>
    %cst_8 = arith.constant 3.200000e+01 : f32
    %19 = vector.broadcast %cst_8 : f32 to vector<16x1xf32>
    %20 = arith.divf %18, %19 : vector<16x1xf32>
    %21 = vector.broadcast %13 : vector<16x1xf32> to vector<16x32xf32>
    %22 = arith.subf %9, %21 : vector<16x32xf32>
    %cst_9 = arith.constant 9.99999974E-6 : f32
    %23 = vector.broadcast %cst_9 : f32 to vector<16x1xf32>
    %24 = arith.addf %20, %23 : vector<16x1xf32>
    %25 = math.rsqrt %24 : vector<16x1xf32>
    %26 = vector.broadcast %25 : vector<16x1xf32> to vector<16x32xf32>
    %27 = arith.mulf %22, %26 : vector<16x32xf32>
    %c0_10 = arith.constant 0 : index
    %c0_11 = arith.constant 0 : index
    %28 = vector.load %arg3[%c0_10, %c0_11] : memref<16x1xf32, #tpu.memory_space<vmem>>, vector<16x1xf32>
    %29 = vector.broadcast %28 : vector<16x1xf32> to vector<16x32xf32>
    %30 = arith.mulf %27, %29 : vector<16x32xf32>
    %c0_12 = arith.constant 0 : index
    %c0_13 = arith.constant 0 : index
    %31 = vector.load %arg4[%c0_12, %c0_13] : memref<16x1xf32, #tpu.memory_space<vmem>>, vector<16x1xf32>
    %32 = vector.broadcast %31 : vector<16x1xf32> to vector<16x32xf32>
    %33 = arith.addf %30, %32 : vector<16x32xf32>
    %c0_14 = arith.constant 0 : index
    %c0_15 = arith.constant 0 : index
    %34 = vector.load %arg5[%c0_14, %c0_15] : memref<16x32xf32, #tpu.memory_space<vmem>>, vector<16x32xf32>
    tpu.vector_store %arg5[%c0_14, %c0_15], %33 {strides = array<i32>} : memref<16x32xf32, #tpu.memory_space<vmem>>, vector<16x32xf32>,
    return
  }
  func.func @transform_0(%arg0: i32) -> (i32, i32) {
    %c0_i32 = arith.constant 0 : i32
    %c0_i32_0 = arith.constant 0 : i32
    %c0_i32_1 = arith.constant 0 : i32
    return %c0_i32, %c0_i32_0 : i32, i32
  }
  func.func @transform_1(%arg0: i32) -> (i32, i32) {
    %c0_i32 = arith.constant 0 : i32
    %c0_i32_0 = arith.constant 0 : i32
    %c0_i32_1 = arith.constant 0 : i32
    return %c0_i32, %c0_i32_0 : i32, i32
  }
  func.func @transform_2(%arg0: i32) -> (i32, i32) {
    %c0_i32 = arith.constant 0 : i32
    %c0_i32_0 = arith.constant 0 : i32
    %c0_i32_1 = arith.constant 0 : i32
    return %c0_i32, %c0_i32_0 : i32, i32
  }
  func.func @transform_3(%arg0: i32) -> (i32, i32) {
    %c0_i32 = arith.constant 0 : i32
    %c0_i32_0 = arith.constant 0 : i32
    %c0_i32_1 = arith.constant 0 : i32
    return %c0_i32, %c0_i32_0 : i32, i32
  }
  func.func @transform_4(%arg0: i32) -> (i32, i32) {
    %c0_i32 = arith.constant 0 : i32
    %c0_i32_0 = arith.constant 0 : i32
    %c0_i32_1 = arith.constant 0 : i32
    return %c0_i32, %c0_i32_0 : i32, i32
  }
}

module attributes {stable_mosaic.version = 11 : i64} {
  func.func @_gemm_bn_kernel(%arg0: i32, %arg1: memref<32x256xbf16, #tpu.memory_space<vmem>>, %arg2: memref<256x8xbf16, #tpu.memory_space<vmem>>, %arg3: memref<32x1xf32, #tpu.memory_space<vmem>>, %arg4: memref<32x1xf32, #tpu.memory_space<vmem>>, %arg5: memref<32x8xf32, #tpu.memory_space<vmem>>) attributes {dimension_semantics = [#tpu.dimension_semantics<arbitrary>], iteration_bounds = array<i64: 1>, scalar_prefetch = 0 : i64, scratch_operands = 0 : i64, tpu.core_type = #tpu.core_type<tc>, window_params = [{pipeline_mode = #tpu.pipeline_mode<synchronous>, transform_indices = @transform_0, window_bounds = array<i64: 32, 256>}, {pipeline_mode = #tpu.pipeline_mode<synchronous>, transform_indices = @transform_1, window_bounds = array<i64: 256, 8>}, {pipeline_mode = #tpu.pipeline_mode<synchronous>, transform_indices = @transform_2, window_bounds = array<i64: 32, 1>}, {pipeline_mode = #tpu.pipeline_mode<synchronous>, transform_indices = @transform_3, window_bounds = array<i64: 32, 1>}, {pipeline_mode = #tpu.pipeline_mode<synchronous>, transform_indices = @transform_4, window_bounds = array<i64: 32, 8>}]} {
    %c0 = arith.constant 0 : index
    %c0_0 = arith.constant 0 : index
    %0 = vector.load %arg2[%c0, %c0_0] : memref<256x8xbf16, #tpu.memory_space<vmem>>, vector<256x8xbf16>
    %1 = arith.extf %0 : vector<256x8xbf16> to vector<256x8xf32>
    %cst = arith.constant 0.000000e+00 : f32
    %2 = vector.broadcast %cst : f32 to vector<256x8xf32>
    %3 = arith.cmpf oge, %1, %2 : vector<256x8xf32>
    %cst_1 = arith.constant 2.000000e-01 : f32
    %4 = vector.broadcast %cst_1 : f32 to vector<256x8xf32>
    %5 = arith.mulf %4, %1 : vector<256x8xf32>
    %6 = arith.select %3, %1, %5 : vector<256x8xi1>, vector<256x8xf32>
    %7 = arith.truncf %6 : vector<256x8xf32> to vector<256x8xbf16>
    %c0_2 = arith.constant 0 : index
    %c0_3 = arith.constant 0 : index
    %8 = vector.load %arg1[%c0_2, %c0_3] : memref<32x256xbf16, #tpu.memory_space<vmem>>, vector<32x256xbf16>
    %cst_4 = arith.constant dense<0.000000e+00> : vector<32x8xf32>
    %9 = tpu.matmul %8, %7, %cst_4 {dimension_numbers = #tpu.dot_dimension_numbers<[1], [0], [0], [1], [0, 0, 1, 1], [], []>} : vector<32x256xbf16>, vector<256x8xbf16>, vector<32x8xf32> -> vector<32x8xf32>
    %cst_5 = arith.constant dense<0.000000e+00> : vector<32xf32>
    %10 = vector.multi_reduction <add>, %9, %cst_5 [1] : vector<32x8xf32> to vector<32xf32>
    %11 = vector.shape_cast %10 : vector<32xf32> to vector<32x1xf32>
    %cst_6 = arith.constant 8.000000e+00 : f32
    %12 = vector.broadcast %cst_6 : f32 to vector<32x1xf32>
    %13 = arith.divf %11, %12 : vector<32x1xf32>
    %14 = vector.broadcast %13 : vector<32x1xf32> to vector<32x8xf32>
    %15 = arith.subf %9, %14 : vector<32x8xf32>
    %16 = arith.mulf %15, %15 : vector<32x8xf32>
    %cst_7 = arith.constant dense<0.000000e+00> : vector<32xf32>
    %17 = vector.multi_reduction <add>, %16, %cst_7 [1] : vector<32x8xf32> to vector<32xf32>
    %18 = vector.shape_cast %17 : vector<32xf32> to vector<32x1xf32>
    %cst_8 = arith.constant 8.000000e+00 : f32
    %19 = vector.broadcast %cst_8 : f32 to vector<32x1xf32>
    %20 = arith.divf %18, %19 : vector<32x1xf32>
    %21 = vector.broadcast %13 : vector<32x1xf32> to vector<32x8xf32>
    %22 = arith.subf %9, %21 : vector<32x8xf32>
    %cst_9 = arith.constant 9.99999974E-6 : f32
    %23 = vector.broadcast %cst_9 : f32 to vector<32x1xf32>
    %24 = arith.addf %20, %23 : vector<32x1xf32>
    %25 = math.rsqrt %24 : vector<32x1xf32>
    %26 = vector.broadcast %25 : vector<32x1xf32> to vector<32x8xf32>
    %27 = arith.mulf %22, %26 : vector<32x8xf32>
    %c0_10 = arith.constant 0 : index
    %c0_11 = arith.constant 0 : index
    %28 = vector.load %arg3[%c0_10, %c0_11] : memref<32x1xf32, #tpu.memory_space<vmem>>, vector<32x1xf32>
    %29 = vector.broadcast %28 : vector<32x1xf32> to vector<32x8xf32>
    %30 = arith.mulf %27, %29 : vector<32x8xf32>
    %c0_12 = arith.constant 0 : index
    %c0_13 = arith.constant 0 : index
    %31 = vector.load %arg4[%c0_12, %c0_13] : memref<32x1xf32, #tpu.memory_space<vmem>>, vector<32x1xf32>
    %32 = vector.broadcast %31 : vector<32x1xf32> to vector<32x8xf32>
    %33 = arith.addf %30, %32 : vector<32x8xf32>
    %c0_14 = arith.constant 0 : index
    %c0_15 = arith.constant 0 : index
    %34 = vector.load %arg5[%c0_14, %c0_15] : memref<32x8xf32, #tpu.memory_space<vmem>>, vector<32x8xf32>
    tpu.vector_store %arg5[%c0_14, %c0_15], %33 {strides = array<i32>} : memref<32x8xf32, #tpu.memory_space<vmem>>, vector<32x8xf32>,
    return
  }
  func.func @transform_0(%arg0: i32) -> (i32, i32) {
    %c0_i32 = arith.constant 0 : i32
    %c0_i32_0 = arith.constant 0 : i32
    %c0_i32_1 = arith.constant 0 : i32
    return %c0_i32, %c0_i32_0 : i32, i32
  }
  func.func @transform_1(%arg0: i32) -> (i32, i32) {
    %c0_i32 = arith.constant 0 : i32
    %c0_i32_0 = arith.constant 0 : i32
    %c0_i32_1 = arith.constant 0 : i32
    return %c0_i32, %c0_i32_0 : i32, i32
  }
  func.func @transform_2(%arg0: i32) -> (i32, i32) {
    %c0_i32 = arith.constant 0 : i32
    %c0_i32_0 = arith.constant 0 : i32
    %c0_i32_1 = arith.constant 0 : i32
    return %c0_i32, %c0_i32_0 : i32, i32
  }
  func.func @transform_3(%arg0: i32) -> (i32, i32) {
    %c0_i32 = arith.constant 0 : i32
    %c0_i32_0 = arith.constant 0 : i32
    %c0_i32_1 = arith.constant 0 : i32
    return %c0_i32, %c0_i32_0 : i32, i32
  }
  func.func @transform_4(%arg0: i32) -> (i32, i32) {
    %c0_i32 = arith.constant 0 : i32
    %c0_i32_0 = arith.constant 0 : i32
    %c0_i32_1 = arith.constant 0 : i32
    return %c0_i32, %c0_i32_0 : i32, i32
  }
}

module attributes {stable_mosaic.version = 11 : i64} {
  func.func @_gemm_kernel(%arg0: i32, %arg1: memref<32x512xbf16, #tpu.memory_space<vmem>>, %arg2: memref<512x2xbf16, #tpu.memory_space<vmem>>, %arg3: memref<32x1xf32, #tpu.memory_space<vmem>>, %arg4: memref<32x2xf32, #tpu.memory_space<vmem>>) attributes {dimension_semantics = [#tpu.dimension_semantics<parallel>], iteration_bounds = array<i64: 1>, scalar_prefetch = 0 : i64, scratch_operands = 0 : i64, tpu.core_type = #tpu.core_type<tc>, window_params = [{pipeline_mode = #tpu.pipeline_mode<synchronous>, transform_indices = @transform_0, window_bounds = array<i64: 32, 512>}, {transform_indices = @transform_1, window_bounds = array<i64: 512, 2>}, {pipeline_mode = #tpu.pipeline_mode<synchronous>, transform_indices = @transform_2, window_bounds = array<i64: 32, 1>}, {transform_indices = @transform_3, window_bounds = array<i64: 32, 2>}]} {
    %c0 = arith.constant 0 : index
    %c0_0 = arith.constant 0 : index
    %0 = vector.load %arg2[%c0, %c0_0] : memref<512x2xbf16, #tpu.memory_space<vmem>>, vector<512x2xbf16>
    %1 = arith.extf %0 : vector<512x2xbf16> to vector<512x2xf32>
    %cst = arith.constant 0.000000e+00 : f32
    %2 = vector.broadcast %cst : f32 to vector<512x2xf32>
    %3 = arith.cmpf oge, %1, %2 : vector<512x2xf32>
    %cst_1 = arith.constant 2.000000e-01 : f32
    %4 = vector.broadcast %cst_1 : f32 to vector<512x2xf32>
    %5 = arith.mulf %4, %1 : vector<512x2xf32>
    %6 = arith.select %3, %1, %5 : vector<512x2xi1>, vector<512x2xf32>
    %7 = arith.truncf %6 : vector<512x2xf32> to vector<512x2xbf16>
    %c0_2 = arith.constant 0 : index
    %c0_3 = arith.constant 0 : index
    %8 = vector.load %arg1[%c0_2, %c0_3] : memref<32x512xbf16, #tpu.memory_space<vmem>>, vector<32x512xbf16>
    %cst_4 = arith.constant dense<0.000000e+00> : vector<32x2xf32>
    %9 = tpu.matmul %8, %7, %cst_4 {dimension_numbers = #tpu.dot_dimension_numbers<[1], [0], [0], [1], [0, 0, 1, 1], [], []>} : vector<32x512xbf16>, vector<512x2xbf16>, vector<32x2xf32> -> vector<32x2xf32>
    %c0_5 = arith.constant 0 : index
    %c0_6 = arith.constant 0 : index
    %10 = vector.load %arg3[%c0_5, %c0_6] : memref<32x1xf32, #tpu.memory_space<vmem>>, vector<32x1xf32>
    %11 = vector.broadcast %10 : vector<32x1xf32> to vector<32x2xf32>
    %12 = arith.addf %9, %11 : vector<32x2xf32>
    %c0_7 = arith.constant 0 : index
    %c0_8 = arith.constant 0 : index
    %13 = vector.load %arg4[%c0_7, %c0_8] : memref<32x2xf32, #tpu.memory_space<vmem>>, vector<32x2xf32>
    tpu.vector_store %arg4[%c0_7, %c0_8], %12 {strides = array<i32>} : memref<32x2xf32, #tpu.memory_space<vmem>>, vector<32x2xf32>,
    return
  }
  func.func @transform_0(%arg0: i32) -> (i32, i32) {
    %c0_i32 = arith.constant 0 : i32
    %c0_i32_0 = arith.constant 0 : i32
    %c0_i32_1 = arith.constant 0 : i32
    return %c0_i32, %c0_i32_0 : i32, i32
  }
  func.func @transform_1(%arg0: i32) -> (i32, i32) {
    %c0_i32 = arith.constant 0 : i32
    %c0_i32_0 = arith.constant 0 : i32
    return %c0_i32, %arg0 : i32, i32
  }
  func.func @transform_2(%arg0: i32) -> (i32, i32) {
    %c0_i32 = arith.constant 0 : i32
    %c0_i32_0 = arith.constant 0 : i32
    %c0_i32_1 = arith.constant 0 : i32
    return %c0_i32, %c0_i32_0 : i32, i32
  }
  func.func @transform_3(%arg0: i32) -> (i32, i32) {
    %c0_i32 = arith.constant 0 : i32
    %c0_i32_0 = arith.constant 0 : i32
    return %c0_i32, %arg0 : i32, i32
  }
}

module attributes {stable_mosaic.version = 11 : i64} {
  func.func @_gemm_bn_kernel(%arg0: i32, %arg1: memref<32x512xbf16, #tpu.memory_space<vmem>>, %arg2: memref<512x8xbf16, #tpu.memory_space<vmem>>, %arg3: memref<32x1xf32, #tpu.memory_space<vmem>>, %arg4: memref<32x1xf32, #tpu.memory_space<vmem>>, %arg5: memref<32x8xf32, #tpu.memory_space<vmem>>) attributes {dimension_semantics = [#tpu.dimension_semantics<arbitrary>], iteration_bounds = array<i64: 1>, scalar_prefetch = 0 : i64, scratch_operands = 0 : i64, tpu.core_type = #tpu.core_type<tc>, window_params = [{pipeline_mode = #tpu.pipeline_mode<synchronous>, transform_indices = @transform_0, window_bounds = array<i64: 32, 512>}, {pipeline_mode = #tpu.pipeline_mode<synchronous>, transform_indices = @transform_1, window_bounds = array<i64: 512, 8>}, {pipeline_mode = #tpu.pipeline_mode<synchronous>, transform_indices = @transform_2, window_bounds = array<i64: 32, 1>}, {pipeline_mode = #tpu.pipeline_mode<synchronous>, transform_indices = @transform_3, window_bounds = array<i64: 32, 1>}, {pipeline_mode = #tpu.pipeline_mode<synchronous>, transform_indices = @transform_4, window_bounds = array<i64: 32, 8>}]} {
    %c0 = arith.constant 0 : index
    %c0_0 = arith.constant 0 : index
    %0 = vector.load %arg2[%c0, %c0_0] : memref<512x8xbf16, #tpu.memory_space<vmem>>, vector<512x8xbf16>
    %1 = arith.extf %0 : vector<512x8xbf16> to vector<512x8xf32>
    %cst = arith.constant 0.000000e+00 : f32
    %2 = vector.broadcast %cst : f32 to vector<512x8xf32>
    %3 = arith.maximumf %1, %2 : vector<512x8xf32>
    %4 = arith.truncf %3 : vector<512x8xf32> to vector<512x8xbf16>
    %c0_1 = arith.constant 0 : index
    %c0_2 = arith.constant 0 : index
    %5 = vector.load %arg1[%c0_1, %c0_2] : memref<32x512xbf16, #tpu.memory_space<vmem>>, vector<32x512xbf16>
    %cst_3 = arith.constant dense<0.000000e+00> : vector<32x8xf32>
    %6 = tpu.matmul %5, %4, %cst_3 {dimension_numbers = #tpu.dot_dimension_numbers<[1], [0], [0], [1], [0, 0, 1, 1], [], []>} : vector<32x512xbf16>, vector<512x8xbf16>, vector<32x8xf32> -> vector<32x8xf32>
    %cst_4 = arith.constant dense<0.000000e+00> : vector<32xf32>
    %7 = vector.multi_reduction <add>, %6, %cst_4 [1] : vector<32x8xf32> to vector<32xf32>
    %8 = vector.shape_cast %7 : vector<32xf32> to vector<32x1xf32>
    %cst_5 = arith.constant 8.000000e+00 : f32
    %9 = vector.broadcast %cst_5 : f32 to vector<32x1xf32>
    %10 = arith.divf %8, %9 : vector<32x1xf32>
    %11 = vector.broadcast %10 : vector<32x1xf32> to vector<32x8xf32>
    %12 = arith.subf %6, %11 : vector<32x8xf32>
    %13 = arith.mulf %12, %12 : vector<32x8xf32>
    %cst_6 = arith.constant dense<0.000000e+00> : vector<32xf32>
    %14 = vector.multi_reduction <add>, %13, %cst_6 [1] : vector<32x8xf32> to vector<32xf32>
    %15 = vector.shape_cast %14 : vector<32xf32> to vector<32x1xf32>
    %cst_7 = arith.constant 8.000000e+00 : f32
    %16 = vector.broadcast %cst_7 : f32 to vector<32x1xf32>
    %17 = arith.divf %15, %16 : vector<32x1xf32>
    %18 = vector.broadcast %10 : vector<32x1xf32> to vector<32x8xf32>
    %19 = arith.subf %6, %18 : vector<32x8xf32>
    %cst_8 = arith.constant 9.99999974E-6 : f32
    %20 = vector.broadcast %cst_8 : f32 to vector<32x1xf32>
    %21 = arith.addf %17, %20 : vector<32x1xf32>
    %22 = math.rsqrt %21 : vector<32x1xf32>
    %23 = vector.broadcast %22 : vector<32x1xf32> to vector<32x8xf32>
    %24 = arith.mulf %19, %23 : vector<32x8xf32>
    %c0_9 = arith.constant 0 : index
    %c0_10 = arith.constant 0 : index
    %25 = vector.load %arg3[%c0_9, %c0_10] : memref<32x1xf32, #tpu.memory_space<vmem>>, vector<32x1xf32>
    %26 = vector.broadcast %25 : vector<32x1xf32> to vector<32x8xf32>
    %27 = arith.mulf %24, %26 : vector<32x8xf32>
    %c0_11 = arith.constant 0 : index
    %c0_12 = arith.constant 0 : index
    %28 = vector.load %arg4[%c0_11, %c0_12] : memref<32x1xf32, #tpu.memory_space<vmem>>, vector<32x1xf32>
    %29 = vector.broadcast %28 : vector<32x1xf32> to vector<32x8xf32>
    %30 = arith.addf %27, %29 : vector<32x8xf32>
    %c0_13 = arith.constant 0 : index
    %c0_14 = arith.constant 0 : index
    %31 = vector.load %arg5[%c0_13, %c0_14] : memref<32x8xf32, #tpu.memory_space<vmem>>, vector<32x8xf32>
    tpu.vector_store %arg5[%c0_13, %c0_14], %30 {strides = array<i32>} : memref<32x8xf32, #tpu.memory_space<vmem>>, vector<32x8xf32>,
    return
  }
  func.func @transform_0(%arg0: i32) -> (i32, i32) {
    %c0_i32 = arith.constant 0 : i32
    %c0_i32_0 = arith.constant 0 : i32
    %c0_i32_1 = arith.constant 0 : i32
    return %c0_i32, %c0_i32_0 : i32, i32
  }
  func.func @transform_1(%arg0: i32) -> (i32, i32) {
    %c0_i32 = arith.constant 0 : i32
    %c0_i32_0 = arith.constant 0 : i32
    %c0_i32_1 = arith.constant 0 : i32
    return %c0_i32, %c0_i32_0 : i32, i32
  }
  func.func @transform_2(%arg0: i32) -> (i32, i32) {
    %c0_i32 = arith.constant 0 : i32
    %c0_i32_0 = arith.constant 0 : i32
    %c0_i32_1 = arith.constant 0 : i32
    return %c0_i32, %c0_i32_0 : i32, i32
  }
  func.func @transform_3(%arg0: i32) -> (i32, i32) {
    %c0_i32 = arith.constant 0 : i32
    %c0_i32_0 = arith.constant 0 : i32
    %c0_i32_1 = arith.constant 0 : i32
    return %c0_i32, %c0_i32_0 : i32, i32
  }
  func.func @transform_4(%arg0: i32) -> (i32, i32) {
    %c0_i32 = arith.constant 0 : i32
    %c0_i32_0 = arith.constant 0 : i32
    %c0_i32_1 = arith.constant 0 : i32
    return %c0_i32, %c0_i32_0 : i32, i32
  }
}

module attributes {stable_mosaic.version = 11 : i64} {
  func.func @_gemm_bn_kernel(%arg0: i32, %arg1: memref<16x1024xbf16, #tpu.memory_space<vmem>>, %arg2: memref<1024x32xbf16, #tpu.memory_space<vmem>>, %arg3: memref<16x1xf32, #tpu.memory_space<vmem>>, %arg4: memref<16x1xf32, #tpu.memory_space<vmem>>, %arg5: memref<16x32xf32, #tpu.memory_space<vmem>>) attributes {dimension_semantics = [#tpu.dimension_semantics<arbitrary>], iteration_bounds = array<i64: 1>, scalar_prefetch = 0 : i64, scratch_operands = 0 : i64, tpu.core_type = #tpu.core_type<tc>, window_params = [{pipeline_mode = #tpu.pipeline_mode<synchronous>, transform_indices = @transform_0, window_bounds = array<i64: 16, 1024>}, {pipeline_mode = #tpu.pipeline_mode<synchronous>, transform_indices = @transform_1, window_bounds = array<i64: 1024, 32>}, {pipeline_mode = #tpu.pipeline_mode<synchronous>, transform_indices = @transform_2, window_bounds = array<i64: 16, 1>}, {pipeline_mode = #tpu.pipeline_mode<synchronous>, transform_indices = @transform_3, window_bounds = array<i64: 16, 1>}, {pipeline_mode = #tpu.pipeline_mode<synchronous>, transform_indices = @transform_4, window_bounds = array<i64: 16, 32>}]} {
    %c0 = arith.constant 0 : index
    %c0_0 = arith.constant 0 : index
    %0 = vector.load %arg2[%c0, %c0_0] : memref<1024x32xbf16, #tpu.memory_space<vmem>>, vector<1024x32xbf16>
    %1 = arith.extf %0 : vector<1024x32xbf16> to vector<1024x32xf32>
    %cst = arith.constant 0.000000e+00 : f32
    %2 = vector.broadcast %cst : f32 to vector<1024x32xf32>
    %3 = arith.maximumf %1, %2 : vector<1024x32xf32>
    %4 = arith.truncf %3 : vector<1024x32xf32> to vector<1024x32xbf16>
    %c0_1 = arith.constant 0 : index
    %c0_2 = arith.constant 0 : index
    %5 = vector.load %arg1[%c0_1, %c0_2] : memref<16x1024xbf16, #tpu.memory_space<vmem>>, vector<16x1024xbf16>
    %cst_3 = arith.constant dense<0.000000e+00> : vector<16x32xf32>
    %6 = tpu.matmul %5, %4, %cst_3 {dimension_numbers = #tpu.dot_dimension_numbers<[1], [0], [0], [1], [0, 0, 1, 1], [], []>} : vector<16x1024xbf16>, vector<1024x32xbf16>, vector<16x32xf32> -> vector<16x32xf32>
    %cst_4 = arith.constant dense<0.000000e+00> : vector<16xf32>
    %7 = vector.multi_reduction <add>, %6, %cst_4 [1] : vector<16x32xf32> to vector<16xf32>
    %8 = vector.shape_cast %7 : vector<16xf32> to vector<16x1xf32>
    %cst_5 = arith.constant 3.200000e+01 : f32
    %9 = vector.broadcast %cst_5 : f32 to vector<16x1xf32>
    %10 = arith.divf %8, %9 : vector<16x1xf32>
    %11 = vector.broadcast %10 : vector<16x1xf32> to vector<16x32xf32>
    %12 = arith.subf %6, %11 : vector<16x32xf32>
    %13 = arith.mulf %12, %12 : vector<16x32xf32>
    %cst_6 = arith.constant dense<0.000000e+00> : vector<16xf32>
    %14 = vector.multi_reduction <add>, %13, %cst_6 [1] : vector<16x32xf32> to vector<16xf32>
    %15 = vector.shape_cast %14 : vector<16xf32> to vector<16x1xf32>
    %cst_7 = arith.constant 3.200000e+01 : f32
    %16 = vector.broadcast %cst_7 : f32 to vector<16x1xf32>
    %17 = arith.divf %15, %16 : vector<16x1xf32>
    %18 = vector.broadcast %10 : vector<16x1xf32> to vector<16x32xf32>
    %19 = arith.subf %6, %18 : vector<16x32xf32>
    %cst_8 = arith.constant 9.99999974E-6 : f32
    %20 = vector.broadcast %cst_8 : f32 to vector<16x1xf32>
    %21 = arith.addf %17, %20 : vector<16x1xf32>
    %22 = math.rsqrt %21 : vector<16x1xf32>
    %23 = vector.broadcast %22 : vector<16x1xf32> to vector<16x32xf32>
    %24 = arith.mulf %19, %23 : vector<16x32xf32>
    %c0_9 = arith.constant 0 : index
    %c0_10 = arith.constant 0 : index
    %25 = vector.load %arg3[%c0_9, %c0_10] : memref<16x1xf32, #tpu.memory_space<vmem>>, vector<16x1xf32>
    %26 = vector.broadcast %25 : vector<16x1xf32> to vector<16x32xf32>
    %27 = arith.mulf %24, %26 : vector<16x32xf32>
    %c0_11 = arith.constant 0 : index
    %c0_12 = arith.constant 0 : index
    %28 = vector.load %arg4[%c0_11, %c0_12] : memref<16x1xf32, #tpu.memory_space<vmem>>, vector<16x1xf32>
    %29 = vector.broadcast %28 : vector<16x1xf32> to vector<16x32xf32>
    %30 = arith.addf %27, %29 : vector<16x32xf32>
    %c0_13 = arith.constant 0 : index
    %c0_14 = arith.constant 0 : index
    %31 = vector.load %arg5[%c0_13, %c0_14] : memref<16x32xf32, #tpu.memory_space<vmem>>, vector<16x32xf32>
    tpu.vector_store %arg5[%c0_13, %c0_14], %30 {strides = array<i32>} : memref<16x32xf32, #tpu.memory_space<vmem>>, vector<16x32xf32>,
    return
  }
  func.func @transform_0(%arg0: i32) -> (i32, i32) {
    %c0_i32 = arith.constant 0 : i32
    %c0_i32_0 = arith.constant 0 : i32
    %c0_i32_1 = arith.constant 0 : i32
    return %c0_i32, %c0_i32_0 : i32, i32
  }
  func.func @transform_1(%arg0: i32) -> (i32, i32) {
    %c0_i32 = arith.constant 0 : i32
    %c0_i32_0 = arith.constant 0 : i32
    %c0_i32_1 = arith.constant 0 : i32
    return %c0_i32, %c0_i32_0 : i32, i32
  }
  func.func @transform_2(%arg0: i32) -> (i32, i32) {
    %c0_i32 = arith.constant 0 : i32
    %c0_i32_0 = arith.constant 0 : i32
    %c0_i32_1 = arith.constant 0 : i32
    return %c0_i32, %c0_i32_0 : i32, i32
  }
  func.func @transform_3(%arg0: i32) -> (i32, i32) {
    %c0_i32 = arith.constant 0 : i32
    %c0_i32_0 = arith.constant 0 : i32
    %c0_i32_1 = arith.constant 0 : i32
    return %c0_i32, %c0_i32_0 : i32, i32
  }
  func.func @transform_4(%arg0: i32) -> (i32, i32) {
    %c0_i32 = arith.constant 0 : i32
    %c0_i32_0 = arith.constant 0 : i32
    %c0_i32_1 = arith.constant 0 : i32
    return %c0_i32, %c0_i32_0 : i32, i32
  }
}

module attributes {stable_mosaic.version = 11 : i64} {
  func.func @_gemm_bn_kernel(%arg0: i32, %arg1: memref<8x512xbf16, #tpu.memory_space<vmem>>, %arg2: memref<512x128xbf16, #tpu.memory_space<vmem>>, %arg3: memref<8x1xf32, #tpu.memory_space<vmem>>, %arg4: memref<8x1xf32, #tpu.memory_space<vmem>>, %arg5: memref<8x128xf32, #tpu.memory_space<vmem>>) attributes {dimension_semantics = [#tpu.dimension_semantics<arbitrary>], iteration_bounds = array<i64: 1>, scalar_prefetch = 0 : i64, scratch_operands = 0 : i64, tpu.core_type = #tpu.core_type<tc>, window_params = [{pipeline_mode = #tpu.pipeline_mode<synchronous>, transform_indices = @transform_0, window_bounds = array<i64: 8, 512>}, {pipeline_mode = #tpu.pipeline_mode<synchronous>, transform_indices = @transform_1, window_bounds = array<i64: 512, 128>}, {pipeline_mode = #tpu.pipeline_mode<synchronous>, transform_indices = @transform_2, window_bounds = array<i64: 8, 1>}, {pipeline_mode = #tpu.pipeline_mode<synchronous>, transform_indices = @transform_3, window_bounds = array<i64: 8, 1>}, {pipeline_mode = #tpu.pipeline_mode<synchronous>, transform_indices = @transform_4, window_bounds = array<i64: 8, 128>}]} {
    %c0 = arith.constant 0 : index
    %c0_0 = arith.constant 0 : index
    %0 = vector.load %arg2[%c0, %c0_0] : memref<512x128xbf16, #tpu.memory_space<vmem>>, vector<512x128xbf16>
    %1 = arith.extf %0 : vector<512x128xbf16> to vector<512x128xf32>
    %cst = arith.constant 0.000000e+00 : f32
    %2 = vector.broadcast %cst : f32 to vector<512x128xf32>
    %3 = arith.maximumf %1, %2 : vector<512x128xf32>
    %4 = arith.truncf %3 : vector<512x128xf32> to vector<512x128xbf16>
    %c0_1 = arith.constant 0 : index
    %c0_2 = arith.constant 0 : index
    %5 = vector.load %arg1[%c0_1, %c0_2] : memref<8x512xbf16, #tpu.memory_space<vmem>>, vector<8x512xbf16>
    %cst_3 = arith.constant dense<0.000000e+00> : vector<8x128xf32>
    %6 = tpu.matmul %5, %4, %cst_3 {dimension_numbers = #tpu.dot_dimension_numbers<[1], [0], [0], [1], [0, 0, 1, 1], [], []>} : vector<8x512xbf16>, vector<512x128xbf16>, vector<8x128xf32> -> vector<8x128xf32>
    %cst_4 = arith.constant dense<0.000000e+00> : vector<8xf32>
    %7 = vector.multi_reduction <add>, %6, %cst_4 [1] : vector<8x128xf32> to vector<8xf32>
    %8 = vector.shape_cast %7 : vector<8xf32> to vector<8x1xf32>
    %cst_5 = arith.constant 1.280000e+02 : f32
    %9 = vector.broadcast %cst_5 : f32 to vector<8x1xf32>
    %10 = arith.divf %8, %9 : vector<8x1xf32>
    %11 = vector.broadcast %10 : vector<8x1xf32> to vector<8x128xf32>
    %12 = arith.subf %6, %11 : vector<8x128xf32>
    %13 = arith.mulf %12, %12 : vector<8x128xf32>
    %cst_6 = arith.constant dense<0.000000e+00> : vector<8xf32>
    %14 = vector.multi_reduction <add>, %13, %cst_6 [1] : vector<8x128xf32> to vector<8xf32>
    %15 = vector.shape_cast %14 : vector<8xf32> to vector<8x1xf32>
    %cst_7 = arith.constant 1.280000e+02 : f32
    %16 = vector.broadcast %cst_7 : f32 to vector<8x1xf32>
    %17 = arith.divf %15, %16 : vector<8x1xf32>
    %18 = vector.broadcast %10 : vector<8x1xf32> to vector<8x128xf32>
    %19 = arith.subf %6, %18 : vector<8x128xf32>
    %cst_8 = arith.constant 9.99999974E-6 : f32
    %20 = vector.broadcast %cst_8 : f32 to vector<8x1xf32>
    %21 = arith.addf %17, %20 : vector<8x1xf32>
    %22 = math.rsqrt %21 : vector<8x1xf32>
    %23 = vector.broadcast %22 : vector<8x1xf32> to vector<8x128xf32>
    %24 = arith.mulf %19, %23 : vector<8x128xf32>
    %c0_9 = arith.constant 0 : index
    %c0_10 = arith.constant 0 : index
    %25 = vector.load %arg3[%c0_9, %c0_10] : memref<8x1xf32, #tpu.memory_space<vmem>>, vector<8x1xf32>
    %26 = vector.broadcast %25 : vector<8x1xf32> to vector<8x128xf32>
    %27 = arith.mulf %24, %26 : vector<8x128xf32>
    %c0_11 = arith.constant 0 : index
    %c0_12 = arith.constant 0 : index
    %28 = vector.load %arg4[%c0_11, %c0_12] : memref<8x1xf32, #tpu.memory_space<vmem>>, vector<8x1xf32>
    %29 = vector.broadcast %28 : vector<8x1xf32> to vector<8x128xf32>
    %30 = arith.addf %27, %29 : vector<8x128xf32>
    %c0_13 = arith.constant 0 : index
    %c0_14 = arith.constant 0 : index
    %31 = vector.load %arg5[%c0_13, %c0_14] : memref<8x128xf32, #tpu.memory_space<vmem>>, vector<8x128xf32>
    tpu.vector_store %arg5[%c0_13, %c0_14], %30 {strides = array<i32>} : memref<8x128xf32, #tpu.memory_space<vmem>>, vector<8x128xf32>,
    return
  }
  func.func @transform_0(%arg0: i32) -> (i32, i32) {
    %c0_i32 = arith.constant 0 : i32
    %c0_i32_0 = arith.constant 0 : i32
    %c0_i32_1 = arith.constant 0 : i32
    return %c0_i32, %c0_i32_0 : i32, i32
  }
  func.func @transform_1(%arg0: i32) -> (i32, i32) {
    %c0_i32 = arith.constant 0 : i32
    %c0_i32_0 = arith.constant 0 : i32
    %c0_i32_1 = arith.constant 0 : i32
    return %c0_i32, %c0_i32_0 : i32, i32
  }
  func.func @transform_2(%arg0: i32) -> (i32, i32) {
    %c0_i32 = arith.constant 0 : i32
    %c0_i32_0 = arith.constant 0 : i32
    %c0_i32_1 = arith.constant 0 : i32
    return %c0_i32, %c0_i32_0 : i32, i32
  }
  func.func @transform_3(%arg0: i32) -> (i32, i32) {
    %c0_i32 = arith.constant 0 : i32
    %c0_i32_0 = arith.constant 0 : i32
    %c0_i32_1 = arith.constant 0 : i32
    return %c0_i32, %c0_i32_0 : i32, i32
  }
  func.func @transform_4(%arg0: i32) -> (i32, i32) {
    %c0_i32 = arith.constant 0 : i32
    %c0_i32_0 = arith.constant 0 : i32
    %c0_i32_1 = arith.constant 0 : i32
    return %c0_i32, %c0_i32_0 : i32, i32
  }
}

module attributes {stable_mosaic.version = 11 : i64} {
  func.func @_gemm_bn_kernel(%arg0: i32, %arg1: memref<4x256xbf16, #tpu.memory_space<vmem>>, %arg2: memref<256x512xbf16, #tpu.memory_space<vmem>>, %arg3: memref<4x1xf32, #tpu.memory_space<vmem>>, %arg4: memref<4x1xf32, #tpu.memory_space<vmem>>, %arg5: memref<4x512xf32, #tpu.memory_space<vmem>>) attributes {dimension_semantics = [#tpu.dimension_semantics<arbitrary>], iteration_bounds = array<i64: 1>, scalar_prefetch = 0 : i64, scratch_operands = 0 : i64, tpu.core_type = #tpu.core_type<tc>, window_params = [{pipeline_mode = #tpu.pipeline_mode<synchronous>, transform_indices = @transform_0, window_bounds = array<i64: 4, 256>}, {pipeline_mode = #tpu.pipeline_mode<synchronous>, transform_indices = @transform_1, window_bounds = array<i64: 256, 512>}, {pipeline_mode = #tpu.pipeline_mode<synchronous>, transform_indices = @transform_2, window_bounds = array<i64: 4, 1>}, {pipeline_mode = #tpu.pipeline_mode<synchronous>, transform_indices = @transform_3, window_bounds = array<i64: 4, 1>}, {pipeline_mode = #tpu.pipeline_mode<synchronous>, transform_indices = @transform_4, window_bounds = array<i64: 4, 512>}]} {
    %c0 = arith.constant 0 : index
    %c0_0 = arith.constant 0 : index
    %0 = vector.load %arg2[%c0, %c0_0] : memref<256x512xbf16, #tpu.memory_space<vmem>>, vector<256x512xbf16>
    %1 = arith.extf %0 : vector<256x512xbf16> to vector<256x512xf32>
    %cst = arith.constant 0.000000e+00 : f32
    %2 = vector.broadcast %cst : f32 to vector<256x512xf32>
    %3 = arith.maximumf %1, %2 : vector<256x512xf32>
    %4 = arith.truncf %3 : vector<256x512xf32> to vector<256x512xbf16>
    %c0_1 = arith.constant 0 : index
    %c0_2 = arith.constant 0 : index
    %5 = vector.load %arg1[%c0_1, %c0_2] : memref<4x256xbf16, #tpu.memory_space<vmem>>, vector<4x256xbf16>
    %cst_3 = arith.constant dense<0.000000e+00> : vector<4x512xf32>
    %6 = tpu.matmul %5, %4, %cst_3 {dimension_numbers = #tpu.dot_dimension_numbers<[1], [0], [0], [1], [0, 0, 1, 1], [], []>} : vector<4x256xbf16>, vector<256x512xbf16>, vector<4x512xf32> -> vector<4x512xf32>
    %cst_4 = arith.constant dense<0.000000e+00> : vector<4xf32>
    %7 = vector.multi_reduction <add>, %6, %cst_4 [1] : vector<4x512xf32> to vector<4xf32>
    %8 = vector.shape_cast %7 : vector<4xf32> to vector<4x1xf32>
    %cst_5 = arith.constant 5.120000e+02 : f32
    %9 = vector.broadcast %cst_5 : f32 to vector<4x1xf32>
    %10 = arith.divf %8, %9 : vector<4x1xf32>
    %11 = vector.broadcast %10 : vector<4x1xf32> to vector<4x512xf32>
    %12 = arith.subf %6, %11 : vector<4x512xf32>
    %13 = arith.mulf %12, %12 : vector<4x512xf32>
    %cst_6 = arith.constant dense<0.000000e+00> : vector<4xf32>
    %14 = vector.multi_reduction <add>, %13, %cst_6 [1] : vector<4x512xf32> to vector<4xf32>
    %15 = vector.shape_cast %14 : vector<4xf32> to vector<4x1xf32>
    %cst_7 = arith.constant 5.120000e+02 : f32
    %16 = vector.broadcast %cst_7 : f32 to vector<4x1xf32>
    %17 = arith.divf %15, %16 : vector<4x1xf32>
    %18 = vector.broadcast %10 : vector<4x1xf32> to vector<4x512xf32>
    %19 = arith.subf %6, %18 : vector<4x512xf32>
    %cst_8 = arith.constant 9.99999974E-6 : f32
    %20 = vector.broadcast %cst_8 : f32 to vector<4x1xf32>
    %21 = arith.addf %17, %20 : vector<4x1xf32>
    %22 = math.rsqrt %21 : vector<4x1xf32>
    %23 = vector.broadcast %22 : vector<4x1xf32> to vector<4x512xf32>
    %24 = arith.mulf %19, %23 : vector<4x512xf32>
    %c0_9 = arith.constant 0 : index
    %c0_10 = arith.constant 0 : index
    %25 = vector.load %arg3[%c0_9, %c0_10] : memref<4x1xf32, #tpu.memory_space<vmem>>, vector<4x1xf32>
    %26 = vector.broadcast %25 : vector<4x1xf32> to vector<4x512xf32>
    %27 = arith.mulf %24, %26 : vector<4x512xf32>
    %c0_11 = arith.constant 0 : index
    %c0_12 = arith.constant 0 : index
    %28 = vector.load %arg4[%c0_11, %c0_12] : memref<4x1xf32, #tpu.memory_space<vmem>>, vector<4x1xf32>
    %29 = vector.broadcast %28 : vector<4x1xf32> to vector<4x512xf32>
    %30 = arith.addf %27, %29 : vector<4x512xf32>
    %c0_13 = arith.constant 0 : index
    %c0_14 = arith.constant 0 : index
    %31 = vector.load %arg5[%c0_13, %c0_14] : memref<4x512xf32, #tpu.memory_space<vmem>>, vector<4x512xf32>
    tpu.vector_store %arg5[%c0_13, %c0_14], %30 {strides = array<i32>} : memref<4x512xf32, #tpu.memory_space<vmem>>, vector<4x512xf32>,
    return
  }
  func.func @transform_0(%arg0: i32) -> (i32, i32) {
    %c0_i32 = arith.constant 0 : i32
    %c0_i32_0 = arith.constant 0 : i32
    %c0_i32_1 = arith.constant 0 : i32
    return %c0_i32, %c0_i32_0 : i32, i32
  }
  func.func @transform_1(%arg0: i32) -> (i32, i32) {
    %c0_i32 = arith.constant 0 : i32
    %c0_i32_0 = arith.constant 0 : i32
    %c0_i32_1 = arith.constant 0 : i32
    return %c0_i32, %c0_i32_0 : i32, i32
  }
  func.func @transform_2(%arg0: i32) -> (i32, i32) {
    %c0_i32 = arith.constant 0 : i32
    %c0_i32_0 = arith.constant 0 : i32
    %c0_i32_1 = arith.constant 0 : i32
    return %c0_i32, %c0_i32_0 : i32, i32
  }
  func.func @transform_3(%arg0: i32) -> (i32, i32) {
    %c0_i32 = arith.constant 0 : i32
    %c0_i32_0 = arith.constant 0 : i32
    %c0_i32_1 = arith.constant 0 : i32
    return %c0_i32, %c0_i32_0 : i32, i32
  }
  func.func @transform_4(%arg0: i32) -> (i32, i32) {
    %c0_i32 = arith.constant 0 : i32
    %c0_i32_0 = arith.constant 0 : i32
    %c0_i32_1 = arith.constant 0 : i32
    return %c0_i32, %c0_i32_0 : i32, i32
  }
}

module attributes {stable_mosaic.version = 11 : i64} {
  func.func @_gemm_chain_kernel(%arg0: i32, %arg1: memref<4x128xbf16, #tpu.memory_space<vmem>>, %arg2: memref<128x1024xbf16, #tpu.memory_space<vmem>>, %arg3: memref<4x1xf32, #tpu.memory_space<vmem>>, %arg4: memref<3x4xbf16, #tpu.memory_space<vmem>>, %arg5: memref<3x1xf32, #tpu.memory_space<vmem>>, %arg6: memref<3x1024xf32, #tpu.memory_space<vmem>>) attributes {dimension_semantics = [#tpu.dimension_semantics<parallel>], iteration_bounds = array<i64: 2>, scalar_prefetch = 0 : i64, scratch_operands = 0 : i64, tpu.core_type = #tpu.core_type<tc>, window_params = [{pipeline_mode = #tpu.pipeline_mode<synchronous>, transform_indices = @transform_0, window_bounds = array<i64: 4, 128>}, {transform_indices = @transform_1, window_bounds = array<i64: 128, 1024>}, {pipeline_mode = #tpu.pipeline_mode<synchronous>, transform_indices = @transform_2, window_bounds = array<i64: 4, 1>}, {pipeline_mode = #tpu.pipeline_mode<synchronous>, transform_indices = @transform_3, window_bounds = array<i64: 3, 4>}, {pipeline_mode = #tpu.pipeline_mode<synchronous>, transform_indices = @transform_4, window_bounds = array<i64: 3, 1>}, {transform_indices = @transform_5, window_bounds = array<i64: 3, 1024>}]} {
    %c0 = arith.constant 0 : index
    %c0_0 = arith.constant 0 : index
    %0 = vector.load %arg2[%c0, %c0_0] : memref<128x1024xbf16, #tpu.memory_space<vmem>>, vector<128x1024xbf16>
    %1 = arith.extf %0 : vector<128x1024xbf16> to vector<128x1024xf32>
    %cst = arith.constant 0.000000e+00 : f32
    %2 = vector.broadcast %cst : f32 to vector<128x1024xf32>
    %3 = arith.maximumf %1, %2 : vector<128x1024xf32>
    %4 = arith.truncf %3 : vector<128x1024xf32> to vector<128x1024xbf16>
    %c0_1 = arith.constant 0 : index
    %c0_2 = arith.constant 0 : index
    %5 = vector.load %arg1[%c0_1, %c0_2] : memref<4x128xbf16, #tpu.memory_space<vmem>>, vector<4x128xbf16>
    %cst_3 = arith.constant dense<0.000000e+00> : vector<4x1024xf32>
    %6 = tpu.matmul %5, %4, %cst_3 {dimension_numbers = #tpu.dot_dimension_numbers<[1], [0], [0], [1], [0, 0, 1, 1], [], []>} : vector<4x128xbf16>, vector<128x1024xbf16>, vector<4x1024xf32> -> vector<4x1024xf32>
    %c0_4 = arith.constant 0 : index
    %c0_5 = arith.constant 0 : index
    %7 = vector.load %arg3[%c0_4, %c0_5] : memref<4x1xf32, #tpu.memory_space<vmem>>, vector<4x1xf32>
    %8 = vector.broadcast %7 : vector<4x1xf32> to vector<4x1024xf32>
    %9 = arith.addf %6, %8 : vector<4x1024xf32>
    %c0_6 = arith.constant 0 : index
    %c0_7 = arith.constant 0 : index
    %10 = vector.load %arg4[%c0_6, %c0_7] : memref<3x4xbf16, #tpu.memory_space<vmem>>, vector<3x4xbf16>
    %11 = arith.truncf %9 : vector<4x1024xf32> to vector<4x1024xbf16>
    %cst_8 = arith.constant dense<0.000000e+00> : vector<3x1024xf32>
    %12 = tpu.matmul %10, %11, %cst_8 {dimension_numbers = #tpu.dot_dimension_numbers<[1], [0], [0], [1], [0, 0, 1, 1], [], []>} : vector<3x4xbf16>, vector<4x1024xbf16>, vector<3x1024xf32> -> vector<3x1024xf32>
    %c0_9 = arith.constant 0 : index
    %c0_10 = arith.constant 0 : index
    %13 = vector.load %arg5[%c0_9, %c0_10] : memref<3x1xf32, #tpu.memory_space<vmem>>, vector<3x1xf32>
    %14 = vector.broadcast %13 : vector<3x1xf32> to vector<3x1024xf32>
    %15 = arith.addf %12, %14 : vector<3x1024xf32>
    %16 = math.tanh %15 : vector<3x1024xf32>
    %c0_11 = arith.constant 0 : index
    %c0_12 = arith.constant 0 : index
    %17 = vector.load %arg6[%c0_11, %c0_12] : memref<3x1024xf32, #tpu.memory_space<vmem>>, vector<3x1024xf32>
    tpu.vector_store %arg6[%c0_11, %c0_12], %16 {strides = array<i32>} : memref<3x1024xf32, #tpu.memory_space<vmem>>, vector<3x1024xf32>,
    return
  }
  func.func @transform_0(%arg0: i32) -> (i32, i32) {
    %c0_i32 = arith.constant 0 : i32
    %c0_i32_0 = arith.constant 0 : i32
    %c0_i32_1 = arith.constant 0 : i32
    return %c0_i32, %c0_i32_0 : i32, i32
  }
  func.func @transform_1(%arg0: i32) -> (i32, i32) {
    %c0_i32 = arith.constant 0 : i32
    %c0_i32_0 = arith.constant 0 : i32
    return %c0_i32, %arg0 : i32, i32
  }
  func.func @transform_2(%arg0: i32) -> (i32, i32) {
    %c0_i32 = arith.constant 0 : i32
    %c0_i32_0 = arith.constant 0 : i32
    %c0_i32_1 = arith.constant 0 : i32
    return %c0_i32, %c0_i32_0 : i32, i32
  }
  func.func @transform_3(%arg0: i32) -> (i32, i32) {
    %c0_i32 = arith.constant 0 : i32
    %c0_i32_0 = arith.constant 0 : i32
    %c0_i32_1 = arith.constant 0 : i32
    return %c0_i32, %c0_i32_0 : i32, i32
  }
  func.func @transform_4(%arg0: i32) -> (i32, i32) {
    %c0_i32 = arith.constant 0 : i32
    %c0_i32_0 = arith.constant 0 : i32
    %c0_i32_1 = arith.constant 0 : i32
    return %c0_i32, %c0_i32_0 : i32, i32
  }
  func.func @transform_5(%arg0: i32) -> (i32, i32) {
    %c0_i32 = arith.constant 0 : i32
    %c0_i32_0 = arith.constant 0 : i32
    return %c0_i32, %arg0 : i32, i32
  }
}

</mosaic_0001>

<bundles_post_ra>
// kernel: _lambda_.10
= control target key start
LH: loop header
LB: loop body
LE: loop exit
PB: predicated region body
PF: predicated region fallthrough
CT: control target
= control target key end

     0   :  { %s486_s12 = smov 0   ;;  %s488_s13 = smov 0   ;;  %s544_s0 = inlined_call_operand.vmem [shape: bf16[4,48], index: 0, kind: input, shape index: {}]   ;;  %s545_s1 = inlined_call_operand.vmem [shape: bf16[48,512], index: 1, kind: input, shape index: {}]   ;;  %s546_s2 = inlined_call_operand.vmem [shape: f32[4,1], index: 2, kind: input, shape index: {}]   ;;  %s547_s3 = inlined_call_operand.vmem [shape: f32[4,512], index: 3, kind: output, shape index: {}]  }
   0x1   :  { %s490_s14 = smov 0  }
   0x2 LB: > { %s385_s15 = sadd.s32 4294967295, %s463_s14   ;;  %s503_s16 = sadd.s32 1, %s463_s14   ;;  %s463_s14 = sphi %s490_s14, %s550_s14   ;;  %s459_s13 = sphi %s488_s13, %s549_s13   ;;  %s455_s12 = sphi %s486_s12, %s548_s12  }
   0x3   : > { %s38_s17 = ssub.s32 %s463_s14, %s503_s16  ;;  %s41_s18 = sadd.s32 1, %s459_s13 }
   0x4   : > { %p39_p0 = scmp.eq.s32.totalorder %s38_s17, 0  ;;  %p48_p1 = scmp.ne.s32.totalorder %s459_s13, %s455_s12 }
   0x5   : > { %p49_p2 = scmp.eq.s32.totalorder %s463_s14, 0  ;;  %p388_p4 = scmp.ge.s32.totalorder %s463_s14, 2 }
   0x6   : > { %s512_s19 = scalar_select %p39_p0, %s459_s13, %s41_s18  }
   0x7   : > { %p50_p3 = por %p49_p2, %p48_p1  ;;  %127 = sbr.rel (%p388_p4) target bundleno = 19 (0x13), region = 24 }
   0xc   : > { %130 = sbr.rel (!%p50_p3) target bundleno = 19 (0x13), region = 28  ;;  %s132_s20 = sand.u32 (%p50_p3), 1, %s459_s13  }
   0xd   : > { %s403_s21 = sshll.u32 (%p50_p3), %s463_s14, 3  ;;  %s404_s22 = smul.u32 (%p50_p3), 48, %s132_s20 }
   0xe   : > { %s137_s25 = scalar_lea.vmem (%p50_p3), %s545_s1, %s403_s21 }
   0xf   : > { %v176_v0 = vld [vmem:[%s137_s25] sm:$0xff] (%p50_p3)  ;;  %v178_v1 = vld [vmem:[%s137_s25 + $0x10] sm:$0xff] (%p50_p3)  ;;  %s134_s26 = scalar_lea.vmem (%p50_p3), [#allocation2], %s404_s22 }
  0x10   : > { %v180_v2 = vld [vmem:[%s137_s25 + $0x20] sm:$0xff] (%p50_p3)  ;;  %v182_v3 = vld [vmem:[%s137_s25 + $0x30] sm:$0xff] (%p50_p3)  ;;  %177 = vst [vmem:[%s134_s26] sm:$0xff] (%p50_p3), %v176_v0  ;;  %179 = vst [vmem:[%s134_s26 + $0x8] sm:$0xff] (%p50_p3), %v178_v1 }
  0x11   : > { %v184_v4 = vld [vmem:[%s137_s25 + $0x40] sm:$0xff]  ;;  %v186_v5 = vld [vmem:[%s137_s25 + $0x50] sm:$0xff]  ;;  %181 = vst [vmem:[%s134_s26 + $0x10] sm:$0xff] %v180_v2  ;;  %183 = vst [vmem:[%s134_s26 + $0x18] sm:$0xff] %v182_v3 }
  0x12   : > { %185 = vst [vmem:[%s134_s26 + $0x20] sm:$0xff] %v184_v4  ;;  %187 = vst [vmem:[%s134_s26 + $0x28] sm:$0xff] %v186_v5 }
  0x13 PF: > { %p391_p5 = scmp.ge.s32.totalorder %s463_s14, 1  ;;  %p192_p6 = scmp.lt.s32.totalorder %s463_s14, 3 }
  0x15   : > { %p193_p7 = pnand %p391_p5, %p192_p6 }
  0x16   : > { %s199_s27 = sand.u32 (!%p193_p7), 1, %s455_s12   ;;  %s392_s7 = sshll.u32 (!%p193_p7), %s385_s15, 1 }
  0x17   : > { %196 = sbr.rel (%p193_p7) target bundleno = 242 (0xf2), region = 66  ;;  %p224_p8 = scmp.lt.s32.totalorder (!%p193_p7), %s392_s7, 3 }
  0x18   : > { %s405_s28 = smul.u32 (!%p193_p7), 48, %s199_s27 }
  0x1a   : > { %s201_s4 = scalar_lea.vmem (!%p193_p7), [#allocation2], %s405_s28 }
  0x1c   : > { %v465_v6 = vmov 0   ;;  %v237_v7 = vld [vmem:[%s546_s2] sm:$0xf]  ;;  %v432_v8 = vld [vmem:[%s201_s4 + $0x24] ss:$8 sps:$4 sm:$0xff]   ;;  %vm273_vm0 = vcmask 392192  }
  0x1d   : > { %309 = vmatprep.mubr.bf16.mxu0 %v465_v6  ;;  %431 = vset.pattern.permute.xlu0 %v465_v6  ;;  %v434_v9 = vld [vmem:[%s201_s4 + $0x20] ss:$8 sps:$4 sm:$0xff]   ;;  %v435_v10 = vld [vmem:[%s201_s4 + $0x14] ss:$8 sps:$4 sm:$0xff]   ;;  %v437_v11 = vld [vmem:[%s201_s4 + $0x10] ss:$8 sps:$4 sm:$0xff]  }
  0x1e   : > { %240 = vperm.xlu0 %431, %v237_v7   ;;  %287 = vmatprep.subr.bf16.mxu0 %v432_v8  ;;  %v438_v12 = vld [vmem:[%s201_s4 + $0x4] ss:$8 sps:$4 sm:$0xff]   ;;  %v440_v13 = vld [vmem:[%s201_s4] ss:$8 sps:$4 sm:$0xff]   ;;  %s552_s7 = smov (!%p224_p8, %s392_s7), 3 }
  0x1f   : > { %288 = vmatpush1.bf16.msra.mxu0 %v434_v9  ;;  %v236_v14 = vld [vmem:[%s544_s0] sm:$0x3]  ;;  %s393_s8 = sshll.u32 %s552_s7, 2 }
  0x20   : > { %289 = vmatprep.subr.bf16.mxu0 %v435_v10  ;;  %s227_s11 = scalar_lea.vmem %s547_s3, %s393_s8 }
  0x23   : > { %290 = vmatpush1.bf16.msra.mxu0 %v437_v11 }
  0x24   : > { %291 = vmatprep.subr.bf16.mxu0 %v438_v12 }
  0x27   : > { %292 = vmatpush1.bf16.msra.mxu0 %v440_v13 }
  0x2a   : > { %400 = vmatmul.mubr.msk.bf16.vlgmr.msra.gmra.mxu0 %vm273_vm0, %v236_v14 }
  0x99   : > { %v241_v15 = vpop.permute.xlu0 %240 }
  0xea   : > { %v311_v16 = vpop.f32.mrf.mxu0 }
  0xeb   : > { %v312_v18 = vadd.f32 %v311_v16, %v241_v15 }
  0xec   : > { %v313_v17 = vpop.f32.mrf.mxu0 }
  0xed   : > { %v314_v19 = vadd.f32 %v313_v17, %v241_v15 }
  0xee   : > { %v315_v20 = vpop.f32.mrf.mxu0 }
  0xef   : > { %v320_v21 = vcombine.low %v312_v18, %v314_v19 }
  0xf0   : > { %v316_v22 = vpop.f32.mrf.mxu0 }
  0xf1   : > { %322 = vst [vmem:[%s227_s11] sm:$0xff] %v320_v21 }
  0xf2 PF: > { %p10_p9 = scmp.ge.s32.totalorder %s503_s16, 4   ;;  %s548_s12 = smov %s459_s13 }
  0xf3   : > { %s549_s13 = smov %s512_s19  ;;  %s550_s14 = smov %s503_s16 }
  0xf4   :  { %12 = sbr.rel (!%p10_p9) target bundleno = 2 (0x2), region = 105 }

// kernel: _lambda_.11
= control target key start
LH: loop header
LB: loop body
LE: loop exit
PB: predicated region body
PF: predicated region fallthrough
CT: control target
= control target key end

     0   :  { %v182_v0 = vmov 0.0   ;;  %vm183_vm0 = vmmov 0   ;;  %vm63_vm9 = vcmask 523264   ;;  %v184_v38 = vmov 0   ;;  %s234_s1 = inlined_call_operand.vmem [shape: bf16[64,128], index: 1, kind: input, shape index: {}]   ;;  %s235_s0 = inlined_call_operand.vmem [shape: bf16[8,64], index: 0, kind: input, shape index: {}]   ;;  %s236_s2 = inlined_call_operand.vmem [shape: f32[8,1], index: 2, kind: input, shape index: {}]   ;;  %s237_s3 = inlined_call_operand.vmem [shape: f32[8,1], index: 3, kind: input, shape index: {}]   ;;  %s238_s4 = inlined_call_operand.vmem [shape: f32[8,128], index: 4, kind: output, shape index: {}]  }
   0x1   :  { %163 = vmatprep.subr.bf16.mxu0 %v182_v0  ;;  %v157_v1 = vld [vmem:[%s234_s1 + $0x18] sm:$0xff]   ;;  %v156_v2 = vld [vmem:[%s234_s1 + $0x10] sm:$0xff]   ;;  %v155_v3 = vld [vmem:[%s234_s1 + $0x8] sm:$0xff]   ;;  %171 = vmatprep.mubr.msk.bf16.mxu0 %vm183_vm0, %v182_v0 }
   0x2   :  { %v153_v4 = vunpack.c.l.bf16 %v157_v1  ;;  %v154_v5 = vunpack.c.h.bf16 %v157_v1  ;;  %v149_v6 = vunpack.c.l.bf16 %v156_v2  ;;  %v150_v7 = vunpack.c.h.bf16 %v156_v2  ;;  %v140_v8 = vld [vmem:[%s234_s1] sm:$0xff]   ;;  %178 = vset.pattern.permute.xlu1 %v184_v38  ;;  %179 = vset.pattern.permute.xlu0 %v184_v38 }
   0x3   :  { %v145_v9 = vunpack.c.l.bf16 %v155_v3  ;;  %v146_v10 = vunpack.c.h.bf16 %v155_v3  ;;  %v141_v11 = vunpack.c.l.bf16 %v140_v8  ;;  %v142_v12 = vunpack.c.h.bf16 %v140_v8  ;;  %v62_v33 = vld [vmem:[%s235_s0] sm:$0xf] }
   0x4   :  { %vm40_vm1 = vcmp.ge.f32.partialorder %v153_v4, 0.0  ;;  %vm41_vm2 = vcmp.ge.f32.partialorder %v154_v5, 0.0  ;;  %v48_v13 = vmul.f32 0.2, %v153_v4  ;;  %v49_v14 = vmul.f32 0.2, %v154_v5 }
   0x5   :  { %vm38_vm3 = vcmp.ge.f32.partialorder %v149_v6, 0.0  ;;  %vm39_vm4 = vcmp.ge.f32.partialorder %v150_v7, 0.0  ;;  %v46_v15 = vmul.f32 0.2, %v149_v6  ;;  %v47_v16 = vmul.f32 0.2, %v150_v7 }
   0x6   :  { %v56_v17 = vsel %vm40_vm1, %v153_v4, %v48_v13  ;;  %v57_v18 = vsel %vm41_vm2, %v154_v5, %v49_v14  ;;  %vm36_vm5 = vcmp.ge.f32.partialorder %v145_v9, 0.0  ;;  %vm37_vm6 = vcmp.ge.f32.partialorder %v146_v10, 0.0  ;;  %v119_v39 = vld [vmem:[%s236_s2] sm:$0xff] }
   0x7   :  { %v61_v19 = vpack.c.bf16 %v57_v18, %v56_v17  ;;  %v54_v20 = vsel %vm38_vm3, %v149_v6, %v46_v15  ;;  %v55_v21 = vsel %vm39_vm4, %v150_v7, %v47_v16  ;;  %v44_v22 = vmul.f32 0.2, %v145_v9  ;;  %122 = vperm.xlu1 %178, %v119_v39   ;;  %v126_v40 = vld [vmem:[%s237_s3] sm:$0xff] }
   0x8   :  { %v45_v23 = vmul.f32 0.2, %v146_v10  ;;  %v60_v24 = vpack.c.bf16 %v55_v21, %v54_v20  ;;  %v42_v27 = vmul.f32 0.2, %v141_v11  ;;  %v43_v28 = vmul.f32 0.2, %v142_v12 }
   0x9   :  { %164 = vmatpush3.bf16.msra.mxu0 %v61_v19  ;;  %v52_v25 = vsel %vm36_vm5, %v145_v9, %v44_v22  ;;  %vm34_vm7 = vcmp.ge.f32.partialorder %v141_v11, 0.0  ;;  %vm35_vm8 = vcmp.ge.f32.partialorder %v142_v12, 0.0 }
   0xa   :  { %165 = vmatprep.subr.bf16.mxu0 %v182_v0  ;;  %v53_v26 = vsel %vm37_vm6, %v146_v10, %v45_v23  ;;  %v50_v30 = vsel %vm34_vm7, %v141_v11, %v42_v27  ;;  %v51_v31 = vsel %vm35_vm8, %v142_v12, %v43_v28 }
   0xb   :  { %v59_v29 = vpack.c.bf16 %v53_v26, %v52_v25  ;;  %v58_v32 = vpack.c.bf16 %v51_v31, %v50_v30  ;;  %129 = vperm.xlu1 %178, %v126_v40  }
   0xd   :  { %166 = vmatpush3.bf16.msra.mxu0 %v60_v24 }
   0xe   :  { %167 = vmatprep.subr.bf16.mxu0 %v182_v0 }
  0x11   :  { %168 = vmatpush3.bf16.msra.mxu0 %v59_v29 }
  0x12   :  { %169 = vmatprep.subr.bf16.mxu0 %v182_v0 }
  0x15   :  { %170 = vmatpush3.bf16.msra.mxu0 %v58_v32 }
  0x18   :  { %172 = vmatmul.mubr.msk.bf16.vlgmr.msra.gmra.mxu0 %vm63_vm9, %v62_v33 }
  0x82   :  { %v123_v48 = vpop.permute.xlu1 %122 }
  0x86   :  { %v130_v52 = vpop.permute.xlu1 %129 }
  0xd8   :  { %v101_v34 = vpop.f32.mrf.mxu0 }
  0xd9   :  { %107 = vadd.xlane.f32.xlu0 %v101_v34 }
  0xda   :  { %v173_v35 = vpop.f32.mrf.mxu0 }
  0xdc   :  { %v104_v36 = vpop.f32.mrf.mxu0 }
  0xde   :  { %v174_v37 = vpop.f32.mrf.mxu0 }
 0x162   :  { %v108_v41 = vpop.xlane.xlu0 %107 }
 0x163   :  { %v110_v42 = vmul.f32 0.0078125, %v108_v41 }
 0x165   :  { %v111_v43 = vsub.f32 %v101_v34, %v110_v42 }
 0x167   :  { %v112_v44 = vmul.f32 %v111_v43, %v111_v43 }
 0x169   :  { %113 = vadd.xlane.f32.xlu0 %v112_v44 }
 0x1f2   :  { %v114_v45 = vpop.xlane.xlu0 %113 }
 0x1f3   :  { %v115_v46 = vmul.f32 0.0078125, %v114_v45 }
 0x1f5   :  { %v116_v47 = vadd.f32 1e-05, %v115_v46 }
 0x1f7   :  { %180 = vrsqrt.f32 %v116_v47 }
 0x204   :  { %v181_v49 = vpop.eup %180 }
 0x205   :  { %v118_v50 = vmul.f32 %v181_v49, %v111_v43 }
 0x207   :  { %v125_v51 = vmul.f32 %v123_v48, %v118_v50 }
 0x209   :  { %v132_v53 = vadd.f32 %v130_v52, %v125_v51 }
 0x20b   :  { %133 = vst [vmem:[%s238_s4] sm:$0xff] %v132_v53 }

// kernel: _lambda_.12
= control target key start
LH: loop header
LB: loop body
LE: loop exit
PB: predicated region body
PF: predicated region fallthrough
CT: control target
= control target key end

     0   :  { %v296_v0 = vmov 0.0   ;;  %vm297_vm0 = vmmov 0   ;;  %s386_s1 = inlined_call_operand.vmem [shape: bf16[128,32], index: 1, kind: input, shape index: {}]   ;;  %s387_s0 = inlined_call_operand.vmem [shape: bf16[16,128], index: 0, kind: input, shape index: {}]   ;;  %s388_s2 = inlined_call_operand.vmem [shape: f32[16,1], index: 2, kind: input, shape index: {}]   ;;  %s389_s3 = inlined_call_operand.vmem [shape: f32[16,1], index: 3, kind: input, shape index: {}]   ;;  %s390_s4 = inlined_call_operand.vmem [shape: f32[16,32], index: 4, kind: output, shape index: {}]  }
   0x1   :  { %266 = vmatprep.subr.bf16.mxu0 %v296_v0  ;;  %v256_v1 = vld [vmem:[%s386_s1 + $0x38] sm:$0xff]   ;;  %v255_v2 = vld [vmem:[%s386_s1 + $0x30] sm:$0xff]   ;;  %v254_v3 = vld [vmem:[%s386_s1 + $0x28] sm:$0xff]   ;;  %282 = vmatprep.mubr.msk.bf16.mxu0 %vm297_vm0, %v296_v0 }
   0x2   :  { %v248_v4 = vunpack.c.l.bf16 %v256_v1  ;;  %v249_v5 = vunpack.c.h.bf16 %v256_v1  ;;  %v244_v6 = vunpack.c.l.bf16 %v255_v2  ;;  %v245_v7 = vunpack.c.h.bf16 %v255_v2  ;;  %v253_v8 = vld [vmem:[%s386_s1 + $0x20] sm:$0xff]   ;;  %v252_v23 = vld [vmem:[%s386_s1 + $0x18] sm:$0xff]   ;;  %v251_v26 = vld [vmem:[%s386_s1 + $0x10] sm:$0xff]  }
   0x3   :  { %v240_v9 = vunpack.c.l.bf16 %v254_v3  ;;  %v241_v10 = vunpack.c.h.bf16 %v254_v3  ;;  %v236_v11 = vunpack.c.l.bf16 %v253_v8  ;;  %v237_v12 = vunpack.c.h.bf16 %v253_v8  ;;  %v250_v40 = vld [vmem:[%s386_s1 + $0x8] sm:$0xff]   ;;  %v219_v48 = vld [vmem:[%s386_s1] sm:$0xff]  }
   0x4   :  { %vm64_vm1 = vcmp.ge.f32.partialorder %v248_v4, 0.0  ;;  %vm65_vm2 = vcmp.ge.f32.partialorder %v249_v5, 0.0  ;;  %v80_v13 = vmul.f32 0.2, %v248_v4  ;;  %v81_v14 = vmul.f32 0.2, %v249_v5 }
   0x5   :  { %vm62_vm3 = vcmp.ge.f32.partialorder %v244_v6, 0.0  ;;  %vm63_vm4 = vcmp.ge.f32.partialorder %v245_v7, 0.0  ;;  %v78_v15 = vmul.f32 0.2, %v244_v6  ;;  %v79_v16 = vmul.f32 0.2, %v245_v7 }
   0x6   :  { %v96_v17 = vsel %vm64_vm1, %v248_v4, %v80_v13  ;;  %v97_v18 = vsel %vm65_vm2, %v249_v5, %v81_v14  ;;  %vm60_vm5 = vcmp.ge.f32.partialorder %v240_v9, 0.0  ;;  %vm61_vm6 = vcmp.ge.f32.partialorder %v241_v10, 0.0  ;;  %v291_v2 = vld [vmem:[%s387_s0] sm:$0xff]   ;;  %v184_v4 = vld [vmem:[%s388_s2 + $0x8] sm:$0xff] }
   0x7   :  { %v105_v19 = vpack.c.bf16 %v97_v18, %v96_v17  ;;  %v94_v20 = vsel %vm62_vm3, %v244_v6, %v78_v15  ;;  %v95_v21 = vsel %vm63_vm4, %v245_v7, %v79_v16  ;;  %v76_v22 = vmul.f32 0.2, %v240_v9  ;;  %v197_v5 = vld [vmem:[%s389_s3] sm:$0xff] }
   0x8   :  { %v104_v24 = vpack.c.bf16 %v95_v21, %v94_v20  ;;  %v77_v25 = vmul.f32 0.2, %v241_v10  ;;  %vm58_vm7 = vcmp.ge.f32.partialorder %v236_v11, 0.0  ;;  %vm59_vm8 = vcmp.ge.f32.partialorder %v237_v12, 0.0 }
   0x9   :  { %267 = vmatpush3.bf16.msra.mxu0 %v105_v19  ;;  %v74_v27 = vmul.f32 0.2, %v236_v11  ;;  %v75_v28 = vmul.f32 0.2, %v237_v12  ;;  %v92_v29 = vsel %vm60_vm5, %v240_v9, %v76_v22  ;;  %v232_v31 = vunpack.c.l.bf16 %v252_v23  ;;  %v198_v22 = vld [vmem:[%s389_s3 + $0x8] sm:$0xff] }
   0xa   :  { %268 = vmatprep.subr.bf16.mxu0 %v296_v0  ;;  %v93_v30 = vsel %vm61_vm6, %v241_v10, %v77_v25  ;;  %v233_v32 = vunpack.c.h.bf16 %v252_v23  ;;  %v228_v33 = vunpack.c.l.bf16 %v251_v26  ;;  %v229_v37 = vunpack.c.h.bf16 %v251_v26 }
   0xb   :  { %v103_v34 = vpack.c.bf16 %v93_v30, %v92_v29  ;;  %v90_v35 = vsel %vm58_vm7, %v236_v11, %v74_v27  ;;  %v91_v36 = vsel %vm59_vm8, %v237_v12, %v75_v28  ;;  %v72_v38 = vmul.f32 0.2, %v232_v31  ;;  %v183_v11 = vld [vmem:[%s388_s2] sm:$0xff] }
   0xc   :  { %v73_v39 = vmul.f32 0.2, %v233_v32  ;;  %vm56_vm9 = vcmp.ge.f32.partialorder %v232_v31, 0.0  ;;  %vm57_vm10 = vcmp.ge.f32.partialorder %v233_v32, 0.0  ;;  %v102_v41 = vpack.c.bf16 %v91_v36, %v90_v35 }
   0xd   :  { %269 = vmatpush3.bf16.msra.mxu0 %v104_v24  ;;  %vm54_vm11 = vcmp.ge.f32.partialorder %v228_v33, 0.0  ;;  %vm55_vm12 = vcmp.ge.f32.partialorder %v229_v37, 0.0  ;;  %v70_v42 = vmul.f32 0.2, %v228_v33  ;;  %v71_v43 = vmul.f32 0.2, %v229_v37 }
   0xe   :  { %270 = vmatprep.subr.bf16.mxu0 %v296_v0  ;;  %v88_v44 = vsel %vm56_vm9, %v232_v31, %v72_v38  ;;  %v89_v45 = vsel %vm57_vm10, %v233_v32, %v73_v39  ;;  %v224_v46 = vunpack.c.l.bf16 %v250_v40  ;;  %v225_v47 = vunpack.c.h.bf16 %v250_v40 }
   0xf   :  { %v101_v49 = vpack.c.bf16 %v89_v45, %v88_v44  ;;  %v86_v50 = vsel %vm54_vm11, %v228_v33, %v70_v42  ;;  %v87_v51 = vsel %vm55_vm12, %v229_v37, %v71_v43  ;;  %v220_v54 = vunpack.c.l.bf16 %v219_v48 }
  0x10   :  { %v68_v52 = vmul.f32 0.2, %v224_v46  ;;  %v69_v53 = vmul.f32 0.2, %v225_v47  ;;  %v221_v55 = vunpack.c.h.bf16 %v219_v48  ;;  %vm52_vm13 = vcmp.ge.f32.partialorder %v224_v46, 0.0 }
  0x11   :  { %271 = vmatpush3.bf16.msra.mxu0 %v103_v34  ;;  %vm53_vm14 = vcmp.ge.f32.partialorder %v225_v47, 0.0  ;;  %v100_v56 = vpack.c.bf16 %v87_v51, %v86_v50  ;;  %v66_v59 = vmul.f32 0.2, %v220_v54  ;;  %vm50_vm15 = vcmp.ge.f32.partialorder %v220_v54, 0.0 }
  0x12   :  { %272 = vmatprep.subr.bf16.mxu0 %v296_v0  ;;  %v84_v57 = vsel %vm52_vm13, %v224_v46, %v68_v52  ;;  %v85_v58 = vsel %vm53_vm14, %v225_v47, %v69_v53  ;;  %v67_v60 = vmul.f32 0.2, %v221_v55  ;;  %vm51_vm0 = vcmp.ge.f32.partialorder %v221_v55, 0.0 }
  0x13   :  { %v99_v61 = vpack.c.bf16 %v85_v58, %v84_v57  ;;  %v82_v62 = vsel %vm50_vm15, %v220_v54, %v66_v59  ;;  %v298_v3 = vmov 0   ;;  %vm155_vm1 = vcmask 261120  }
  0x14   :  { %v83_v63 = vsel %vm51_vm0, %v221_v55, %v67_v60  ;;  %290 = vset.pattern.permute.xlu1 %v298_v3  ;;  %289 = vset.pattern.permute.xlu0 %v298_v3 }
  0x15   :  { %273 = vmatpush3.bf16.msra.mxu0 %v102_v41  ;;  %v98_v1 = vpack.c.bf16 %v83_v63, %v82_v62  ;;  %192 = vperm.xlu1 %290, %v184_v4  }
  0x16   :  { %274 = vmatprep.subr.bf16.mxu0 %v296_v0 }
  0x19   :  { %275 = vmatpush3.bf16.msra.mxu0 %v101_v49  ;;  %201 = vperm.xlu1 %290, %v197_v5  }
  0x1a   :  { %276 = vmatprep.subr.bf16.mxu0 %v296_v0 }
  0x1d   :  { %277 = vmatpush3.bf16.msra.mxu0 %v100_v56 }
  0x1e   :  { %278 = vmatprep.subr.bf16.mxu0 %v296_v0 }
  0x21   :  { %279 = vmatpush3.bf16.msra.mxu0 %v99_v61 }
  0x22   :  { %280 = vmatprep.subr.bf16.mxu0 %v296_v0 }
  0x25   :  { %281 = vmatpush3.bf16.msra.mxu0 %v98_v1 }
  0x28   :  { %283 = vmatmul.mubr.bf16.vlgmr.msra.gmra.mxu0 %v291_v2 }
  0x90   :  { %v193_v23 = vpop.permute.xlu1 %192 }
  0x94   :  { %v202_v24 = vpop.permute.xlu1 %201 }
  0xe8   :  { %v148_v0 = vpop.f32.mrf.mxu0 }
  0xe9   :  { %v156_v6 = vsel %vm155_vm1, %v148_v0, 0.0 }
  0xea   :  { %157 = vadd.xlane.f32.xlu0 %v156_v6  ;;  %v284_v7 = vpop.f32.mrf.mxu0 }
  0xec   :  { %v151_v8 = vpop.f32.mrf.mxu0 }
  0xed   :  { %v159_v9 = vsel %vm155_vm1, %v151_v8, 0.0 }
  0xee   :  { %160 = vadd.xlane.f32.xlu0 %v159_v9  ;;  %v285_v10 = vpop.f32.mrf.mxu0 }
 0x104   :  { %187 = vperm.xlu0 %289, %v183_v11  }
 0x173   :  { %v158_v12 = vpop.xlane.xlu0 %157 }
 0x174   :  { %v163_v13 = vmul.f32 0.03125, %v158_v12 }
 0x176   :  { %v165_v14 = vsub.f32 %v148_v0, %v163_v13 }
 0x177   :  { %v161_v15 = vpop.xlane.xlu0 %160 }
 0x178   :  { %v164_v16 = vmul.f32 0.03125, %v161_v15  ;;  %v167_v17 = vmul.f32 %v165_v14, %v165_v14 }
 0x17a   :  { %v166_v18 = vsub.f32 %v151_v8, %v164_v16  ;;  %v169_v19 = vsel %vm155_vm1, %v167_v17, 0.0 }
 0x17b   :  { %170 = vadd.xlane.f32.xlu1 %v169_v19 }
 0x17c   :  { %v168_v20 = vmul.f32 %v166_v18, %v166_v18 }
 0x17e   :  { %v172_v21 = vsel %vm155_vm1, %v168_v20, 0.0 }
 0x17f   :  { %173 = vadd.xlane.f32.xlu1 %v172_v21  ;;  %v188_v32 = vpop.permute.xlu0 %187 }
 0x190   :  { %206 = vperm.xlu1 %290, %v198_v22  }
 0x204   :  { %v171_v25 = vpop.xlane.xlu1 %170 }
 0x205   :  { %v175_v26 = vmul.f32 0.03125, %v171_v25 }
 0x207   :  { %v177_v27 = vadd.f32 1e-05, %v175_v26 }
 0x208   :  { %v174_v28 = vpop.xlane.xlu1 %173 }
 0x209   :  { %292 = vrsqrt.f32 %v177_v27  ;;  %v176_v29 = vmul.f32 0.03125, %v174_v28 }
 0x20b   :  { %v178_v30 = vadd.f32 1e-05, %v176_v29 }
 0x20c   :  { %v207_v39 = vpop.permute.xlu1 %206 }
 0x20d   :  { %294 = vrsqrt.f32 %v178_v30 }
 0x216   :  { %v293_v31 = vpop.eup %292 }
 0x217   :  { %v181_v33 = vmul.f32 %v293_v31, %v165_v14 }
 0x219   :  { %v195_v34 = vmul.f32 %v188_v32, %v181_v33 }
 0x21a   :  { %v295_v35 = vpop.eup %294 }
 0x21b   :  { %v182_v36 = vmul.f32 %v295_v35, %v166_v18  ;;  %v209_v37 = vadd.f32 %v202_v24, %v195_v34 }
 0x21d   :  { %v196_v38 = vmul.f32 %v193_v23, %v182_v36  ;;  %211 = vst.msk [vmem:[%s390_s4] sm:$0xff] %vm155_vm1, %v209_v37 }
 0x21f   :  { %v210_v40 = vadd.f32 %v207_v39, %v196_v38 }
 0x221   :  { %212 = vst.msk [vmem:[%s390_s4 + $0x8] sm:$0xff] %vm155_vm1, %v210_v40 }

// kernel: _lambda_.13
= control target key start
LH: loop header
LB: loop body
LE: loop exit
PB: predicated region body
PF: predicated region fallthrough
CT: control target
= control target key end

     0   :  { %s668_s1 = inlined_call_operand.vmem [shape: bf16[256,8], index: 1, kind: input, shape index: {}]   ;;  %s669_s0 = inlined_call_operand.vmem [shape: bf16[32,256], index: 0, kind: input, shape index: {}]   ;;  %s670_s2 = inlined_call_operand.vmem [shape: f32[32,1], index: 2, kind: input, shape index: {}]   ;;  %s671_s3 = inlined_call_operand.vmem [shape: f32[32,1], index: 3, kind: input, shape index: {}]   ;;  %s672_s4 = inlined_call_operand.vmem [shape: f32[32,8], index: 4, kind: output, shape index: {}]  }
   0x1   :  { %v467_v0 = vld [vmem:[%s668_s1 + $0x78] sm:$0xff]   ;;  %v466_v2 = vld [vmem:[%s668_s1 + $0x70] sm:$0xff]   ;;  %v465_v18 = vld [vmem:[%s668_s1 + $0x68] sm:$0xff]  }
   0x2   :  { %v459_v1 = vld [vmem:[%s668_s1 + $0x38] sm:$0xff]   ;;  %v451_v3 = vunpack.c.l.bf16 %v467_v0  ;;  %v452_v4 = vunpack.c.h.bf16 %v467_v0  ;;  %v458_v7 = vld [vmem:[%s668_s1 + $0x30] sm:$0xff]   ;;  %v447_v8 = vunpack.c.l.bf16 %v466_v2  ;;  %v448_v9 = vunpack.c.h.bf16 %v466_v2  ;;  %v457_v23 = vld [vmem:[%s668_s1 + $0x28] sm:$0xff]  }
   0x3   :  { %v419_v5 = vunpack.c.l.bf16 %v459_v1  ;;  %v420_v6 = vunpack.c.h.bf16 %v459_v1  ;;  %v415_v10 = vunpack.c.l.bf16 %v458_v7  ;;  %v416_v11 = vunpack.c.h.bf16 %v458_v7  ;;  %v517_v34 = vld [vmem:[%s669_s0 + $0x4] ss:$8 sps:$4 sm:$0xff]   ;;  %v520_v39 = vld [vmem:[%s669_s0 + $0x14] ss:$8 sps:$4 sm:$0xff]  }
   0x4   :  { %vm112_vm0 = vcmp.ge.f32.partialorder %v451_v3, 0.0  ;;  %vm113_vm1 = vcmp.ge.f32.partialorder %v452_v4, 0.0  ;;  %v144_v12 = vmul.f32 0.2, %v451_v3  ;;  %v145_v13 = vmul.f32 0.2, %v452_v4  ;;  %250 = vmatprep.mubr.bf16.mxu0 %v517_v34  ;;  %258 = vmatprep.mubr.bf16.mxu1 %v520_v39 }
   0x5   :  { %vm96_vm2 = vcmp.ge.f32.partialorder %v419_v5, 0.0  ;;  %vm97_vm3 = vcmp.ge.f32.partialorder %v420_v6, 0.0  ;;  %v128_v14 = vmul.f32 0.2, %v419_v5  ;;  %v129_v15 = vmul.f32 0.2, %v420_v6 }
   0x6   :  { %v176_v16 = vsel %vm112_vm0, %v451_v3, %v144_v12  ;;  %v177_v17 = vsel %vm113_vm1, %v452_v4, %v145_v13  ;;  %vm110_vm4 = vcmp.ge.f32.partialorder %v447_v8, 0.0  ;;  %vm111_vm5 = vcmp.ge.f32.partialorder %v448_v9, 0.0  ;;  %v464_v38 = vld [vmem:[%s668_s1 + $0x60] sm:$0xff]   ;;  %v463_v54 = vld [vmem:[%s668_s1 + $0x58] sm:$0xff]   ;;  %v462_v4 = vld [vmem:[%s668_s1 + $0x50] sm:$0xff]  }
   0x7   :  { %v193_v19 = vpack.c.bf16 %v177_v17, %v176_v16  ;;  %v160_v20 = vsel %vm96_vm2, %v419_v5, %v128_v14  ;;  %v161_v21 = vsel %vm97_vm3, %v420_v6, %v129_v15  ;;  %v142_v22 = vmul.f32 0.2, %v447_v8  ;;  %v456_v43 = vld [vmem:[%s668_s1 + $0x20] sm:$0xff]   ;;  %v455_v55 = vld [vmem:[%s668_s1 + $0x18] sm:$0xff]   ;;  %v454_v14 = vld [vmem:[%s668_s1 + $0x10] sm:$0xff]  }
   0x8   :  { %v185_v24 = vpack.c.bf16 %v161_v21, %v160_v20  ;;  %v143_v25 = vmul.f32 0.2, %v448_v9  ;;  %vm94_vm6 = vcmp.ge.f32.partialorder %v415_v10, 0.0  ;;  %vm95_vm7 = vcmp.ge.f32.partialorder %v416_v11, 0.0 }
   0x9   :  { %468 = vmatprep.subr.bf16.mxu0 %v193_v19  ;;  %496 = vmatprep.subr.bf16.mxu1 %v193_v19  ;;  %v174_v26 = vsel %vm110_vm4, %v447_v8, %v142_v22  ;;  %v126_v27 = vmul.f32 0.2, %v415_v10  ;;  %v127_v28 = vmul.f32 0.2, %v416_v11  ;;  %v443_v29 = vunpack.c.l.bf16 %v465_v18 }
   0xa   :  { %469 = vmatpush3.bf16.msra.mxu0 %v185_v24  ;;  %504 = vmatpush3.bf16.msra.mxu1 %v185_v24  ;;  %v175_v30 = vsel %vm111_vm5, %v448_v9, %v143_v25  ;;  %v444_v31 = vunpack.c.h.bf16 %v465_v18  ;;  %v411_v32 = vunpack.c.l.bf16 %v457_v23  ;;  %v412_v33 = vunpack.c.h.bf16 %v457_v23  ;;  %v461_v18 = vld [vmem:[%s668_s1 + $0x48] sm:$0xff]  }
   0xb   :  { %v192_v35 = vpack.c.bf16 %v175_v30, %v174_v26  ;;  %v158_v36 = vsel %vm94_vm6, %v415_v10, %v126_v27  ;;  %v159_v37 = vsel %vm95_vm7, %v416_v11, %v127_v28  ;;  %vm108_vm8 = vcmp.ge.f32.partialorder %v443_v29, 0.0 }
   0xc   :  { %v184_v40 = vpack.c.bf16 %v159_v37, %v158_v36  ;;  %vm109_vm9 = vcmp.ge.f32.partialorder %v444_v31, 0.0  ;;  %v140_v41 = vmul.f32 0.2, %v443_v29  ;;  %v141_v42 = vmul.f32 0.2, %v444_v31 }
   0xd   :  { %470 = vmatprep.subr.bf16.mxu0 %v192_v35  ;;  %497 = vmatprep.subr.bf16.mxu1 %v192_v35  ;;  %vm92_vm10 = vcmp.ge.f32.partialorder %v411_v32, 0.0  ;;  %vm93_vm11 = vcmp.ge.f32.partialorder %v412_v33, 0.0  ;;  %v124_v44 = vmul.f32 0.2, %v411_v32  ;;  %v125_v45 = vmul.f32 0.2, %v412_v33 }
   0xe   :  { %471 = vmatpush3.bf16.msra.mxu0 %v184_v40  ;;  %505 = vmatpush3.bf16.msra.mxu1 %v184_v40  ;;  %v172_v46 = vsel %vm108_vm8, %v443_v29, %v140_v41  ;;  %v173_v47 = vsel %vm109_vm9, %v444_v31, %v141_v42  ;;  %v439_v48 = vunpack.c.l.bf16 %v464_v38  ;;  %v440_v49 = vunpack.c.h.bf16 %v464_v38 }
   0xf   :  { %v191_v50 = vpack.c.bf16 %v173_v47, %v172_v46  ;;  %v156_v51 = vsel %vm92_vm10, %v411_v32, %v124_v44  ;;  %v157_v52 = vsel %vm93_vm11, %v412_v33, %v125_v45  ;;  %v407_v53 = vunpack.c.l.bf16 %v456_v43  ;;  %v453_v32 = vld [vmem:[%s668_s1 + $0x8] sm:$0xff]   ;;  %v460_v33 = vld [vmem:[%s668_s1 + $0x40] sm:$0xff]  }
  0x10   :  { %v183_v56 = vpack.c.bf16 %v157_v52, %v156_v51  ;;  %vm106_vm12 = vcmp.ge.f32.partialorder %v439_v48, 0.0  ;;  %vm107_vm13 = vcmp.ge.f32.partialorder %v440_v49, 0.0  ;;  %v138_v57 = vmul.f32 0.2, %v439_v48  ;;  %v390_v47 = vld [vmem:[%s668_s1] sm:$0xff]  }
  0x11   :  { %472 = vmatprep.subr.bf16.mxu0 %v191_v50  ;;  %498 = vmatprep.subr.bf16.mxu1 %v191_v50  ;;  %v139_v58 = vmul.f32 0.2, %v440_v49  ;;  %v408_v59 = vunpack.c.h.bf16 %v456_v43  ;;  %vm90_vm14 = vcmp.ge.f32.partialorder %v407_v53, 0.0  ;;  %v122_v60 = vmul.f32 0.2, %v407_v53 }
  0x12   :  { %473 = vmatpush3.bf16.msra.mxu0 %v183_v56  ;;  %506 = vmatpush3.bf16.msra.mxu1 %v183_v56  ;;  %v170_v61 = vsel %vm106_vm12, %v439_v48, %v138_v57  ;;  %v435_v62 = vunpack.c.l.bf16 %v463_v54  ;;  %v436_v63 = vunpack.c.h.bf16 %v463_v54  ;;  %v403_v0 = vunpack.c.l.bf16 %v455_v55 }
  0x13   :  { %v171_v1 = vsel %vm107_vm13, %v440_v49, %v139_v58  ;;  %vm91_vm15 = vcmp.ge.f32.partialorder %v408_v59, 0.0  ;;  %v123_v2 = vmul.f32 0.2, %v408_v59  ;;  %v154_v3 = vsel %vm90_vm14, %v407_v53, %v122_v60 }
  0x14   :  { %v190_v5 = vpack.c.bf16 %v171_v1, %v170_v61  ;;  %vm104_vm0 = vcmp.ge.f32.partialorder %v435_v62, 0.0  ;;  %vm105_vm1 = vcmp.ge.f32.partialorder %v436_v63, 0.0  ;;  %v136_v6 = vmul.f32 0.2, %v435_v62 }
  0x15   :  { %v155_v7 = vsel %vm91_vm15, %v408_v59, %v123_v2  ;;  %v137_v8 = vmul.f32 0.2, %v436_v63  ;;  %v404_v9 = vunpack.c.h.bf16 %v455_v55  ;;  %vm88_vm2 = vcmp.ge.f32.partialorder %v403_v0, 0.0  ;;  %v515_v2 = vld [vmem:[%s669_s0] ss:$8 sps:$4 sm:$0xff]  }
  0x16   :  { %474 = vmatprep.subr.bf16.mxu0 %v190_v5  ;;  %499 = vmatprep.subr.bf16.mxu1 %v190_v5  ;;  %v182_v10 = vpack.c.bf16 %v155_v7, %v154_v3  ;;  %v168_v11 = vsel %vm104_vm0, %v435_v62, %v136_v6  ;;  %v120_v12 = vmul.f32 0.2, %v403_v0  ;;  %v431_v13 = vunpack.c.l.bf16 %v462_v4  ;;  %v518_v3 = vld [vmem:[%s669_s0 + $0x10] ss:$8 sps:$4 sm:$0xff]  }
  0x17   :  { %v169_v15 = vsel %vm105_vm1, %v436_v63, %v137_v8  ;;  %vm89_vm3 = vcmp.ge.f32.partialorder %v404_v9, 0.0  ;;  %v121_v16 = vmul.f32 0.2, %v404_v9  ;;  %v432_v17 = vunpack.c.h.bf16 %v462_v4 }
  0x18   :  { %475 = vmatpush3.bf16.msra.mxu0 %v182_v10  ;;  %507 = vmatpush3.bf16.msra.mxu1 %v182_v10  ;;  %v189_v19 = vpack.c.bf16 %v169_v15, %v168_v11  ;;  %v152_v20 = vsel %vm88_vm2, %v403_v0, %v120_v12  ;;  %vm102_vm4 = vcmp.ge.f32.partialorder %v431_v13, 0.0  ;;  %v134_v21 = vmul.f32 0.2, %v431_v13 }
  0x19   :  { %v153_v22 = vsel %vm89_vm3, %v404_v9, %v121_v16  ;;  %vm103_vm5 = vcmp.ge.f32.partialorder %v432_v17, 0.0  ;;  %v135_v23 = vmul.f32 0.2, %v432_v17  ;;  %v399_v24 = vunpack.c.l.bf16 %v454_v14 }
  0x1a   :  { %476 = vmatprep.subr.bf16.mxu0 %v189_v19  ;;  %500 = vmatprep.subr.bf16.mxu1 %v189_v19  ;;  %v181_v25 = vpack.c.bf16 %v153_v22, %v152_v20  ;;  %v166_v26 = vsel %vm102_vm4, %v431_v13, %v134_v21  ;;  %v400_v27 = vunpack.c.h.bf16 %v454_v14  ;;  %v427_v28 = vunpack.c.l.bf16 %v461_v18  ;;  %v322_v21 = vld [vmem:[%s670_s2 + $0x8] sm:$0xff]  ;;  %v323_v22 = vld [vmem:[%s670_s2 + $0x10] sm:$0xff] }
  0x1b   :  { %v167_v29 = vsel %vm103_vm5, %v432_v17, %v135_v23  ;;  %vm86_vm6 = vcmp.ge.f32.partialorder %v399_v24, 0.0  ;;  %v118_v30 = vmul.f32 0.2, %v399_v24  ;;  %v428_v31 = vunpack.c.h.bf16 %v461_v18  ;;  %v324_v23 = vld [vmem:[%s670_s2 + $0x18] sm:$0xff] }
  0x1c   :  { %477 = vmatpush3.bf16.msra.mxu0 %v181_v25  ;;  %508 = vmatpush3.bf16.msra.mxu1 %v181_v25  ;;  %v188_v34 = vpack.c.bf16 %v167_v29, %v166_v26  ;;  %vm87_vm7 = vcmp.ge.f32.partialorder %v400_v27, 0.0  ;;  %v119_v35 = vmul.f32 0.2, %v400_v27  ;;  %vm100_vm8 = vcmp.ge.f32.partialorder %v427_v28, 0.0  ;;  %v350_v25 = vld [vmem:[%s671_s3 + $0x8] sm:$0xff]  ;;  %v351_v26 = vld [vmem:[%s671_s3 + $0x10] sm:$0xff] }
  0x1d   :  { %v150_v36 = vsel %vm86_vm6, %v399_v24, %v118_v30  ;;  %vm101_vm9 = vcmp.ge.f32.partialorder %v428_v31, 0.0  ;;  %v132_v37 = vmul.f32 0.2, %v427_v28  ;;  %v133_v38 = vmul.f32 0.2, %v428_v31  ;;  %v349_v24 = vld [vmem:[%s671_s3] sm:$0xff] }
  0x1e   :  { %478 = vmatprep.subr.bf16.mxu0 %v188_v34  ;;  %501 = vmatprep.subr.bf16.mxu1 %v188_v34  ;;  %v151_v39 = vsel %vm87_vm7, %v400_v27, %v119_v35  ;;  %v395_v40 = vunpack.c.l.bf16 %v453_v32  ;;  %v396_v41 = vunpack.c.h.bf16 %v453_v32  ;;  %v423_v42 = vunpack.c.l.bf16 %v460_v33 }
  0x1f   :  { %v180_v43 = vpack.c.bf16 %v151_v39, %v150_v36  ;;  %v164_v44 = vsel %vm100_vm8, %v427_v28, %v132_v37  ;;  %v165_v45 = vsel %vm101_vm9, %v428_v31, %v133_v38  ;;  %v424_v46 = vunpack.c.h.bf16 %v460_v33 }
  0x20   :  { %v187_v48 = vpack.c.bf16 %v165_v45, %v164_v44  ;;  %vm84_vm10 = vcmp.ge.f32.partialorder %v395_v40, 0.0  ;;  %vm85_vm11 = vcmp.ge.f32.partialorder %v396_v41, 0.0  ;;  %v116_v49 = vmul.f32 0.2, %v395_v40 }
  0x21   :  { %479 = vmatpush3.bf16.msra.mxu0 %v180_v43  ;;  %509 = vmatpush3.bf16.msra.mxu1 %v180_v43  ;;  %v117_v50 = vmul.f32 0.2, %v396_v41  ;;  %vm98_vm12 = vcmp.ge.f32.partialorder %v423_v42, 0.0  ;;  %vm99_vm13 = vcmp.ge.f32.partialorder %v424_v46, 0.0  ;;  %v130_v51 = vmul.f32 0.2, %v423_v42 }
  0x22   :  { %480 = vmatprep.subr.bf16.mxu0 %v187_v48  ;;  %502 = vmatprep.subr.bf16.mxu1 %v187_v48  ;;  %v148_v52 = vsel %vm84_vm10, %v395_v40, %v116_v49  ;;  %v131_v53 = vmul.f32 0.2, %v424_v46  ;;  %v391_v54 = vunpack.c.l.bf16 %v390_v47  ;;  %v392_v55 = vunpack.c.h.bf16 %v390_v47  ;;  %v352_v47 = vld [vmem:[%s671_s3 + $0x18] sm:$0xff]  ;;  %v321_v48 = vld [vmem:[%s670_s2] sm:$0xff] }
  0x23   :  { %v149_v56 = vsel %vm85_vm11, %v396_v41, %v117_v50  ;;  %v162_v57 = vsel %vm98_vm12, %v423_v42, %v130_v51  ;;  %v529_v4 = vmov 0   ;;  %vm267_vm0 = vcmask 64512  }
  0x24   :  { %v179_v58 = vpack.c.bf16 %v149_v56, %v148_v52  ;;  %v163_v59 = vsel %vm99_vm13, %v424_v46, %v131_v53  ;;  %vm82_vm14 = vcmp.ge.f32.partialorder %v391_v54, 0.0  ;;  %vm83_vm15 = vcmp.ge.f32.partialorder %v392_v55, 0.0  ;;  %514 = vset.pattern.permute.xlu1 %v529_v4  ;;  %513 = vset.pattern.permute.xlu0 %v529_v4 }
  0x25   :  { %v186_v60 = vpack.c.bf16 %v163_v59, %v162_v57  ;;  %v114_v61 = vmul.f32 0.2, %v391_v54  ;;  %v115_v62 = vmul.f32 0.2, %v392_v55 }
  0x26   :  { %481 = vmatpush3.bf16.msra.mxu0 %v179_v58  ;;  %510 = vmatpush3.bf16.msra.mxu1 %v179_v58 }
  0x27   :  { %482 = vmatprep.subr.bf16.mxu0 %v186_v60  ;;  %503 = vmatprep.subr.bf16.mxu1 %v186_v60  ;;  %v146_v63 = vsel %vm82_vm14, %v391_v54, %v114_v61  ;;  %v147_v0 = vsel %vm83_vm15, %v392_v55, %v115_v62 }
  0x28   :  { %v178_v1 = vpack.c.bf16 %v147_v0, %v146_v63 }
  0x2a   :  { %483 = vmatpush3.bf16.msra.mxu0 %v178_v1  ;;  %511 = vmatpush3.bf16.msra.mxu1 %v178_v1 }
  0x2d   :  { %251 = vmatmul.mubr.bf16.vlgmr.msra.gmra.mxu0 %v515_v2  ;;  %259 = vmatmul.mubr.bf16.vlgmr.msra.gmra.mxu1 %v518_v3 }
  0xed   :  { %v484_v5 = vpop.f32.mrf.mxu0  ;;  %v490_v6 = vpop.f32.mrf.mxu1 }
  0xef   :  { %v485_v7 = vpop.f32.mrf.mxu0  ;;  %v491_v8 = vpop.f32.mrf.mxu1 }
  0xf0   :  { %v486_v9 = vadd.f32 %v485_v7, %v484_v5  ;;  %v492_v10 = vadd.f32 %v491_v8, %v490_v6 }
  0xf1   :  { %v487_v11 = vpop.f32.mrf.mxu0  ;;  %v493_v12 = vpop.f32.mrf.mxu1 }
  0xf2   :  { %v274_v13 = vsel %vm267_vm0, %v492_v10, 0.0  ;;  %v268_v14 = vsel %vm267_vm0, %v486_v9, 0.0 }
  0xf3   :  { %v494_v15 = vpop.f32.mrf.mxu1  ;;  %275 = vadd.xlane.f32.xlu1 %v274_v13  ;;  %v488_v16 = vpop.f32.mrf.mxu0  ;;  %269 = vadd.xlane.f32.xlu0 %v268_v14 }
  0xf4   :  { %v495_v17 = vadd.f32 %v494_v15, %v493_v12  ;;  %v489_v18 = vadd.f32 %v488_v16, %v487_v11 }
  0xf6   :  { %v277_v19 = vsel %vm267_vm0, %v495_v17, 0.0  ;;  %v271_v20 = vsel %vm267_vm0, %v489_v18, 0.0 }
  0xf7   :  { %278 = vadd.xlane.f32.xlu1 %v277_v19  ;;  %272 = vadd.xlane.f32.xlu0 %v271_v20 }
 0x108   :  { %332 = vperm.xlu1 %514, %v322_v21  }
 0x10c   :  { %337 = vperm.xlu1 %514, %v323_v22  }
 0x110   :  { %342 = vperm.xlu1 %514, %v324_v23  }
 0x114   :  { %355 = vperm.xlu1 %514, %v349_v24  }
 0x118   :  { %360 = vperm.xlu1 %514, %v350_v25  }
 0x11c   :  { %365 = vperm.xlu1 %514, %v351_v26  }
 0x17c   :  { %v276_v27 = vpop.xlane.xlu1 %275  ;;  %v270_v28 = vpop.xlane.xlu0 %269 }
 0x17d   :  { %v283_v29 = vmul.f32 0.125, %v276_v27  ;;  %v281_v30 = vmul.f32 0.125, %v270_v28 }
 0x17f   :  { %v287_v31 = vsub.f32 %v492_v10, %v283_v29  ;;  %v285_v32 = vsub.f32 %v486_v9, %v281_v30 }
 0x180   :  { %v279_v33 = vpop.xlane.xlu1 %278  ;;  %v273_v34 = vpop.xlane.xlu0 %272 }
 0x181   :  { %v284_v35 = vmul.f32 0.125, %v279_v33  ;;  %v282_v36 = vmul.f32 0.125, %v273_v34  ;;  %v289_v37 = vmul.f32 %v285_v32, %v285_v32  ;;  %v291_v41 = vmul.f32 %v287_v31, %v287_v31 }
 0x183   :  { %v288_v38 = vsub.f32 %v495_v17, %v284_v35  ;;  %v286_v39 = vsub.f32 %v489_v18, %v282_v36  ;;  %v293_v40 = vsel %vm267_vm0, %v289_v37, 0.0  ;;  %v299_v43 = vsel %vm267_vm0, %v291_v41, 0.0 }
 0x184   :  { %294 = vadd.xlane.f32.xlu0 %v293_v40  ;;  %v333_v49 = vpop.permute.xlu1 %332 }
 0x185   :  { %v290_v42 = vmul.f32 %v286_v39, %v286_v39  ;;  %v292_v45 = vmul.f32 %v288_v38, %v288_v38 }
 0x187   :  { %v296_v44 = vsel %vm267_vm0, %v290_v42, 0.0  ;;  %v302_v46 = vsel %vm267_vm0, %v292_v45, 0.0 }
 0x188   :  { %300 = vadd.xlane.f32.xlu0 %v299_v43  ;;  %297 = vadd.xlane.f32.xlu1 %v296_v44  ;;  %v338_v50 = vpop.permute.xlu1 %337 }
 0x18c   :  { %303 = vadd.xlane.f32.xlu1 %v302_v46  ;;  %v343_v51 = vpop.permute.xlu1 %342 }
 0x190   :  { %v356_v52 = vpop.permute.xlu1 %355 }
 0x194   :  { %v361_v53 = vpop.permute.xlu1 %360 }
 0x198   :  { %v366_v54 = vpop.permute.xlu1 %365 }
 0x19d   :  { %370 = vperm.xlu1 %514, %v352_v47  }
 0x19e   :  { %327 = vperm.xlu0 %513, %v321_v48  }
 0x20d   :  { %v295_v55 = vpop.xlane.xlu0 %294 }
 0x20e   :  { %v305_v56 = vmul.f32 0.125, %v295_v55 }
 0x210   :  { %v309_v57 = vadd.f32 1e-05, %v305_v56 }
 0x211   :  { %v298_v58 = vpop.xlane.xlu1 %297  ;;  %v301_v59 = vpop.xlane.xlu0 %300 }
 0x212   :  { %521 = vrsqrt.f32 %v309_v57  ;;  %v306_v60 = vmul.f32 0.125, %v298_v58  ;;  %v307_v61 = vmul.f32 0.125, %v301_v59 }
 0x214   :  { %v310_v62 = vadd.f32 1e-05, %v306_v60  ;;  %v311_v63 = vadd.f32 1e-05, %v307_v61 }
 0x215   :  { %v304_v0 = vpop.xlane.xlu1 %303 }
 0x216   :  { %523 = vrsqrt.f32 %v310_v62  ;;  %v308_v1 = vmul.f32 0.125, %v304_v0 }
 0x217   :  { %525 = vrsqrt.f32 %v311_v63 }
 0x218   :  { %v312_v2 = vadd.f32 1e-05, %v308_v1 }
 0x219   :  { %v328_v4 = vpop.permute.xlu0 %327  ;;  %v371_v19 = vpop.permute.xlu1 %370 }
 0x21a   :  { %527 = vrsqrt.f32 %v312_v2 }
 0x21f   :  { %v522_v3 = vpop.eup %521 }
 0x220   :  { %v317_v5 = vmul.f32 %v522_v3, %v285_v32 }
 0x222   :  { %v345_v6 = vmul.f32 %v328_v4, %v317_v5 }
 0x223   :  { %v524_v7 = vpop.eup %523 }
 0x224   :  { %v526_v8 = vpop.eup %525  ;;  %v318_v9 = vmul.f32 %v524_v7, %v286_v39  ;;  %v373_v10 = vadd.f32 %v356_v52, %v345_v6 }
 0x225   :  { %v319_v11 = vmul.f32 %v526_v8, %v287_v31 }
 0x226   :  { %v346_v12 = vmul.f32 %v333_v49, %v318_v9  ;;  %377 = vst.msk [vmem:[%s672_s4] sm:$0xff] %vm267_vm0, %v373_v10 }
 0x227   :  { %v528_v13 = vpop.eup %527  ;;  %v347_v14 = vmul.f32 %v338_v50, %v319_v11 }
 0x228   :  { %v320_v15 = vmul.f32 %v528_v13, %v288_v38  ;;  %v374_v16 = vadd.f32 %v361_v53, %v346_v12 }
 0x229   :  { %v375_v17 = vadd.f32 %v366_v54, %v347_v14 }
 0x22a   :  { %v348_v18 = vmul.f32 %v343_v51, %v320_v15  ;;  %378 = vst.msk [vmem:[%s672_s4 + $0x8] sm:$0xff] %vm267_vm0, %v374_v16 }
 0x22b   :  { %379 = vst.msk [vmem:[%s672_s4 + $0x10] sm:$0xff] %vm267_vm0, %v375_v17 }
 0x22c   :  { %v376_v20 = vadd.f32 %v371_v19, %v348_v18 }
 0x22e   :  { %380 = vst.msk [vmem:[%s672_s4 + $0x18] sm:$0xff] %vm267_vm0, %v376_v20 }

// kernel: _lambda_.14
= control target key start
LH: loop header
LB: loop body
LE: loop exit
PB: predicated region body
PF: predicated region fallthrough
CT: control target
= control target key end

     0   :  { %v784_v3 = vmov 0   ;;  %s956_s1 = inlined_call_operand.vmem [shape: bf16[512,2], index: 1, kind: input, shape index: {}]   ;;  %s957_s0 = inlined_call_operand.vmem [shape: bf16[32,512], index: 0, kind: input, shape index: {}]   ;;  %s958_s2 = inlined_call_operand.vmem [shape: f32[32,1], index: 2, kind: input, shape index: {}]   ;;  %s959_s3 = inlined_call_operand.vmem [shape: f32[32,2], index: 3, kind: output, shape index: {}]  }
   0x1   :  { %v696_v0 = vld [vmem:[%s956_s1 + $0x78] sm:$0xff]   ;;  %770 = vset.pattern.permute.xlu0 %v784_v3  ;;  %771 = vset.pattern.permute.xlu1 %v784_v3  ;;  %v695_v19 = vld [vmem:[%s956_s1 + $0x70] sm:$0xff]   ;;  %v694_v53 = vld [vmem:[%s956_s1 + $0x68] sm:$0xff]  }
   0x2   :  { %v712_v1 = vld [vmem:[%s956_s1 + $0xf8] sm:$0xff]   ;;  %v616_v4 = vunpack.c.l.bf16 %v696_v0  ;;  %v617_v5 = vunpack.c.h.bf16 %v696_v0  ;;  %v711_v24 = vld [vmem:[%s956_s1 + $0xf0] sm:$0xff]   ;;  %v612_v30 = vunpack.c.l.bf16 %v695_v19  ;;  %v613_v32 = vunpack.c.h.bf16 %v695_v19  ;;  %v710_v54 = vld [vmem:[%s956_s1 + $0xe8] sm:$0xff]  }
   0x3   :  { %v688_v2 = vld [vmem:[%s956_s1 + $0x38] sm:$0xff]   ;;  %v680_v6 = vunpack.c.l.bf16 %v712_v1  ;;  %v681_v7 = vunpack.c.h.bf16 %v712_v1  ;;  %v676_v33 = vunpack.c.l.bf16 %v711_v24  ;;  %v677_v34 = vunpack.c.h.bf16 %v711_v24  ;;  %v687_v38 = vld [vmem:[%s956_s1 + $0x30] sm:$0xff]   ;;  %v693_v19 = vld [vmem:[%s956_s1 + $0x60] sm:$0xff]  }
   0x4   :  { %v704_v8 = vld [vmem:[%s956_s1 + $0xb8] sm:$0xff]   ;;  %v584_v9 = vunpack.c.l.bf16 %v688_v2  ;;  %v585_v10 = vunpack.c.h.bf16 %v688_v2  ;;  %vm173_vm0 = vcmp.ge.f32.partialorder %v616_v4, 0.0  ;;  %vm174_vm1 = vcmp.ge.f32.partialorder %v617_v5, 0.0  ;;  %v703_v42 = vld [vmem:[%s956_s1 + $0xb0] sm:$0xff]  }
   0x5   :  { %v648_v11 = vunpack.c.l.bf16 %v704_v8  ;;  %v649_v12 = vunpack.c.h.bf16 %v704_v8  ;;  %v237_v13 = vmul.f32 0.2, %v616_v4  ;;  %v238_v14 = vmul.f32 0.2, %v617_v5  ;;  %v774_v0 = vld [vmem:[%s957_s0 + $0x4] ss:$16 sps:$4 sm:$0xff]  }
   0x6   :  { %vm205_vm2 = vcmp.ge.f32.partialorder %v680_v6, 0.0  ;;  %vm206_vm3 = vcmp.ge.f32.partialorder %v681_v7, 0.0  ;;  %v269_v15 = vmul.f32 0.2, %v680_v6  ;;  %v270_v16 = vmul.f32 0.2, %v681_v7  ;;  %471 = vmatprep.mubr.bf16.mxu0 %v774_v0 }
   0x7   :  { %v301_v17 = vsel %vm173_vm0, %v616_v4, %v237_v13  ;;  %v302_v18 = vsel %vm174_vm1, %v617_v5, %v238_v14  ;;  %vm157_vm4 = vcmp.ge.f32.partialorder %v584_v9, 0.0  ;;  %vm158_vm5 = vcmp.ge.f32.partialorder %v585_v10, 0.0  ;;  %v686_v4 = vld [vmem:[%s956_s1 + $0x28] sm:$0xff]   ;;  %v377_v24 = vld [vmem:[%s958_s2 + $0x10] sm:$0xff] }
   0x8   :  { %v350_v20 = vpack.c.bf16 %v302_v18, %v301_v17  ;;  %v333_v21 = vsel %vm205_vm2, %v680_v6, %v269_v15  ;;  %v334_v22 = vsel %vm206_vm3, %v681_v7, %v270_v16  ;;  %v221_v23 = vmul.f32 0.2, %v584_v9  ;;  %v777_v7 = vld [vmem:[%s957_s0 + $0xc] ss:$16 sps:$4 sm:$0xff]   ;;  %391 = vperm.xlu1 %771, %v377_v24  }
   0x9   :  { %v366_v25 = vpack.c.bf16 %v334_v22, %v333_v21  ;;  %v222_v26 = vmul.f32 0.2, %v585_v10  ;;  %vm189_vm6 = vcmp.ge.f32.partialorder %v648_v11, 0.0  ;;  %vm190_vm7 = vcmp.ge.f32.partialorder %v649_v12, 0.0  ;;  %v702_v15 = vld [vmem:[%s956_s1 + $0xa8] sm:$0xff]   ;;  %520 = vmatprep.mubr.bf16.mxu1 %v777_v7 }
   0xa   :  { %713 = vmatprep.subr.bf16.mxu0 %v350_v20  ;;  %v285_v27 = vsel %vm157_vm4, %v584_v9, %v221_v23  ;;  %v253_v28 = vmul.f32 0.2, %v648_v11  ;;  %v254_v29 = vmul.f32 0.2, %v649_v12  ;;  %vm171_vm8 = vcmp.ge.f32.partialorder %v612_v30, 0.0  ;;  %v375_v20 = vld [vmem:[%s958_s2] sm:$0xff] }
   0xb   :  { %741 = vmatprep.subr.bf16.mxu1 %v366_v25  ;;  %v286_v31 = vsel %vm158_vm5, %v585_v10, %v222_v26  ;;  %vm172_vm9 = vcmp.ge.f32.partialorder %v613_v32, 0.0  ;;  %v235_v40 = vmul.f32 0.2, %v612_v30  ;;  %v236_v41 = vmul.f32 0.2, %v613_v32  ;;  %381 = vperm.xlu0 %770, %v375_v20   ;;  %v691_v20 = vld [vmem:[%s956_s1 + $0x50] sm:$0xff]  }
   0xc   :  { %v342_v35 = vpack.c.bf16 %v286_v31, %v285_v27  ;;  %v317_v36 = vsel %vm189_vm6, %v648_v11, %v253_v28  ;;  %v318_v37 = vsel %vm190_vm7, %v649_v12, %v254_v29  ;;  %vm203_vm10 = vcmp.ge.f32.partialorder %v676_v33, 0.0  ;;  %v376_v28 = vld [vmem:[%s958_s2 + $0x8] sm:$0xff] }
   0xd   :  { %v358_v39 = vpack.c.bf16 %v318_v37, %v317_v36  ;;  %vm204_vm11 = vcmp.ge.f32.partialorder %v677_v34, 0.0  ;;  %v267_v43 = vmul.f32 0.2, %v676_v33  ;;  %v268_v44 = vmul.f32 0.2, %v677_v34  ;;  %v709_v37 = vld [vmem:[%s956_s1 + $0xe0] sm:$0xff]  }
   0xe   :  { %714 = vmatpush3.bf16.msra.mxu0 %v342_v35  ;;  %v299_v45 = vsel %vm171_vm8, %v612_v30, %v235_v40  ;;  %v300_v46 = vsel %vm172_vm9, %v613_v32, %v236_v41  ;;  %v580_v47 = vunpack.c.l.bf16 %v687_v38  ;;  %v581_v48 = vunpack.c.h.bf16 %v687_v38  ;;  %v685_v38 = vld [vmem:[%s956_s1 + $0x20] sm:$0xff]  }
   0xf   :  { %742 = vmatpush3.bf16.msra.mxu1 %v358_v39  ;;  %v349_v49 = vpack.c.bf16 %v300_v46, %v299_v45  ;;  %v331_v50 = vsel %vm203_vm10, %v676_v33, %v267_v43  ;;  %v332_v51 = vsel %vm204_vm11, %v677_v34, %v268_v44  ;;  %v644_v52 = vunpack.c.l.bf16 %v703_v42  ;;  %v378_v33 = vld [vmem:[%s958_s2 + $0x18] sm:$0xff]  ;;  %386 = vperm.xlu0 %770, %v376_v28  }
  0x10   :  { %v365_v55 = vpack.c.bf16 %v332_v51, %v331_v50  ;;  %vm155_vm12 = vcmp.ge.f32.partialorder %v580_v47, 0.0  ;;  %vm156_vm13 = vcmp.ge.f32.partialorder %v581_v48, 0.0  ;;  %v219_v56 = vmul.f32 0.2, %v580_v47  ;;  %396 = vperm.xlu1 %771, %v378_v33  }
  0x11   :  { %715 = vmatprep.subr.bf16.mxu0 %v349_v49  ;;  %v220_v57 = vmul.f32 0.2, %v581_v48  ;;  %v645_v58 = vunpack.c.h.bf16 %v703_v42  ;;  %vm187_vm14 = vcmp.ge.f32.partialorder %v644_v52, 0.0  ;;  %v251_v59 = vmul.f32 0.2, %v644_v52 }
  0x12   :  { %743 = vmatprep.subr.bf16.mxu1 %v365_v55  ;;  %v283_v60 = vsel %vm155_vm12, %v580_v47, %v219_v56  ;;  %v608_v61 = vunpack.c.l.bf16 %v694_v53  ;;  %v609_v62 = vunpack.c.h.bf16 %v694_v53  ;;  %v672_v63 = vunpack.c.l.bf16 %v710_v54  ;;  %v692_v55 = vld [vmem:[%s956_s1 + $0x58] sm:$0xff]  }
  0x13   :  { %v284_v1 = vsel %vm156_vm13, %v581_v48, %v220_v57  ;;  %vm188_vm15 = vcmp.ge.f32.partialorder %v645_v58, 0.0  ;;  %v252_v2 = vmul.f32 0.2, %v645_v58  ;;  %v315_v3 = vsel %vm187_vm14, %v644_v52, %v251_v59  ;;  %v701_v52 = vld [vmem:[%s956_s1 + $0xa0] sm:$0xff]  }
  0x14   :  { %v341_v5 = vpack.c.bf16 %v284_v1, %v283_v60  ;;  %vm169_vm0 = vcmp.ge.f32.partialorder %v608_v61, 0.0  ;;  %vm170_vm1 = vcmp.ge.f32.partialorder %v609_v62, 0.0  ;;  %v233_v6 = vmul.f32 0.2, %v608_v61 }
  0x15   :  { %v316_v8 = vsel %vm188_vm15, %v645_v58, %v252_v2  ;;  %v234_v9 = vmul.f32 0.2, %v609_v62  ;;  %v673_v10 = vunpack.c.h.bf16 %v710_v54  ;;  %vm201_vm2 = vcmp.ge.f32.partialorder %v672_v63, 0.0  ;;  %v708_v2 = vld [vmem:[%s956_s1 + $0xd8] sm:$0xff]  }
  0x16   :  { %716 = vmatpush3.bf16.msra.mxu0 %v341_v5  ;;  %v357_v11 = vpack.c.bf16 %v316_v8, %v315_v3  ;;  %v297_v12 = vsel %vm169_vm0, %v608_v61, %v233_v6  ;;  %v265_v13 = vmul.f32 0.2, %v672_v63  ;;  %v576_v14 = vunpack.c.l.bf16 %v686_v4  ;;  %v684_v5 = vld [vmem:[%s956_s1 + $0x18] sm:$0xff]  }
  0x17   :  { %v298_v16 = vsel %vm170_vm1, %v609_v62, %v234_v9  ;;  %vm202_vm3 = vcmp.ge.f32.partialorder %v673_v10, 0.0  ;;  %v266_v17 = vmul.f32 0.2, %v673_v10  ;;  %v577_v18 = vunpack.c.h.bf16 %v686_v4 }
  0x18   :  { %744 = vmatpush3.bf16.msra.mxu1 %v357_v11  ;;  %v348_v21 = vpack.c.bf16 %v298_v16, %v297_v12  ;;  %v329_v22 = vsel %vm201_vm2, %v672_v63, %v265_v13  ;;  %vm153_vm4 = vcmp.ge.f32.partialorder %v576_v14, 0.0  ;;  %v217_v23 = vmul.f32 0.2, %v576_v14  ;;  %v700_v16 = vld [vmem:[%s956_s1 + $0x98] sm:$0xff]  }
  0x19   :  { %v330_v25 = vsel %vm202_vm3, %v673_v10, %v266_v17  ;;  %vm154_vm5 = vcmp.ge.f32.partialorder %v577_v18, 0.0  ;;  %v218_v26 = vmul.f32 0.2, %v577_v18  ;;  %v640_v27 = vunpack.c.l.bf16 %v702_v15 }
  0x1a   :  { %717 = vmatprep.subr.bf16.mxu0 %v348_v21  ;;  %v364_v29 = vpack.c.bf16 %v330_v25, %v329_v22  ;;  %v281_v30 = vsel %vm153_vm4, %v576_v14, %v217_v23  ;;  %v641_v31 = vunpack.c.h.bf16 %v702_v15  ;;  %v604_v32 = vunpack.c.l.bf16 %v693_v19 }
  0x1b   :  { %v282_v34 = vsel %vm154_vm5, %v577_v18, %v218_v26  ;;  %vm185_vm6 = vcmp.ge.f32.partialorder %v640_v27, 0.0  ;;  %v249_v35 = vmul.f32 0.2, %v640_v27  ;;  %v605_v36 = vunpack.c.h.bf16 %v693_v19 }
  0x1c   :  { %745 = vmatprep.subr.bf16.mxu1 %v364_v29  ;;  %v340_v39 = vpack.c.bf16 %v282_v34, %v281_v30  ;;  %vm186_vm7 = vcmp.ge.f32.partialorder %v641_v31, 0.0  ;;  %v250_v40 = vmul.f32 0.2, %v641_v31  ;;  %vm167_vm8 = vcmp.ge.f32.partialorder %v604_v32, 0.0  ;;  %v707_v34 = vld [vmem:[%s956_s1 + $0xd0] sm:$0xff]  }
  0x1d   :  { %v313_v41 = vsel %vm185_vm6, %v640_v27, %v249_v35  ;;  %vm168_vm9 = vcmp.ge.f32.partialorder %v605_v36, 0.0  ;;  %v231_v42 = vmul.f32 0.2, %v604_v32  ;;  %v232_v43 = vmul.f32 0.2, %v605_v36 }
  0x1e   :  { %718 = vmatpush3.bf16.msra.mxu0 %v340_v39  ;;  %v314_v44 = vsel %vm186_vm7, %v641_v31, %v250_v40  ;;  %v668_v45 = vunpack.c.l.bf16 %v709_v37  ;;  %v669_v46 = vunpack.c.h.bf16 %v709_v37  ;;  %v572_v47 = vunpack.c.l.bf16 %v685_v38  ;;  %v683_v40 = vld [vmem:[%s956_s1 + $0x10] sm:$0xff]  }
  0x1f   :  { %v356_v48 = vpack.c.bf16 %v314_v44, %v313_v41  ;;  %v295_v49 = vsel %vm167_vm8, %v604_v32, %v231_v42  ;;  %v296_v50 = vsel %vm168_vm9, %v605_v36, %v232_v43  ;;  %v573_v51 = vunpack.c.h.bf16 %v685_v38 }
  0x20   :  { %v347_v53 = vpack.c.bf16 %v296_v50, %v295_v49  ;;  %vm199_vm10 = vcmp.ge.f32.partialorder %v668_v45, 0.0  ;;  %vm200_vm11 = vcmp.ge.f32.partialorder %v669_v46, 0.0  ;;  %v263_v54 = vmul.f32 0.2, %v668_v45 }
  0x21   :  { %746 = vmatpush3.bf16.msra.mxu1 %v356_v48  ;;  %v264_v56 = vmul.f32 0.2, %v669_v46  ;;  %vm151_vm12 = vcmp.ge.f32.partialorder %v572_v47, 0.0  ;;  %vm152_vm13 = vcmp.ge.f32.partialorder %v573_v51, 0.0  ;;  %v215_v57 = vmul.f32 0.2, %v572_v47 }
  0x22   :  { %719 = vmatprep.subr.bf16.mxu0 %v347_v53  ;;  %v327_v58 = vsel %vm199_vm10, %v668_v45, %v263_v54  ;;  %v216_v59 = vmul.f32 0.2, %v573_v51  ;;  %v636_v60 = vunpack.c.l.bf16 %v701_v52  ;;  %v637_v61 = vunpack.c.h.bf16 %v701_v52  ;;  %v699_v45 = vld [vmem:[%s956_s1 + $0x90] sm:$0xff]  }
  0x23   :  { %v328_v62 = vsel %vm200_vm11, %v669_v46, %v264_v56  ;;  %v279_v63 = vsel %vm151_vm12, %v572_v47, %v215_v57  ;;  %v600_v0 = vunpack.c.l.bf16 %v692_v55  ;;  %v601_v1 = vunpack.c.h.bf16 %v692_v55 }
  0x24   :  { %v363_v3 = vpack.c.bf16 %v328_v62, %v327_v58  ;;  %v280_v4 = vsel %vm152_vm13, %v573_v51, %v216_v59  ;;  %vm183_vm14 = vcmp.ge.f32.partialorder %v636_v60, 0.0  ;;  %vm184_vm15 = vcmp.ge.f32.partialorder %v637_v61, 0.0  ;;  %v690_v59 = vld [vmem:[%s956_s1 + $0x48] sm:$0xff]  }
  0x25   :  { %v339_v6 = vpack.c.bf16 %v280_v4, %v279_v63  ;;  %v247_v7 = vmul.f32 0.2, %v636_v60  ;;  %v248_v8 = vmul.f32 0.2, %v637_v61  ;;  %vm165_vm0 = vcmp.ge.f32.partialorder %v600_v0, 0.0 }
  0x26   :  { %747 = vmatprep.subr.bf16.mxu1 %v363_v3  ;;  %vm166_vm1 = vcmp.ge.f32.partialorder %v601_v1, 0.0  ;;  %v229_v9 = vmul.f32 0.2, %v600_v0  ;;  %v230_v10 = vmul.f32 0.2, %v601_v1  ;;  %v664_v11 = vunpack.c.l.bf16 %v708_v2 }
  0x27   :  { %720 = vmatpush3.bf16.msra.mxu0 %v339_v6  ;;  %v311_v12 = vsel %vm183_vm14, %v636_v60, %v247_v7  ;;  %v312_v13 = vsel %vm184_vm15, %v637_v61, %v248_v8  ;;  %v665_v14 = vunpack.c.h.bf16 %v708_v2  ;;  %v568_v15 = vunpack.c.l.bf16 %v684_v5 }
  0x28   :  { %v355_v17 = vpack.c.bf16 %v312_v13, %v311_v12  ;;  %v293_v18 = vsel %vm165_vm0, %v600_v0, %v229_v9  ;;  %v294_v19 = vsel %vm166_vm1, %v601_v1, %v230_v10  ;;  %vm197_vm2 = vcmp.ge.f32.partialorder %v664_v11, 0.0  ;;  %v706_v0 = vld [vmem:[%s956_s1 + $0xc8] sm:$0xff]  }
  0x29   :  { %v346_v21 = vpack.c.bf16 %v294_v19, %v293_v18  ;;  %vm198_vm3 = vcmp.ge.f32.partialorder %v665_v14, 0.0  ;;  %v261_v22 = vmul.f32 0.2, %v664_v11  ;;  %v262_v23 = vmul.f32 0.2, %v665_v14  ;;  %v682_v1 = vld [vmem:[%s956_s1 + $0x8] sm:$0xff]  }
  0x2a   :  { %748 = vmatpush3.bf16.msra.mxu1 %v355_v17  ;;  %v569_v24 = vunpack.c.h.bf16 %v684_v5  ;;  %vm149_vm4 = vcmp.ge.f32.partialorder %v568_v15, 0.0  ;;  %v213_v25 = vmul.f32 0.2, %v568_v15  ;;  %v632_v26 = vunpack.c.l.bf16 %v700_v16 }
  0x2b   :  { %721 = vmatprep.subr.bf16.mxu0 %v346_v21  ;;  %v325_v27 = vsel %vm197_vm2, %v664_v11, %v261_v22  ;;  %v326_v28 = vsel %vm198_vm3, %v665_v14, %v262_v23  ;;  %v633_v29 = vunpack.c.h.bf16 %v700_v16  ;;  %v596_v30 = vunpack.c.l.bf16 %v691_v20  ;;  %v698_v16 = vld [vmem:[%s956_s1 + $0x88] sm:$0xff]  }
  0x2c   :  { %v362_v31 = vpack.c.bf16 %v326_v28, %v325_v27  ;;  %vm150_vm5 = vcmp.ge.f32.partialorder %v569_v24, 0.0  ;;  %v214_v32 = vmul.f32 0.2, %v569_v24  ;;  %v277_v33 = vsel %vm149_vm4, %v568_v15, %v213_v25 }
  0x2d   :  { %vm181_vm6 = vcmp.ge.f32.partialorder %v632_v26, 0.0  ;;  %vm182_vm7 = vcmp.ge.f32.partialorder %v633_v29, 0.0  ;;  %v245_v35 = vmul.f32 0.2, %v632_v26  ;;  %v246_v36 = vmul.f32 0.2, %v633_v29 }
  0x2e   :  { %749 = vmatprep.subr.bf16.mxu1 %v362_v31  ;;  %v278_v37 = vsel %vm150_vm5, %v569_v24, %v214_v32  ;;  %v597_v38 = vunpack.c.h.bf16 %v691_v20  ;;  %vm163_vm8 = vcmp.ge.f32.partialorder %v596_v30, 0.0  ;;  %v227_v39 = vmul.f32 0.2, %v596_v30 }
  0x2f   :  { %v338_v41 = vpack.c.bf16 %v278_v37, %v277_v33  ;;  %v309_v42 = vsel %vm181_vm6, %v632_v26, %v245_v35  ;;  %v310_v43 = vsel %vm182_vm7, %v633_v29, %v246_v36  ;;  %v660_v44 = vunpack.c.l.bf16 %v707_v34  ;;  %v689_v26 = vld [vmem:[%s956_s1 + $0x40] sm:$0xff]  }
  0x30   :  { %v354_v46 = vpack.c.bf16 %v310_v43, %v309_v42  ;;  %vm164_vm9 = vcmp.ge.f32.partialorder %v597_v38, 0.0  ;;  %v228_v47 = vmul.f32 0.2, %v597_v38  ;;  %v291_v48 = vsel %vm163_vm8, %v596_v30, %v227_v39  ;;  %v705_v30 = vld [vmem:[%s956_s1 + $0xc0] sm:$0xff]  }
  0x31   :  { %722 = vmatpush3.bf16.msra.mxu0 %v338_v41  ;;  %v661_v49 = vunpack.c.h.bf16 %v707_v34  ;;  %vm195_vm10 = vcmp.ge.f32.partialorder %v660_v44, 0.0  ;;  %v259_v50 = vmul.f32 0.2, %v660_v44  ;;  %v564_v51 = vunpack.c.l.bf16 %v683_v40  ;;  %v555_v41 = vld [vmem:[%s956_s1] sm:$0xff]  }
  0x32   :  { %750 = vmatpush3.bf16.msra.mxu1 %v354_v46  ;;  %v292_v52 = vsel %vm164_vm9, %v597_v38, %v228_v47  ;;  %v565_v53 = vunpack.c.h.bf16 %v683_v40  ;;  %v628_v54 = vunpack.c.l.bf16 %v699_v45  ;;  %v629_v55 = vunpack.c.h.bf16 %v699_v45 }
  0x33   :  { %v345_v56 = vpack.c.bf16 %v292_v52, %v291_v48  ;;  %vm196_vm11 = vcmp.ge.f32.partialorder %v661_v49, 0.0  ;;  %v260_v57 = vmul.f32 0.2, %v661_v49  ;;  %v323_v58 = vsel %vm195_vm10, %v660_v44, %v259_v50 }
  0x34   :  { %vm147_vm12 = vcmp.ge.f32.partialorder %v564_v51, 0.0  ;;  %vm148_vm13 = vcmp.ge.f32.partialorder %v565_v53, 0.0  ;;  %v211_v60 = vmul.f32 0.2, %v564_v51  ;;  %v212_v61 = vmul.f32 0.2, %v565_v53 }
  0x35   :  { %723 = vmatprep.subr.bf16.mxu0 %v345_v56  ;;  %v324_v62 = vsel %vm196_vm11, %v661_v49, %v260_v57  ;;  %vm179_vm14 = vcmp.ge.f32.partialorder %v628_v54, 0.0  ;;  %vm180_vm15 = vcmp.ge.f32.partialorder %v629_v55, 0.0  ;;  %v243_v63 = vmul.f32 0.2, %v628_v54 }
  0x36   :  { %v361_v2 = vpack.c.bf16 %v324_v62, %v323_v58  ;;  %v275_v3 = vsel %vm147_vm12, %v564_v51, %v211_v60  ;;  %v276_v4 = vsel %vm148_vm13, %v565_v53, %v212_v61  ;;  %v244_v5 = vmul.f32 0.2, %v629_v55  ;;  %v697_v51 = vld [vmem:[%s956_s1 + $0x80] sm:$0xff]  }
  0x37   :  { %v337_v6 = vpack.c.bf16 %v276_v4, %v275_v3  ;;  %v307_v7 = vsel %vm179_vm14, %v628_v54, %v243_v63  ;;  %v592_v8 = vunpack.c.l.bf16 %v690_v59  ;;  %v593_v9 = vunpack.c.h.bf16 %v690_v59 }
  0x38   :  { %751 = vmatprep.subr.bf16.mxu1 %v361_v2  ;;  %v308_v10 = vsel %vm180_vm15, %v629_v55, %v244_v5  ;;  %v656_v11 = vunpack.c.l.bf16 %v706_v0  ;;  %v657_v12 = vunpack.c.h.bf16 %v706_v0  ;;  %v560_v13 = vunpack.c.l.bf16 %v682_v1  ;;  %v772_v5 = vld [vmem:[%s957_s0] ss:$16 sps:$4 sm:$0xff]  }
  0x39   :  { %724 = vmatpush3.bf16.msra.mxu0 %v337_v6  ;;  %v353_v14 = vpack.c.bf16 %v308_v10, %v307_v7  ;;  %vm161_vm0 = vcmp.ge.f32.partialorder %v592_v8, 0.0  ;;  %vm162_vm1 = vcmp.ge.f32.partialorder %v593_v9, 0.0  ;;  %v225_v15 = vmul.f32 0.2, %v592_v8  ;;  %v778_v7 = vld [vmem:[%s957_s0 + $0x24] ss:$16 sps:$4 sm:$0xff]  }
  0x3a   :  { %v226_v17 = vmul.f32 0.2, %v593_v9  ;;  %vm193_vm2 = vcmp.ge.f32.partialorder %v656_v11, 0.0  ;;  %vm194_vm3 = vcmp.ge.f32.partialorder %v657_v12, 0.0  ;;  %v257_v18 = vmul.f32 0.2, %v656_v11 }
  0x3b   :  { %752 = vmatpush3.bf16.msra.mxu1 %v353_v14  ;;  %v289_v19 = vsel %vm161_vm0, %v592_v8, %v225_v15  ;;  %v258_v20 = vmul.f32 0.2, %v657_v12  ;;  %v561_v21 = vunpack.c.h.bf16 %v682_v1  ;;  %vm145_vm4 = vcmp.ge.f32.partialorder %v560_v13, 0.0  ;;  %v780_v10 = vld [vmem:[%s957_s0 + $0x2c] ss:$16 sps:$4 sm:$0xff]  }
  0x3c   :  { %v290_v22 = vsel %vm162_vm1, %v593_v9, %v226_v17  ;;  %v321_v23 = vsel %vm193_vm2, %v656_v11, %v257_v18  ;;  %v209_v24 = vmul.f32 0.2, %v560_v13  ;;  %v624_v25 = vunpack.c.l.bf16 %v698_v16  ;;  %v775_v9 = vld [vmem:[%s957_s0 + $0x8] ss:$16 sps:$4 sm:$0xff]   ;;  %v782_v11 = vld [vmem:[%s957_s0 + $0x20] ss:$16 sps:$4 sm:$0xff]  }
  0x3d   :  { %v344_v27 = vpack.c.bf16 %v290_v22, %v289_v19  ;;  %v322_v28 = vsel %vm194_vm3, %v657_v12, %v258_v20  ;;  %vm146_vm5 = vcmp.ge.f32.partialorder %v561_v21, 0.0  ;;  %v210_v29 = vmul.f32 0.2, %v561_v21  ;;  %v783_v12 = vld [vmem:[%s957_s0 + $0x28] ss:$16 sps:$4 sm:$0xff]  }
  0x3e   :  { %v360_v31 = vpack.c.bf16 %v322_v28, %v321_v23  ;;  %v273_v32 = vsel %vm145_vm4, %v560_v13, %v209_v24  ;;  %v625_v33 = vunpack.c.h.bf16 %v698_v16  ;;  %vm177_vm6 = vcmp.ge.f32.partialorder %v624_v25, 0.0 }
  0x3f   :  { %725 = vmatprep.subr.bf16.mxu0 %v344_v27  ;;  %v274_v34 = vsel %vm146_vm5, %v561_v21, %v210_v29  ;;  %v241_v35 = vmul.f32 0.2, %v624_v25  ;;  %v588_v36 = vunpack.c.l.bf16 %v689_v26  ;;  %v589_v37 = vunpack.c.h.bf16 %v689_v26 }
  0x40   :  { %753 = vmatprep.subr.bf16.mxu1 %v360_v31  ;;  %v336_v38 = vpack.c.bf16 %v274_v34, %v273_v32  ;;  %vm178_vm7 = vcmp.ge.f32.partialorder %v625_v33, 0.0  ;;  %v242_v39 = vmul.f32 0.2, %v625_v33  ;;  %v652_v40 = vunpack.c.l.bf16 %v705_v30 }
  0x41   :  { %v305_v42 = vsel %vm177_vm6, %v624_v25, %v241_v35  ;;  %vm159_vm8 = vcmp.ge.f32.partialorder %v588_v36, 0.0  ;;  %vm160_vm9 = vcmp.ge.f32.partialorder %v589_v37, 0.0  ;;  %v223_v43 = vmul.f32 0.2, %v588_v36 }
  0x42   :  { %726 = vmatpush3.bf16.msra.mxu0 %v336_v38  ;;  %v306_v44 = vsel %vm178_vm7, %v625_v33, %v242_v39  ;;  %v224_v45 = vmul.f32 0.2, %v589_v37  ;;  %v653_v46 = vunpack.c.h.bf16 %v705_v30  ;;  %vm191_vm10 = vcmp.ge.f32.partialorder %v652_v40, 0.0 }
  0x43   :  { %v352_v47 = vpack.c.bf16 %v306_v44, %v305_v42  ;;  %v287_v48 = vsel %vm159_vm8, %v588_v36, %v223_v43  ;;  %v255_v49 = vmul.f32 0.2, %v652_v40  ;;  %v556_v50 = vunpack.c.l.bf16 %v555_v41 }
  0x44   :  { %v288_v52 = vsel %vm160_vm9, %v589_v37, %v224_v45  ;;  %vm192_vm11 = vcmp.ge.f32.partialorder %v653_v46, 0.0  ;;  %v256_v53 = vmul.f32 0.2, %v653_v46  ;;  %v557_v54 = vunpack.c.h.bf16 %v555_v41 }
  0x45   :  { %754 = vmatpush3.bf16.msra.mxu1 %v352_v47  ;;  %v343_v55 = vpack.c.bf16 %v288_v52, %v287_v48  ;;  %v319_v56 = vsel %vm191_vm10, %v652_v40, %v255_v49  ;;  %vm143_vm12 = vcmp.ge.f32.partialorder %v556_v50, 0.0  ;;  %v207_v57 = vmul.f32 0.2, %v556_v50 }
  0x46   :  { %v320_v58 = vsel %vm192_vm11, %v653_v46, %v256_v53  ;;  %vm144_vm13 = vcmp.ge.f32.partialorder %v557_v54, 0.0  ;;  %v208_v59 = vmul.f32 0.2, %v557_v54  ;;  %v620_v60 = vunpack.c.l.bf16 %v697_v51 }
  0x47   :  { %727 = vmatprep.subr.bf16.mxu0 %v343_v55  ;;  %v359_v61 = vpack.c.bf16 %v320_v58, %v319_v56  ;;  %v271_v62 = vsel %vm143_vm12, %v556_v50, %v207_v57  ;;  %v621_v63 = vunpack.c.h.bf16 %v697_v51  ;;  %vm537_vm0 = vcmask 15360  }
  0x48   :  { %v272_v0 = vsel %vm144_vm13, %v557_v54, %v208_v59  ;;  %vm175_vm14 = vcmp.ge.f32.partialorder %v620_v60, 0.0  ;;  %v239_v1 = vmul.f32 0.2, %v620_v60 }
  0x49   :  { %755 = vmatprep.subr.bf16.mxu1 %v359_v61  ;;  %v335_v2 = vpack.c.bf16 %v272_v0, %v271_v62  ;;  %vm176_vm15 = vcmp.ge.f32.partialorder %v621_v63, 0.0  ;;  %v240_v3 = vmul.f32 0.2, %v621_v63 }
  0x4a   :  { %v303_v4 = vsel %vm175_vm14, %v620_v60, %v239_v1 }
  0x4b   :  { %728 = vmatpush3.bf16.msra.mxu0 %v335_v2  ;;  %v304_v6 = vsel %vm176_vm15, %v621_v63, %v240_v3 }
  0x4c   :  { %v351_v8 = vpack.c.bf16 %v304_v6, %v303_v4 }
  0x4e   :  { %756 = vmatpush3.bf16.msra.mxu1 %v351_v8  ;;  %472 = vmatmul.mubr.bf16.vlgmr.msra.gmra.mxu0 %v772_v5 }
  0x4f   :  { %479 = vmatprep.mubr.bf16.mxu0 %v778_v7 }
  0x51   :  { %521 = vmatmul.mubr.bf16.vlgmr.msra.gmra.mxu1 %v775_v9 }
  0x52   :  { %528 = vmatprep.mubr.bf16.mxu1 %v780_v10 }
  0x56   :  { %480 = vmatmul.mubr.bf16.gmra.mxu0 %v782_v11 }
  0x59   :  { %529 = vmatmul.mubr.bf16.gmra.mxu1 %v783_v12 }
  0x83   :  { %v392_v31 = vpop.permute.xlu1 %391 }
  0x86   :  { %v382_v14 = vpop.permute.xlu0 %381 }
  0x8a   :  { %v387_v23 = vpop.permute.xlu0 %386 }
  0x8b   :  { %v397_v44 = vpop.permute.xlu1 %396 }
 0x10e   :  { %v729_v13 = vpop.f32.mrf.mxu0 }
 0x110   :  { %v730_v15 = vpop.f32.mrf.mxu0 }
 0x111   :  { %v757_v16 = vpop.f32.mrf.mxu1  ;;  %v731_v17 = vadd.f32 %v730_v15, %v729_v13 }
 0x112   :  { %v732_v18 = vpop.f32.mrf.mxu0 }
 0x113   :  { %v758_v19 = vpop.f32.mrf.mxu1  ;;  %v474_v20 = vadd.f32 %v731_v17, %v382_v14 }
 0x114   :  { %v759_v21 = vadd.f32 %v758_v19, %v757_v16  ;;  %v733_v22 = vpop.f32.mrf.mxu0 }
 0x115   :  { %v760_v24 = vpop.f32.mrf.mxu1  ;;  %v734_v25 = vadd.f32 %v733_v22, %v732_v18 }
 0x116   :  { %v523_v26 = vadd.f32 %v759_v21, %v474_v20  ;;  %v735_v27 = vpop.f32.mrf.mxu0 }
 0x117   :  { %v761_v28 = vpop.f32.mrf.mxu1  ;;  %v477_v29 = vadd.f32 %v734_v25, %v387_v23 }
 0x118   :  { %538 = vst.msk [vmem:[%s959_s3] sm:$0xff] %vm537_vm0, %v523_v26  ;;  %v762_v30 = vadd.f32 %v761_v28, %v760_v24  ;;  %v736_v32 = vpop.f32.mrf.mxu0 }
 0x119   :  { %v763_v33 = vpop.f32.mrf.mxu1  ;;  %v737_v34 = vadd.f32 %v736_v32, %v735_v27 }
 0x11a   :  { %v526_v35 = vadd.f32 %v762_v30, %v477_v29  ;;  %v738_v36 = vpop.f32.mrf.mxu0 }
 0x11b   :  { %v482_v37 = vadd.f32 %v737_v34, %v392_v31  ;;  %v764_v38 = vpop.f32.mrf.mxu1 }
 0x11c   :  { %539 = vst.msk [vmem:[%s959_s3 + $0x8] sm:$0xff] %vm537_vm0, %v526_v35  ;;  %v765_v39 = vadd.f32 %v764_v38, %v763_v33  ;;  %v739_v40 = vpop.f32.mrf.mxu0 }
 0x11d   :  { %v766_v41 = vpop.f32.mrf.mxu1  ;;  %v740_v42 = vadd.f32 %v739_v40, %v738_v36 }
 0x11e   :  { %v531_v43 = vadd.f32 %v765_v39, %v482_v37 }
 0x11f   :  { %v485_v45 = vadd.f32 %v740_v42, %v397_v44  ;;  %v767_v46 = vpop.f32.mrf.mxu1 }
 0x120   :  { %540 = vst.msk [vmem:[%s959_s3 + $0x10] sm:$0xff] %vm537_vm0, %v531_v43  ;;  %v768_v47 = vadd.f32 %v767_v46, %v766_v41 }
 0x122   :  { %v534_v48 = vadd.f32 %v768_v47, %v485_v45 }
 0x124   :  { %541 = vst.msk [vmem:[%s959_s3 + $0x18] sm:$0xff] %vm537_vm0, %v534_v48 }

// kernel: _lambda_.15
= control target key start
LH: loop header
LB: loop body
LE: loop exit
PB: predicated region body
PF: predicated region fallthrough
CT: control target
= control target key end

     0   :  { %vm388_vm0 = vcmask 64512   ;;  %s946_s1 = inlined_call_operand.vmem [shape: bf16[512,8], index: 1, kind: input, shape index: {}]   ;;  %s947_s0 = inlined_call_operand.vmem [shape: bf16[32,512], index: 0, kind: input, shape index: {}]   ;;  %s948_s2 = inlined_call_operand.vmem [shape: f32[32,1], index: 2, kind: input, shape index: {}]   ;;  %s949_s3 = inlined_call_operand.vmem [shape: f32[32,1], index: 3, kind: input, shape index: {}]   ;;  %s950_s4 = inlined_call_operand.vmem [shape: f32[32,8], index: 4, kind: output, shape index: {}]  }
   0x1   :  { %v656_v0 = vld [vmem:[%s946_s1 + $0x78] sm:$0xff]   ;;  %v655_v12 = vld [vmem:[%s946_s1 + $0x70] sm:$0xff]   ;;  %v654_v32 = vld [vmem:[%s946_s1 + $0x68] sm:$0xff]  }
   0x2   :  { %v672_v1 = vld [vmem:[%s946_s1 + $0xf8] sm:$0xff]   ;;  %v576_v3 = vunpack.c.l.bf16 %v656_v0  ;;  %v577_v4 = vunpack.c.h.bf16 %v656_v0  ;;  %v671_v17 = vld [vmem:[%s946_s1 + $0xf0] sm:$0xff]   ;;  %v572_v25 = vunpack.c.l.bf16 %v655_v12  ;;  %v573_v26 = vunpack.c.h.bf16 %v655_v12  ;;  %v670_v41 = vld [vmem:[%s946_s1 + $0xe8] sm:$0xff]  }
   0x3   :  { %v648_v2 = vld [vmem:[%s946_s1 + $0x38] sm:$0xff]   ;;  %v640_v5 = vunpack.c.l.bf16 %v672_v1  ;;  %v641_v6 = vunpack.c.h.bf16 %v672_v1  ;;  %v647_v22 = vld [vmem:[%s946_s1 + $0x30] sm:$0xff]   ;;  %v636_v30 = vunpack.c.l.bf16 %v671_v17  ;;  %v637_v31 = vunpack.c.h.bf16 %v671_v17  ;;  %v646_v46 = vld [vmem:[%s946_s1 + $0x28] sm:$0xff]  }
   0x4   :  { %v664_v7 = vld [vmem:[%s946_s1 + $0xb8] sm:$0xff]   ;;  %v544_v8 = vunpack.c.l.bf16 %v648_v2  ;;  %v545_v9 = vunpack.c.h.bf16 %v648_v2  ;;  %v176_v13 = vmax.f32 %v576_v3, 0.0  ;;  %v177_v14 = vmax.f32 %v577_v4, 0.0  ;;  %v663_v27 = vld [vmem:[%s946_s1 + $0xb0] sm:$0xff]   ;;  %v662_v51 = vld [vmem:[%s946_s1 + $0xa8] sm:$0xff]  }
   0x5   :  { %v608_v10 = vunpack.c.l.bf16 %v664_v7  ;;  %v609_v11 = vunpack.c.h.bf16 %v664_v7  ;;  %v208_v15 = vmax.f32 %v640_v5, 0.0  ;;  %v209_v16 = vmax.f32 %v641_v6, 0.0  ;;  %v653_v56 = vld [vmem:[%s946_s1 + $0x60] sm:$0xff]  }
   0x6   :  { %v160_v18 = vmax.f32 %v544_v8, 0.0  ;;  %v161_v19 = vmax.f32 %v545_v9, 0.0  ;;  %v225_v23 = vpack.c.bf16 %v177_v14, %v176_v13  ;;  %v174_v33 = vmax.f32 %v572_v25, 0.0  ;;  %v669_v61 = vld [vmem:[%s946_s1 + $0xe0] sm:$0xff]   ;;  %v737_v8 = vld [vmem:[%s947_s0 + $0xc] ss:$16 sps:$4 sm:$0xff]  }
   0x7   :  { %v192_v20 = vmax.f32 %v608_v10, 0.0  ;;  %v193_v21 = vmax.f32 %v609_v11, 0.0  ;;  %v241_v24 = vpack.c.bf16 %v209_v16, %v208_v15  ;;  %v175_v34 = vmax.f32 %v573_v26, 0.0  ;;  %v734_v62 = vld [vmem:[%s947_s0 + $0x4] ss:$16 sps:$4 sm:$0xff]   ;;  %371 = vmatprep.mubr.bf16.mxu1 %v737_v8 }
   0x8   :  { %v217_v28 = vpack.c.bf16 %v161_v19, %v160_v18  ;;  %673 = vmatprep.subr.bf16.mxu0 %v225_v23  ;;  %v540_v35 = vunpack.c.l.bf16 %v647_v22  ;;  %v541_v36 = vunpack.c.h.bf16 %v647_v22  ;;  %v206_v37 = vmax.f32 %v636_v30, 0.0  ;;  %v645_v3 = vld [vmem:[%s946_s1 + $0x20] sm:$0xff]   ;;  %322 = vmatprep.mubr.bf16.mxu0 %v734_v62  ;;  %v652_v18 = vld [vmem:[%s946_s1 + $0x58] sm:$0xff]  }
   0x9   :  { %v233_v29 = vpack.c.bf16 %v193_v21, %v192_v20  ;;  %701 = vmatprep.subr.bf16.mxu1 %v241_v24  ;;  %v207_v38 = vmax.f32 %v637_v31, 0.0  ;;  %v604_v39 = vunpack.c.l.bf16 %v663_v27  ;;  %v605_v40 = vunpack.c.h.bf16 %v663_v27  ;;  %v661_v13 = vld [vmem:[%s946_s1 + $0xa0] sm:$0xff]   ;;  %v668_v27 = vld [vmem:[%s946_s1 + $0xd8] sm:$0xff]  }
   0xa   :  { %674 = vmatpush3.bf16.msra.mxu0 %v217_v28  ;;  %v224_v42 = vpack.c.bf16 %v175_v34, %v174_v33  ;;  %v158_v43 = vmax.f32 %v540_v35, 0.0  ;;  %v159_v44 = vmax.f32 %v541_v36, 0.0  ;;  %v568_v45 = vunpack.c.l.bf16 %v654_v32 }
   0xb   :  { %702 = vmatpush3.bf16.msra.mxu1 %v233_v29  ;;  %v240_v47 = vpack.c.bf16 %v207_v38, %v206_v37  ;;  %v190_v48 = vmax.f32 %v604_v39, 0.0  ;;  %v191_v49 = vmax.f32 %v605_v40, 0.0  ;;  %v569_v50 = vunpack.c.h.bf16 %v654_v32  ;;  %v644_v32 = vld [vmem:[%s946_s1 + $0x18] sm:$0xff]  }
   0xc   :  { %675 = vmatprep.subr.bf16.mxu0 %v224_v42  ;;  %v216_v52 = vpack.c.bf16 %v159_v44, %v158_v43  ;;  %v172_v53 = vmax.f32 %v568_v45, 0.0  ;;  %v632_v54 = vunpack.c.l.bf16 %v670_v41  ;;  %v633_v55 = vunpack.c.h.bf16 %v670_v41  ;;  %v660_v37 = vld [vmem:[%s946_s1 + $0x98] sm:$0xff]   ;;  %v651_v42 = vld [vmem:[%s946_s1 + $0x50] sm:$0xff]  }
   0xd   :  { %703 = vmatprep.subr.bf16.mxu1 %v240_v47  ;;  %v232_v57 = vpack.c.bf16 %v191_v49, %v190_v48  ;;  %v173_v58 = vmax.f32 %v569_v50, 0.0  ;;  %v536_v59 = vunpack.c.l.bf16 %v646_v46  ;;  %v537_v60 = vunpack.c.h.bf16 %v646_v46 }
   0xe   :  { %676 = vmatpush3.bf16.msra.mxu0 %v216_v52  ;;  %v204_v63 = vmax.f32 %v632_v54, 0.0  ;;  %v205_v0 = vmax.f32 %v633_v55, 0.0  ;;  %v600_v1 = vunpack.c.l.bf16 %v662_v51  ;;  %v601_v2 = vunpack.c.h.bf16 %v662_v51  ;;  %v667_v51 = vld [vmem:[%s946_s1 + $0xd0] sm:$0xff]  }
   0xf   :  { %704 = vmatpush3.bf16.msra.mxu1 %v232_v57  ;;  %v223_v4 = vpack.c.bf16 %v173_v58, %v172_v53  ;;  %v156_v5 = vmax.f32 %v536_v59, 0.0  ;;  %v157_v6 = vmax.f32 %v537_v60, 0.0  ;;  %v564_v7 = vunpack.c.l.bf16 %v653_v56 }
  0x10   :  { %v239_v9 = vpack.c.bf16 %v205_v0, %v204_v63  ;;  %v188_v10 = vmax.f32 %v600_v1, 0.0  ;;  %v189_v11 = vmax.f32 %v601_v2, 0.0  ;;  %v565_v12 = vunpack.c.h.bf16 %v653_v56  ;;  %v643_v56 = vld [vmem:[%s946_s1 + $0x10] sm:$0xff]   ;;  %v650_v2 = vld [vmem:[%s946_s1 + $0x48] sm:$0xff]  }
  0x11   :  { %677 = vmatprep.subr.bf16.mxu0 %v223_v4  ;;  %v215_v14 = vpack.c.bf16 %v157_v6, %v156_v5  ;;  %v170_v15 = vmax.f32 %v564_v7, 0.0  ;;  %v628_v16 = vunpack.c.l.bf16 %v669_v61  ;;  %v629_v17 = vunpack.c.h.bf16 %v669_v61  ;;  %v659_v61 = vld [vmem:[%s946_s1 + $0x90] sm:$0xff]  }
  0x12   :  { %705 = vmatprep.subr.bf16.mxu1 %v239_v9  ;;  %v231_v19 = vpack.c.bf16 %v189_v11, %v188_v10  ;;  %v171_v20 = vmax.f32 %v565_v12, 0.0  ;;  %v532_v21 = vunpack.c.l.bf16 %v645_v3  ;;  %v533_v22 = vunpack.c.h.bf16 %v645_v3  ;;  %v666_v11 = vld [vmem:[%s946_s1 + $0xc8] sm:$0xff]  }
  0x13   :  { %678 = vmatpush3.bf16.msra.mxu0 %v215_v14  ;;  %v202_v23 = vmax.f32 %v628_v16, 0.0  ;;  %v203_v24 = vmax.f32 %v629_v17, 0.0  ;;  %v596_v25 = vunpack.c.l.bf16 %v661_v13  ;;  %v597_v26 = vunpack.c.h.bf16 %v661_v13  ;;  %v642_v16 = vld [vmem:[%s946_s1 + $0x8] sm:$0xff]  }
  0x14   :  { %706 = vmatpush3.bf16.msra.mxu1 %v231_v19  ;;  %v222_v28 = vpack.c.bf16 %v171_v20, %v170_v15  ;;  %v154_v29 = vmax.f32 %v532_v21, 0.0  ;;  %v155_v30 = vmax.f32 %v533_v22, 0.0  ;;  %v560_v31 = vunpack.c.l.bf16 %v652_v18  ;;  %v658_v21 = vld [vmem:[%s946_s1 + $0x88] sm:$0xff]  }
  0x15   :  { %v238_v33 = vpack.c.bf16 %v203_v24, %v202_v23  ;;  %v186_v34 = vmax.f32 %v596_v25, 0.0  ;;  %v187_v35 = vmax.f32 %v597_v26, 0.0  ;;  %v561_v36 = vunpack.c.h.bf16 %v652_v18  ;;  %v649_v26 = vld [vmem:[%s946_s1 + $0x40] sm:$0xff]  }
  0x16   :  { %679 = vmatprep.subr.bf16.mxu0 %v222_v28  ;;  %v214_v38 = vpack.c.bf16 %v155_v30, %v154_v29  ;;  %v168_v39 = vmax.f32 %v560_v31, 0.0  ;;  %v624_v40 = vunpack.c.l.bf16 %v668_v27  ;;  %v625_v41 = vunpack.c.h.bf16 %v668_v27 }
  0x17   :  { %707 = vmatprep.subr.bf16.mxu1 %v238_v33  ;;  %v230_v43 = vpack.c.bf16 %v187_v35, %v186_v34  ;;  %v169_v44 = vmax.f32 %v561_v36, 0.0  ;;  %v528_v45 = vunpack.c.l.bf16 %v644_v32  ;;  %v529_v46 = vunpack.c.h.bf16 %v644_v32  ;;  %v665_v35 = vld [vmem:[%s946_s1 + $0xc0] sm:$0xff]  }
  0x18   :  { %680 = vmatpush3.bf16.msra.mxu0 %v214_v38  ;;  %v200_v47 = vmax.f32 %v624_v40, 0.0  ;;  %v201_v48 = vmax.f32 %v625_v41, 0.0  ;;  %v592_v49 = vunpack.c.l.bf16 %v660_v37  ;;  %v593_v50 = vunpack.c.h.bf16 %v660_v37  ;;  %v515_v40 = vld [vmem:[%s946_s1] sm:$0xff]  }
  0x19   :  { %708 = vmatpush3.bf16.msra.mxu1 %v230_v43  ;;  %v221_v52 = vpack.c.bf16 %v169_v44, %v168_v39  ;;  %v152_v53 = vmax.f32 %v528_v45, 0.0  ;;  %v153_v54 = vmax.f32 %v529_v46, 0.0  ;;  %v556_v55 = vunpack.c.l.bf16 %v651_v42  ;;  %v657_v45 = vld [vmem:[%s946_s1 + $0x80] sm:$0xff]  }
  0x1a   :  { %v237_v57 = vpack.c.bf16 %v201_v48, %v200_v47  ;;  %v184_v58 = vmax.f32 %v592_v49, 0.0  ;;  %v185_v59 = vmax.f32 %v593_v50, 0.0  ;;  %v557_v60 = vunpack.c.h.bf16 %v651_v42 }
  0x1b   :  { %681 = vmatprep.subr.bf16.mxu0 %v221_v52  ;;  %v213_v62 = vpack.c.bf16 %v153_v54, %v152_v53  ;;  %v166_v63 = vmax.f32 %v556_v55, 0.0  ;;  %v620_v0 = vunpack.c.l.bf16 %v667_v51  ;;  %v621_v1 = vunpack.c.h.bf16 %v667_v51 }
  0x1c   :  { %709 = vmatprep.subr.bf16.mxu1 %v237_v57  ;;  %v229_v3 = vpack.c.bf16 %v185_v59, %v184_v58  ;;  %v167_v4 = vmax.f32 %v557_v60, 0.0  ;;  %v524_v5 = vunpack.c.l.bf16 %v643_v56  ;;  %v525_v6 = vunpack.c.h.bf16 %v643_v56 }
  0x1d   :  { %682 = vmatpush3.bf16.msra.mxu0 %v213_v62  ;;  %v198_v7 = vmax.f32 %v620_v0, 0.0  ;;  %v199_v8 = vmax.f32 %v621_v1, 0.0  ;;  %v588_v9 = vunpack.c.l.bf16 %v659_v61  ;;  %v589_v10 = vunpack.c.h.bf16 %v659_v61 }
  0x1e   :  { %710 = vmatpush3.bf16.msra.mxu1 %v229_v3  ;;  %v220_v12 = vpack.c.bf16 %v167_v4, %v166_v63  ;;  %v150_v13 = vmax.f32 %v524_v5, 0.0  ;;  %v151_v14 = vmax.f32 %v525_v6, 0.0  ;;  %v552_v15 = vunpack.c.l.bf16 %v650_v2  ;;  %v735_v3 = vld [vmem:[%s947_s0 + $0x8] ss:$16 sps:$4 sm:$0xff]   ;;  %v738_v4 = vld [vmem:[%s947_s0 + $0x24] ss:$16 sps:$4 sm:$0xff]  }
  0x1f   :  { %v236_v17 = vpack.c.bf16 %v199_v8, %v198_v7  ;;  %v182_v18 = vmax.f32 %v588_v9, 0.0  ;;  %v183_v19 = vmax.f32 %v589_v10, 0.0  ;;  %v553_v20 = vunpack.c.h.bf16 %v650_v2  ;;  %v732_v2 = vld [vmem:[%s947_s0] ss:$16 sps:$4 sm:$0xff]   ;;  %v740_v5 = vld [vmem:[%s947_s0 + $0x2c] ss:$16 sps:$4 sm:$0xff]  }
  0x20   :  { %683 = vmatprep.subr.bf16.mxu0 %v220_v12  ;;  %v212_v22 = vpack.c.bf16 %v151_v14, %v150_v13  ;;  %v164_v23 = vmax.f32 %v552_v15, 0.0  ;;  %v616_v24 = vunpack.c.l.bf16 %v666_v11  ;;  %v617_v25 = vunpack.c.h.bf16 %v666_v11  ;;  %v742_v6 = vld [vmem:[%s947_s0 + $0x20] ss:$16 sps:$4 sm:$0xff]   ;;  %v743_v7 = vld [vmem:[%s947_s0 + $0x28] ss:$16 sps:$4 sm:$0xff]  }
  0x21   :  { %711 = vmatprep.subr.bf16.mxu1 %v236_v17  ;;  %v228_v27 = vpack.c.bf16 %v183_v19, %v182_v18  ;;  %v165_v28 = vmax.f32 %v553_v20, 0.0  ;;  %v520_v29 = vunpack.c.l.bf16 %v642_v16  ;;  %v521_v30 = vunpack.c.h.bf16 %v642_v16 }
  0x22   :  { %684 = vmatpush3.bf16.msra.mxu0 %v212_v22  ;;  %v196_v31 = vmax.f32 %v616_v24, 0.0  ;;  %v197_v32 = vmax.f32 %v617_v25, 0.0  ;;  %v584_v33 = vunpack.c.l.bf16 %v658_v21  ;;  %v585_v34 = vunpack.c.h.bf16 %v658_v21 }
  0x23   :  { %712 = vmatpush3.bf16.msra.mxu1 %v228_v27  ;;  %v219_v36 = vpack.c.bf16 %v165_v28, %v164_v23  ;;  %v148_v37 = vmax.f32 %v520_v29, 0.0  ;;  %v149_v38 = vmax.f32 %v521_v30, 0.0  ;;  %v548_v39 = vunpack.c.l.bf16 %v649_v26 }
  0x24   :  { %v235_v41 = vpack.c.bf16 %v197_v32, %v196_v31  ;;  %v180_v42 = vmax.f32 %v584_v33, 0.0  ;;  %v181_v43 = vmax.f32 %v585_v34, 0.0  ;;  %v549_v44 = vunpack.c.h.bf16 %v649_v26 }
  0x25   :  { %685 = vmatprep.subr.bf16.mxu0 %v219_v36  ;;  %v211_v46 = vpack.c.bf16 %v149_v38, %v148_v37  ;;  %v162_v47 = vmax.f32 %v548_v39, 0.0  ;;  %v612_v48 = vunpack.c.l.bf16 %v665_v35  ;;  %v613_v49 = vunpack.c.h.bf16 %v665_v35 }
  0x26   :  { %713 = vmatprep.subr.bf16.mxu1 %v235_v41  ;;  %v227_v50 = vpack.c.bf16 %v181_v43, %v180_v42  ;;  %v163_v51 = vmax.f32 %v549_v44, 0.0  ;;  %v516_v52 = vunpack.c.l.bf16 %v515_v40  ;;  %v517_v53 = vunpack.c.h.bf16 %v515_v40 }
  0x27   :  { %686 = vmatpush3.bf16.msra.mxu0 %v211_v46  ;;  %v194_v54 = vmax.f32 %v612_v48, 0.0  ;;  %v195_v55 = vmax.f32 %v613_v49, 0.0  ;;  %v580_v56 = vunpack.c.l.bf16 %v657_v45  ;;  %v581_v57 = vunpack.c.h.bf16 %v657_v45 }
  0x28   :  { %714 = vmatpush3.bf16.msra.mxu1 %v227_v50  ;;  %v218_v58 = vpack.c.bf16 %v163_v51, %v162_v47  ;;  %v146_v59 = vmax.f32 %v516_v52, 0.0  ;;  %v147_v60 = vmax.f32 %v517_v53, 0.0  ;;  %v752_v40 = vmov 0  }
  0x29   :  { %v234_v61 = vpack.c.bf16 %v195_v55, %v194_v54  ;;  %v178_v62 = vmax.f32 %v580_v56, 0.0  ;;  %v179_v63 = vmax.f32 %v581_v57, 0.0  ;;  %731 = vset.pattern.permute.xlu1 %v752_v40  ;;  %730 = vset.pattern.permute.xlu0 %v752_v40  ;;  %v443_v56 = vld [vmem:[%s948_s2 + $0x8] sm:$0xff]  ;;  %v444_v57 = vld [vmem:[%s948_s2 + $0x10] sm:$0xff] }
  0x2a   :  { %687 = vmatprep.subr.bf16.mxu0 %v218_v58  ;;  %v210_v0 = vpack.c.bf16 %v147_v60, %v146_v59  ;;  %v445_v58 = vld [vmem:[%s948_s2 + $0x18] sm:$0xff]  ;;  %v442_v59 = vld [vmem:[%s948_s2] sm:$0xff] }
  0x2b   :  { %715 = vmatprep.subr.bf16.mxu1 %v234_v61  ;;  %v226_v1 = vpack.c.bf16 %v179_v63, %v178_v62  ;;  %v470_v60 = vld [vmem:[%s949_s3] sm:$0xff]  ;;  %v471_v61 = vld [vmem:[%s949_s3 + $0x8] sm:$0xff]  ;;  %v472_v62 = vld [vmem:[%s949_s3 + $0x10] sm:$0xff] }
  0x2c   :  { %688 = vmatpush3.bf16.msra.mxu0 %v210_v0 }
  0x2d   :  { %716 = vmatpush3.bf16.msra.mxu1 %v226_v1 }
  0x2f   :  { %323 = vmatmul.mubr.bf16.vlgmr.msra.gmra.mxu0 %v732_v2 }
  0x30   :  { %372 = vmatmul.mubr.bf16.vlgmr.msra.gmra.mxu1 %v735_v3  ;;  %330 = vmatprep.mubr.bf16.mxu0 %v738_v4  ;;  %v473_v4 = vld [vmem:[%s949_s3 + $0x18] sm:$0xff] }
  0x31   :  { %379 = vmatprep.mubr.bf16.mxu1 %v740_v5 }
  0x37   :  { %331 = vmatmul.mubr.bf16.gmra.mxu0 %v742_v6 }
  0x38   :  { %380 = vmatmul.mubr.bf16.gmra.mxu1 %v743_v7 }
  0xef   :  { %v689_v8 = vpop.f32.mrf.mxu0 }
  0xf0   :  { %v717_v9 = vpop.f32.mrf.mxu1 }
  0xf1   :  { %v690_v10 = vpop.f32.mrf.mxu0 }
  0xf2   :  { %v691_v11 = vadd.f32 %v690_v10, %v689_v8  ;;  %v718_v12 = vpop.f32.mrf.mxu1 }
  0xf3   :  { %v719_v13 = vadd.f32 %v718_v12, %v717_v9  ;;  %v692_v14 = vpop.f32.mrf.mxu0 }
  0xf4   :  { %v720_v15 = vpop.f32.mrf.mxu1 }
  0xf5   :  { %v693_v16 = vpop.f32.mrf.mxu0  ;;  %v374_v17 = vadd.f32 %v719_v13, %v691_v11 }
  0xf6   :  { %v694_v18 = vadd.f32 %v693_v16, %v692_v14  ;;  %v721_v19 = vpop.f32.mrf.mxu1 }
  0xf7   :  { %v722_v20 = vadd.f32 %v721_v19, %v720_v15  ;;  %v695_v21 = vpop.f32.mrf.mxu0  ;;  %v389_v22 = vsel %vm388_vm0, %v374_v17, 0.0 }
  0xf8   :  { %v723_v23 = vpop.f32.mrf.mxu1  ;;  %390 = vadd.xlane.f32.xlu0 %v389_v22 }
  0xf9   :  { %v696_v24 = vpop.f32.mrf.mxu0  ;;  %v377_v25 = vadd.f32 %v722_v20, %v694_v18 }
  0xfa   :  { %v697_v26 = vadd.f32 %v696_v24, %v695_v21  ;;  %v724_v27 = vpop.f32.mrf.mxu1 }
  0xfb   :  { %v725_v28 = vadd.f32 %v724_v27, %v723_v23  ;;  %v698_v29 = vpop.f32.mrf.mxu0  ;;  %v392_v30 = vsel %vm388_vm0, %v377_v25, 0.0 }
  0xfc   :  { %v726_v31 = vpop.f32.mrf.mxu1  ;;  %393 = vadd.xlane.f32.xlu0 %v392_v30 }
  0xfd   :  { %v699_v32 = vpop.f32.mrf.mxu0  ;;  %v382_v33 = vadd.f32 %v725_v28, %v697_v26 }
  0xfe   :  { %v700_v34 = vadd.f32 %v699_v32, %v698_v29  ;;  %v727_v35 = vpop.f32.mrf.mxu1 }
  0xff   :  { %v728_v36 = vadd.f32 %v727_v35, %v726_v31  ;;  %v395_v37 = vsel %vm388_vm0, %v382_v33, 0.0 }
 0x100   :  { %396 = vadd.xlane.f32.xlu1 %v395_v37 }
 0x101   :  { %v385_v38 = vadd.f32 %v728_v36, %v700_v34 }
 0x103   :  { %v398_v39 = vsel %vm388_vm0, %v385_v38, 0.0 }
 0x104   :  { %399 = vadd.xlane.f32.xlu1 %v398_v39 }
 0x181   :  { %v391_v41 = vpop.xlane.xlu0 %390 }
 0x182   :  { %v402_v42 = vmul.f32 0.125, %v391_v41 }
 0x184   :  { %v406_v43 = vsub.f32 %v374_v17, %v402_v42 }
 0x185   :  { %v394_v44 = vpop.xlane.xlu0 %393 }
 0x186   :  { %v403_v45 = vmul.f32 0.125, %v394_v44  ;;  %v410_v46 = vmul.f32 %v406_v43, %v406_v43 }
 0x188   :  { %v407_v47 = vsub.f32 %v377_v25, %v403_v45  ;;  %v414_v48 = vsel %vm388_vm0, %v410_v46, 0.0 }
 0x189   :  { %v397_v49 = vpop.xlane.xlu1 %396  ;;  %415 = vadd.xlane.f32.xlu0 %v414_v48 }
 0x18a   :  { %v404_v50 = vmul.f32 0.125, %v397_v49  ;;  %v411_v51 = vmul.f32 %v407_v47, %v407_v47 }
 0x18c   :  { %v408_v52 = vsub.f32 %v382_v33, %v404_v50  ;;  %v417_v53 = vsel %vm388_vm0, %v411_v51, 0.0 }
 0x18d   :  { %418 = vadd.xlane.f32.xlu1 %v417_v53  ;;  %v400_v63 = vpop.xlane.xlu1 %399 }
 0x18e   :  { %v412_v54 = vmul.f32 %v408_v52, %v408_v52  ;;  %v405_v0 = vmul.f32 0.125, %v400_v63 }
 0x190   :  { %v420_v55 = vsel %vm388_vm0, %v412_v54, 0.0  ;;  %v409_v1 = vsub.f32 %v385_v38, %v405_v0 }
 0x191   :  { %421 = vadd.xlane.f32.xlu0 %v420_v55 }
 0x192   :  { %v413_v2 = vmul.f32 %v409_v1, %v409_v1 }
 0x194   :  { %v423_v3 = vsel %vm388_vm0, %v413_v2, 0.0 }
 0x19e   :  { %453 = vperm.xlu1 %731, %v443_v56  }
 0x1a2   :  { %458 = vperm.xlu1 %731, %v444_v57  }
 0x1a6   :  { %463 = vperm.xlu1 %731, %v445_v58  }
 0x1a7   :  { %448 = vperm.xlu0 %730, %v442_v59  }
 0x1aa   :  { %476 = vperm.xlu1 %731, %v470_v60  }
 0x1ae   :  { %481 = vperm.xlu1 %731, %v471_v61  }
 0x1b2   :  { %486 = vperm.xlu1 %731, %v472_v62  }
 0x1d6   :  { %424 = vadd.xlane.f32.xlu1 %v423_v3 }
 0x1e7   :  { %491 = vperm.xlu1 %731, %v473_v4  }
 0x212   :  { %v416_v5 = vpop.xlane.xlu0 %415 }
 0x213   :  { %v426_v6 = vmul.f32 0.125, %v416_v5 }
 0x215   :  { %v430_v7 = vadd.f32 1e-05, %v426_v6 }
 0x216   :  { %v419_v8 = vpop.xlane.xlu1 %418 }
 0x217   :  { %744 = vrsqrt.f32 %v430_v7  ;;  %v427_v9 = vmul.f32 0.125, %v419_v8 }
 0x219   :  { %v431_v10 = vadd.f32 1e-05, %v427_v9 }
 0x21a   :  { %v454_v11 = vpop.permute.xlu1 %453  ;;  %v422_v12 = vpop.xlane.xlu0 %421 }
 0x21b   :  { %746 = vrsqrt.f32 %v431_v10  ;;  %v428_v13 = vmul.f32 0.125, %v422_v12 }
 0x21d   :  { %v432_v14 = vadd.f32 1e-05, %v428_v13 }
 0x21e   :  { %v459_v15 = vpop.permute.xlu1 %458 }
 0x21f   :  { %748 = vrsqrt.f32 %v432_v14 }
 0x222   :  { %v464_v16 = vpop.permute.xlu1 %463  ;;  %v449_v18 = vpop.permute.xlu0 %448 }
 0x224   :  { %v745_v17 = vpop.eup %744 }
 0x225   :  { %v438_v19 = vmul.f32 %v745_v17, %v406_v43 }
 0x226   :  { %v477_v20 = vpop.permute.xlu1 %476 }
 0x227   :  { %v466_v21 = vmul.f32 %v449_v18, %v438_v19 }
 0x228   :  { %v747_v22 = vpop.eup %746 }
 0x229   :  { %v439_v23 = vmul.f32 %v747_v22, %v407_v47  ;;  %v494_v24 = vadd.f32 %v477_v20, %v466_v21 }
 0x22a   :  { %v482_v25 = vpop.permute.xlu1 %481 }
 0x22b   :  { %v467_v26 = vmul.f32 %v454_v11, %v439_v23  ;;  %498 = vst.msk [vmem:[%s950_s4] sm:$0xff] %vm388_vm0, %v494_v24 }
 0x22c   :  { %v749_v27 = vpop.eup %748 }
 0x22d   :  { %v440_v28 = vmul.f32 %v749_v27, %v408_v52  ;;  %v495_v29 = vadd.f32 %v482_v25, %v467_v26 }
 0x22e   :  { %v487_v31 = vpop.permute.xlu1 %486 }
 0x22f   :  { %v468_v30 = vmul.f32 %v459_v15, %v440_v28  ;;  %499 = vst.msk [vmem:[%s950_s4 + $0x8] sm:$0xff] %vm388_vm0, %v495_v29 }
 0x231   :  { %v496_v32 = vadd.f32 %v487_v31, %v468_v30 }
 0x233   :  { %500 = vst.msk [vmem:[%s950_s4 + $0x10] sm:$0xff] %vm388_vm0, %v496_v32 }
 0x25f   :  { %v425_v33 = vpop.xlane.xlu1 %424 }
 0x260   :  { %v429_v34 = vmul.f32 0.125, %v425_v33 }
 0x262   :  { %v433_v35 = vadd.f32 1e-05, %v429_v34 }
 0x263   :  { %v492_v39 = vpop.permute.xlu1 %491 }
 0x264   :  { %750 = vrsqrt.f32 %v433_v35 }
 0x271   :  { %v751_v36 = vpop.eup %750 }
 0x272   :  { %v441_v37 = vmul.f32 %v751_v36, %v409_v1 }
 0x274   :  { %v469_v38 = vmul.f32 %v464_v16, %v441_v37 }
 0x276   :  { %v497_v40 = vadd.f32 %v492_v39, %v469_v38 }
 0x278   :  { %501 = vst.msk [vmem:[%s950_s4 + $0x18] sm:$0xff] %vm388_vm0, %v497_v40 }

// kernel: _lambda_.16
= control target key start
LH: loop header
LB: loop body
LE: loop exit
PB: predicated region body
PF: predicated region fallthrough
CT: control target
= control target key end

     0   :  { %vm678_vm0 = vcmask 261120   ;;  %s1428_s1 = inlined_call_operand.vmem [shape: bf16[1024,32], index: 1, kind: input, shape index: {}]   ;;  %s1429_s0 = inlined_call_operand.vmem [shape: bf16[16,1024], index: 0, kind: input, shape index: {}]   ;;  %s1430_s2 = inlined_call_operand.vmem [shape: f32[16,1], index: 2, kind: input, shape index: {}]   ;;  %s1431_s3 = inlined_call_operand.vmem [shape: f32[16,1], index: 3, kind: input, shape index: {}]   ;;  %s1432_s4 = inlined_call_operand.vmem [shape: f32[16,32], index: 4, kind: output, shape index: {}]  }
   0x1   :  { %v1018_v0 = vld [vmem:[%s1428_s1 + $0x78] sm:$0xff]   ;;  %v1017_v12 = vld [vmem:[%s1428_s1 + $0x70] sm:$0xff]   ;;  %v1016_v32 = vld [vmem:[%s1428_s1 + $0x68] sm:$0xff]  }
   0x2   :  { %v1034_v1 = vld [vmem:[%s1428_s1 + $0xf8] sm:$0xff]   ;;  %v810_v3 = vunpack.c.l.bf16 %v1018_v0  ;;  %v811_v4 = vunpack.c.h.bf16 %v1018_v0  ;;  %v1033_v17 = vld [vmem:[%s1428_s1 + $0xf0] sm:$0xff]   ;;  %v806_v25 = vunpack.c.l.bf16 %v1017_v12  ;;  %v807_v26 = vunpack.c.h.bf16 %v1017_v12  ;;  %v1032_v41 = vld [vmem:[%s1428_s1 + $0xe8] sm:$0xff]  }
   0x3   :  { %v1010_v2 = vld [vmem:[%s1428_s1 + $0x38] sm:$0xff]   ;;  %v874_v5 = vunpack.c.l.bf16 %v1034_v1  ;;  %v875_v6 = vunpack.c.h.bf16 %v1034_v1  ;;  %v1009_v22 = vld [vmem:[%s1428_s1 + $0x30] sm:$0xff]   ;;  %v870_v30 = vunpack.c.l.bf16 %v1033_v17  ;;  %v871_v31 = vunpack.c.h.bf16 %v1033_v17  ;;  %v1008_v46 = vld [vmem:[%s1428_s1 + $0x28] sm:$0xff]  }
   0x4   :  { %v1026_v7 = vld [vmem:[%s1428_s1 + $0xb8] sm:$0xff]   ;;  %v778_v8 = vunpack.c.l.bf16 %v1010_v2  ;;  %v779_v9 = vunpack.c.h.bf16 %v1010_v2  ;;  %v304_v13 = vmax.f32 %v810_v3, 0.0  ;;  %v305_v14 = vmax.f32 %v811_v4, 0.0  ;;  %v1025_v27 = vld [vmem:[%s1428_s1 + $0xb0] sm:$0xff]   ;;  %v1024_v51 = vld [vmem:[%s1428_s1 + $0xa8] sm:$0xff]  }
   0x5   :  { %v842_v10 = vunpack.c.l.bf16 %v1026_v7  ;;  %v843_v11 = vunpack.c.h.bf16 %v1026_v7  ;;  %v336_v15 = vmax.f32 %v874_v5, 0.0  ;;  %v337_v16 = vmax.f32 %v875_v6, 0.0  ;;  %v1015_v56 = vld [vmem:[%s1428_s1 + $0x60] sm:$0xff]  }
   0x6   :  { %v288_v18 = vmax.f32 %v778_v8, 0.0  ;;  %v289_v19 = vmax.f32 %v779_v9, 0.0  ;;  %v417_v23 = vpack.c.bf16 %v305_v14, %v304_v13  ;;  %v302_v33 = vmax.f32 %v806_v25, 0.0  ;;  %v1031_v1 = vld [vmem:[%s1428_s1 + $0xe0] sm:$0xff]   ;;  %v1030_v25 = vld [vmem:[%s1428_s1 + $0xd8] sm:$0xff]  }
   0x7   :  { %v320_v20 = vmax.f32 %v842_v10, 0.0  ;;  %v321_v21 = vmax.f32 %v843_v11, 0.0  ;;  %v433_v24 = vpack.c.bf16 %v337_v16, %v336_v15  ;;  %v303_v34 = vmax.f32 %v807_v26, 0.0  ;;  %v1007_v6 = vld [vmem:[%s1428_s1 + $0x20] sm:$0xff]   ;;  %v1014_v16 = vld [vmem:[%s1428_s1 + $0x58] sm:$0xff]  }
   0x8   :  { %v409_v28 = vpack.c.bf16 %v289_v19, %v288_v18  ;;  %1067 = vmatprep.subr.bf16.mxu0 %v417_v23  ;;  %v774_v35 = vunpack.c.l.bf16 %v1009_v22  ;;  %v775_v36 = vunpack.c.h.bf16 %v1009_v22  ;;  %v334_v37 = vmax.f32 %v870_v30, 0.0  ;;  %v1023_v11 = vld [vmem:[%s1428_s1 + $0xa0] sm:$0xff]   ;;  %v1006_v30 = vld [vmem:[%s1428_s1 + $0x18] sm:$0xff]  }
   0x9   :  { %v425_v29 = vpack.c.bf16 %v321_v21, %v320_v20  ;;  %1089 = vmatprep.subr.bf16.mxu1 %v433_v24  ;;  %v335_v38 = vmax.f32 %v871_v31, 0.0  ;;  %v838_v39 = vunpack.c.l.bf16 %v1025_v27  ;;  %v839_v40 = vunpack.c.h.bf16 %v1025_v27 }
   0xa   :  { %1068 = vmatpush3.bf16.msra.mxu0 %v409_v28  ;;  %v416_v42 = vpack.c.bf16 %v303_v34, %v302_v33  ;;  %v286_v43 = vmax.f32 %v774_v35, 0.0  ;;  %v287_v44 = vmax.f32 %v775_v36, 0.0  ;;  %v802_v45 = vunpack.c.l.bf16 %v1016_v32  ;;  %v1022_v35 = vld [vmem:[%s1428_s1 + $0x98] sm:$0xff]  }
   0xb   :  { %1090 = vmatpush3.bf16.msra.mxu1 %v425_v29  ;;  %v432_v47 = vpack.c.bf16 %v335_v38, %v334_v37  ;;  %v318_v48 = vmax.f32 %v838_v39, 0.0  ;;  %v319_v49 = vmax.f32 %v839_v40, 0.0  ;;  %v803_v50 = vunpack.c.h.bf16 %v1016_v32  ;;  %v1013_v40 = vld [vmem:[%s1428_s1 + $0x50] sm:$0xff]  }
   0xc   :  { %1069 = vmatprep.subr.bf16.mxu0 %v416_v42  ;;  %v408_v52 = vpack.c.bf16 %v287_v44, %v286_v43  ;;  %v300_v53 = vmax.f32 %v802_v45, 0.0  ;;  %v866_v54 = vunpack.c.l.bf16 %v1032_v41  ;;  %v867_v55 = vunpack.c.h.bf16 %v1032_v41 }
   0xd   :  { %1091 = vmatprep.subr.bf16.mxu1 %v432_v47  ;;  %v424_v57 = vpack.c.bf16 %v319_v49, %v318_v48  ;;  %v301_v58 = vmax.f32 %v803_v50, 0.0  ;;  %v770_v59 = vunpack.c.l.bf16 %v1008_v46  ;;  %v771_v60 = vunpack.c.h.bf16 %v1008_v46  ;;  %v1029_v49 = vld [vmem:[%s1428_s1 + $0xd0] sm:$0xff]  }
   0xe   :  { %1070 = vmatpush3.bf16.msra.mxu0 %v408_v52  ;;  %v332_v61 = vmax.f32 %v866_v54, 0.0  ;;  %v333_v62 = vmax.f32 %v867_v55, 0.0  ;;  %v834_v63 = vunpack.c.l.bf16 %v1024_v51  ;;  %v835_v0 = vunpack.c.h.bf16 %v1024_v51  ;;  %v1005_v54 = vld [vmem:[%s1428_s1 + $0x10] sm:$0xff]  }
   0xf   :  { %1092 = vmatpush3.bf16.msra.mxu1 %v424_v57  ;;  %v415_v2 = vpack.c.bf16 %v301_v58, %v300_v53  ;;  %v284_v3 = vmax.f32 %v770_v59, 0.0  ;;  %v285_v4 = vmax.f32 %v771_v60, 0.0  ;;  %v798_v5 = vunpack.c.l.bf16 %v1015_v56  ;;  %v1021_v59 = vld [vmem:[%s1428_s1 + $0x90] sm:$0xff]  }
  0x10   :  { %v431_v7 = vpack.c.bf16 %v333_v62, %v332_v61  ;;  %v316_v8 = vmax.f32 %v834_v63, 0.0  ;;  %v317_v9 = vmax.f32 %v835_v0, 0.0  ;;  %v799_v10 = vunpack.c.h.bf16 %v1015_v56  ;;  %v1012_v0 = vld [vmem:[%s1428_s1 + $0x48] sm:$0xff]  }
  0x11   :  { %1071 = vmatprep.subr.bf16.mxu0 %v415_v2  ;;  %v407_v12 = vpack.c.bf16 %v285_v4, %v284_v3  ;;  %v298_v13 = vmax.f32 %v798_v5, 0.0  ;;  %v862_v14 = vunpack.c.l.bf16 %v1031_v1  ;;  %v863_v15 = vunpack.c.h.bf16 %v1031_v1 }
  0x12   :  { %1093 = vmatprep.subr.bf16.mxu1 %v431_v7  ;;  %v423_v17 = vpack.c.bf16 %v317_v9, %v316_v8  ;;  %v299_v18 = vmax.f32 %v799_v10, 0.0  ;;  %v766_v19 = vunpack.c.l.bf16 %v1007_v6  ;;  %v767_v20 = vunpack.c.h.bf16 %v1007_v6  ;;  %v1028_v9 = vld [vmem:[%s1428_s1 + $0xc8] sm:$0xff]  }
  0x13   :  { %1072 = vmatpush3.bf16.msra.mxu0 %v407_v12  ;;  %v330_v21 = vmax.f32 %v862_v14, 0.0  ;;  %v331_v22 = vmax.f32 %v863_v15, 0.0  ;;  %v830_v23 = vunpack.c.l.bf16 %v1023_v11  ;;  %v831_v24 = vunpack.c.h.bf16 %v1023_v11  ;;  %v1004_v14 = vld [vmem:[%s1428_s1 + $0x8] sm:$0xff]  }
  0x14   :  { %1094 = vmatpush3.bf16.msra.mxu1 %v423_v17  ;;  %v414_v26 = vpack.c.bf16 %v299_v18, %v298_v13  ;;  %v282_v27 = vmax.f32 %v766_v19, 0.0  ;;  %v283_v28 = vmax.f32 %v767_v20, 0.0  ;;  %v794_v29 = vunpack.c.l.bf16 %v1014_v16  ;;  %v1020_v19 = vld [vmem:[%s1428_s1 + $0x88] sm:$0xff]  }
  0x15   :  { %v430_v31 = vpack.c.bf16 %v331_v22, %v330_v21  ;;  %v314_v32 = vmax.f32 %v830_v23, 0.0  ;;  %v315_v33 = vmax.f32 %v831_v24, 0.0  ;;  %v795_v34 = vunpack.c.h.bf16 %v1014_v16  ;;  %v1011_v24 = vld [vmem:[%s1428_s1 + $0x40] sm:$0xff]  }
  0x16   :  { %1073 = vmatprep.subr.bf16.mxu0 %v414_v26  ;;  %v406_v36 = vpack.c.bf16 %v283_v28, %v282_v27  ;;  %v296_v37 = vmax.f32 %v794_v29, 0.0  ;;  %v858_v38 = vunpack.c.l.bf16 %v1030_v25  ;;  %v859_v39 = vunpack.c.h.bf16 %v1030_v25 }
  0x17   :  { %1095 = vmatprep.subr.bf16.mxu1 %v430_v31  ;;  %v422_v41 = vpack.c.bf16 %v315_v33, %v314_v32  ;;  %v297_v42 = vmax.f32 %v795_v34, 0.0  ;;  %v762_v43 = vunpack.c.l.bf16 %v1006_v30  ;;  %v763_v44 = vunpack.c.h.bf16 %v1006_v30  ;;  %v1027_v33 = vld [vmem:[%s1428_s1 + $0xc0] sm:$0xff]  }
  0x18   :  { %1074 = vmatpush3.bf16.msra.mxu0 %v406_v36  ;;  %v328_v45 = vmax.f32 %v858_v38, 0.0  ;;  %v329_v46 = vmax.f32 %v859_v39, 0.0  ;;  %v826_v47 = vunpack.c.l.bf16 %v1022_v35  ;;  %v827_v48 = vunpack.c.h.bf16 %v1022_v35  ;;  %v749_v38 = vld [vmem:[%s1428_s1] sm:$0xff]  }
  0x19   :  { %1096 = vmatpush3.bf16.msra.mxu1 %v422_v41  ;;  %v413_v50 = vpack.c.bf16 %v297_v42, %v296_v37  ;;  %v280_v51 = vmax.f32 %v762_v43, 0.0  ;;  %v281_v52 = vmax.f32 %v763_v44, 0.0  ;;  %v790_v53 = vunpack.c.l.bf16 %v1013_v40  ;;  %v1019_v43 = vld [vmem:[%s1428_s1 + $0x80] sm:$0xff]  }
  0x1a   :  { %v429_v55 = vpack.c.bf16 %v329_v46, %v328_v45  ;;  %v312_v56 = vmax.f32 %v826_v47, 0.0  ;;  %v313_v57 = vmax.f32 %v827_v48, 0.0  ;;  %v791_v58 = vunpack.c.h.bf16 %v1013_v40  ;;  %v466_v48 = vld [vmem:[%s1429_s0] sm:$0xff] }
  0x1b   :  { %1075 = vmatprep.subr.bf16.mxu0 %v413_v50  ;;  %v405_v60 = vpack.c.bf16 %v281_v52, %v280_v51  ;;  %v294_v61 = vmax.f32 %v790_v53, 0.0  ;;  %v854_v62 = vunpack.c.l.bf16 %v1029_v49  ;;  %v855_v63 = vunpack.c.h.bf16 %v1029_v49  ;;  %v470_v49 = vld [vmem:[%s1429_s0 + $0x20] sm:$0xff] }
  0x1c   :  { %1097 = vmatprep.subr.bf16.mxu1 %v429_v55  ;;  %v421_v1 = vpack.c.bf16 %v313_v57, %v312_v56  ;;  %v295_v2 = vmax.f32 %v791_v58, 0.0  ;;  %v758_v3 = vunpack.c.l.bf16 %v1005_v54  ;;  %v759_v4 = vunpack.c.h.bf16 %v1005_v54  ;;  %v467_v58 = vld [vmem:[%s1429_s0 + $0x8] sm:$0xff] }
  0x1d   :  { %1076 = vmatpush3.bf16.msra.mxu0 %v405_v60  ;;  %v326_v5 = vmax.f32 %v854_v62, 0.0  ;;  %v327_v6 = vmax.f32 %v855_v63, 0.0  ;;  %v822_v7 = vunpack.c.l.bf16 %v1021_v59  ;;  %v823_v8 = vunpack.c.h.bf16 %v1021_v59  ;;  %v471_v59 = vld [vmem:[%s1429_s0 + $0x28] sm:$0xff]  ;;  %v1050_v60 = vld [vmem:[%s1428_s1 + $0x178] sm:$0xff]  }
  0x1e   :  { %1098 = vmatpush3.bf16.msra.mxu1 %v421_v1  ;;  %v412_v10 = vpack.c.bf16 %v295_v2, %v294_v61  ;;  %v278_v11 = vmax.f32 %v758_v3, 0.0  ;;  %v279_v12 = vmax.f32 %v759_v4, 0.0  ;;  %v786_v13 = vunpack.c.l.bf16 %v1012_v0  ;;  %v1066_v1 = vld [vmem:[%s1428_s1 + $0x1f8] sm:$0xff]  }
  0x1f   :  { %v428_v15 = vpack.c.bf16 %v327_v6, %v326_v5  ;;  %v310_v16 = vmax.f32 %v822_v7, 0.0  ;;  %v311_v17 = vmax.f32 %v823_v8, 0.0  ;;  %v787_v18 = vunpack.c.h.bf16 %v1012_v0  ;;  %v1042_v6 = vld [vmem:[%s1428_s1 + $0x138] sm:$0xff]  }
  0x20   :  { %1077 = vmatprep.subr.bf16.mxu0 %v412_v10  ;;  %v404_v20 = vpack.c.bf16 %v279_v12, %v278_v11  ;;  %v292_v21 = vmax.f32 %v786_v13, 0.0  ;;  %v850_v22 = vunpack.c.l.bf16 %v1028_v9  ;;  %v851_v23 = vunpack.c.h.bf16 %v1028_v9  ;;  %v1058_v7 = vld [vmem:[%s1428_s1 + $0x1b8] sm:$0xff]  }
  0x21   :  { %1099 = vmatprep.subr.bf16.mxu1 %v428_v15  ;;  %v420_v25 = vpack.c.bf16 %v311_v17, %v310_v16  ;;  %v293_v26 = vmax.f32 %v787_v18, 0.0  ;;  %v754_v27 = vunpack.c.l.bf16 %v1004_v14  ;;  %v755_v28 = vunpack.c.h.bf16 %v1004_v14  ;;  %v1049_v16 = vld [vmem:[%s1428_s1 + $0x170] sm:$0xff]  }
  0x22   :  { %1078 = vmatpush3.bf16.msra.mxu0 %v404_v20  ;;  %v324_v29 = vmax.f32 %v850_v22, 0.0  ;;  %v325_v30 = vmax.f32 %v851_v23, 0.0  ;;  %v818_v31 = vunpack.c.l.bf16 %v1020_v19  ;;  %v819_v32 = vunpack.c.h.bf16 %v1020_v19 }
  0x23   :  { %1100 = vmatpush3.bf16.msra.mxu1 %v420_v25  ;;  %v411_v34 = vpack.c.bf16 %v293_v26, %v292_v21  ;;  %v276_v35 = vmax.f32 %v754_v27, 0.0  ;;  %v277_v36 = vmax.f32 %v755_v28, 0.0  ;;  %v782_v37 = vunpack.c.l.bf16 %v1011_v24  ;;  %v1065_v25 = vld [vmem:[%s1428_s1 + $0x1f0] sm:$0xff]  }
  0x24   :  { %v427_v39 = vpack.c.bf16 %v325_v30, %v324_v29  ;;  %v308_v40 = vmax.f32 %v818_v31, 0.0  ;;  %v309_v41 = vmax.f32 %v819_v32, 0.0  ;;  %v783_v42 = vunpack.c.h.bf16 %v1011_v24  ;;  %v1041_v30 = vld [vmem:[%s1428_s1 + $0x130] sm:$0xff]  }
  0x25   :  { %1079 = vmatprep.subr.bf16.mxu0 %v411_v34  ;;  %v403_v44 = vpack.c.bf16 %v277_v36, %v276_v35  ;;  %v290_v45 = vmax.f32 %v782_v37, 0.0  ;;  %v846_v46 = vunpack.c.l.bf16 %v1027_v33  ;;  %v847_v47 = vunpack.c.h.bf16 %v1027_v33  ;;  %v1057_v35 = vld [vmem:[%s1428_s1 + $0x1b0] sm:$0xff]  }
  0x26   :  { %1101 = vmatprep.subr.bf16.mxu1 %v427_v39  ;;  %v419_v50 = vpack.c.bf16 %v309_v41, %v308_v40  ;;  %v291_v51 = vmax.f32 %v783_v42, 0.0  ;;  %v750_v52 = vunpack.c.l.bf16 %v749_v38  ;;  %v751_v53 = vunpack.c.h.bf16 %v749_v38  ;;  %v1048_v40 = vld [vmem:[%s1428_s1 + $0x168] sm:$0xff]  }
  0x27   :  { %1080 = vmatpush3.bf16.msra.mxu0 %v403_v44  ;;  %v322_v54 = vmax.f32 %v846_v46, 0.0  ;;  %v323_v55 = vmax.f32 %v847_v47, 0.0  ;;  %v814_v56 = vunpack.c.l.bf16 %v1019_v43  ;;  %v815_v57 = vunpack.c.h.bf16 %v1019_v43 }
  0x28   :  { %1102 = vmatpush3.bf16.msra.mxu1 %v419_v50  ;;  %v410_v61 = vpack.c.bf16 %v291_v51, %v290_v45  ;;  %v274_v62 = vmax.f32 %v750_v52, 0.0  ;;  %v275_v63 = vmax.f32 %v751_v53, 0.0  ;;  %v740_v0 = vcombine.low %v466_v48, %v470_v49 }
  0x29   :  { %v426_v2 = vpack.c.bf16 %v323_v55, %v322_v54  ;;  %v306_v3 = vmax.f32 %v814_v56, 0.0  ;;  %v307_v4 = vmax.f32 %v815_v57, 0.0  ;;  %v741_v5 = vcombine.high %v466_v48, %v470_v49  ;;  %v1064_v49 = vld [vmem:[%s1428_s1 + $0x1e8] sm:$0xff]  }
  0x2a   :  { %1081 = vmatprep.subr.bf16.mxu0 %v410_v61  ;;  %v402_v8 = vpack.c.bf16 %v275_v63, %v274_v62  ;;  %v742_v9 = vcombine.low %v467_v58, %v471_v59  ;;  %v743_v10 = vcombine.high %v467_v58, %v471_v59  ;;  %v938_v11 = vunpack.c.l.bf16 %v1050_v60  ;;  %v1040_v54 = vld [vmem:[%s1428_s1 + $0x128] sm:$0xff]  }
  0x2b   :  { %1103 = vmatprep.subr.bf16.mxu1 %v426_v2  ;;  %v418_v12 = vpack.c.bf16 %v307_v4, %v306_v3  ;;  %546 = vmatprep.mubr.bf16.mxu0 %v741_v5  ;;  %v939_v13 = vunpack.c.h.bf16 %v1050_v60  ;;  %v1002_v14 = vunpack.c.l.bf16 %v1066_v1  ;;  %v1003_v15 = vunpack.c.h.bf16 %v1066_v1  ;;  %v1056_v59 = vld [vmem:[%s1428_s1 + $0x1a8] sm:$0xff]  }
  0x2c   :  { %1082 = vmatpush3.bf16.msra.mxu0 %v402_v8  ;;  %587 = vmatprep.mubr.bf16.mxu1 %v743_v10  ;;  %v368_v17 = vmax.f32 %v938_v11, 0.0  ;;  %v906_v18 = vunpack.c.l.bf16 %v1042_v6  ;;  %v907_v19 = vunpack.c.h.bf16 %v1042_v6  ;;  %v970_v20 = vunpack.c.l.bf16 %v1058_v7 }
  0x2d   :  { %1104 = vmatpush3.bf16.msra.mxu1 %v418_v12  ;;  %v369_v21 = vmax.f32 %v939_v13, 0.0  ;;  %v400_v22 = vmax.f32 %v1002_v14, 0.0  ;;  %v401_v23 = vmax.f32 %v1003_v15, 0.0  ;;  %v971_v24 = vunpack.c.h.bf16 %v1058_v7  ;;  %v1039_v14 = vld [vmem:[%s1428_s1 + $0x120] sm:$0xff]  }
  0x2e   :  { %v352_v26 = vmax.f32 %v906_v18, 0.0  ;;  %v353_v27 = vmax.f32 %v907_v19, 0.0  ;;  %v384_v28 = vmax.f32 %v970_v20, 0.0  ;;  %v934_v29 = vunpack.c.l.bf16 %v1049_v16  ;;  %v1055_v19 = vld [vmem:[%s1428_s1 + $0x1a0] sm:$0xff]  }
  0x2f   :  { %547 = vmatmul.mubr.bf16.vlgmr.msra.gmra.mxu0 %v740_v0  ;;  %v449_v31 = vpack.c.bf16 %v369_v21, %v368_v17  ;;  %v465_v32 = vpack.c.bf16 %v401_v23, %v400_v22  ;;  %v385_v33 = vmax.f32 %v971_v24, 0.0  ;;  %v935_v34 = vunpack.c.h.bf16 %v1049_v16  ;;  %v1047_v0 = vld [vmem:[%s1428_s1 + $0x160] sm:$0xff]   ;;  %v1046_v24 = vld [vmem:[%s1428_s1 + $0x158] sm:$0xff]  }
  0x30   :  { %588 = vmatmul.mubr.bf16.vlgmr.msra.gmra.mxu1 %v742_v9  ;;  %v441_v36 = vpack.c.bf16 %v353_v27, %v352_v26  ;;  %v366_v37 = vmax.f32 %v934_v29, 0.0  ;;  %v998_v38 = vunpack.c.l.bf16 %v1065_v25  ;;  %v999_v39 = vunpack.c.h.bf16 %v1065_v25  ;;  %v1063_v9 = vld [vmem:[%s1428_s1 + $0x1e0] sm:$0xff]  }
  0x31   :  { %1111 = vmatprep.subr.bf16.mxu0 %v449_v31  ;;  %1133 = vmatprep.subr.bf16.mxu1 %v465_v32  ;;  %v457_v41 = vpack.c.bf16 %v385_v33, %v384_v28  ;;  %v367_v42 = vmax.f32 %v935_v34, 0.0  ;;  %v902_v43 = vunpack.c.l.bf16 %v1041_v30  ;;  %v903_v44 = vunpack.c.h.bf16 %v1041_v30  ;;  %v1062_v33 = vld [vmem:[%s1428_s1 + $0x1d8] sm:$0xff]  }
  0x32   :  { %1112 = vmatpush3.bf16.msra.mxu0 %v441_v36  ;;  %v398_v45 = vmax.f32 %v998_v38, 0.0  ;;  %v399_v46 = vmax.f32 %v999_v39, 0.0  ;;  %v966_v47 = vunpack.c.l.bf16 %v1057_v35  ;;  %v967_v48 = vunpack.c.h.bf16 %v1057_v35  ;;  %v1038_v38 = vld [vmem:[%s1428_s1 + $0x118] sm:$0xff]  }
  0x33   :  { %1134 = vmatpush3.bf16.msra.mxu1 %v457_v41  ;;  %v448_v50 = vpack.c.bf16 %v367_v42, %v366_v37  ;;  %v350_v51 = vmax.f32 %v902_v43, 0.0  ;;  %v351_v52 = vmax.f32 %v903_v44, 0.0  ;;  %v930_v53 = vunpack.c.l.bf16 %v1048_v40  ;;  %v1054_v43 = vld [vmem:[%s1428_s1 + $0x198] sm:$0xff]  }
  0x34   :  { %v464_v55 = vpack.c.bf16 %v399_v46, %v398_v45  ;;  %v382_v56 = vmax.f32 %v966_v47, 0.0  ;;  %v383_v57 = vmax.f32 %v967_v48, 0.0  ;;  %v931_v58 = vunpack.c.h.bf16 %v1048_v40  ;;  %v1045_v48 = vld [vmem:[%s1428_s1 + $0x150] sm:$0xff]  }
  0x35   :  { %1113 = vmatprep.subr.bf16.mxu0 %v448_v50  ;;  %v440_v60 = vpack.c.bf16 %v351_v52, %v350_v51  ;;  %v364_v61 = vmax.f32 %v930_v53, 0.0  ;;  %v994_v62 = vunpack.c.l.bf16 %v1064_v49  ;;  %v995_v63 = vunpack.c.h.bf16 %v1064_v49 }
  0x36   :  { %1135 = vmatprep.subr.bf16.mxu1 %v464_v55  ;;  %v456_v1 = vpack.c.bf16 %v383_v57, %v382_v56  ;;  %v365_v2 = vmax.f32 %v931_v58, 0.0  ;;  %v898_v3 = vunpack.c.l.bf16 %v1040_v54  ;;  %v899_v4 = vunpack.c.h.bf16 %v1040_v54  ;;  %v1061_v57 = vld [vmem:[%s1428_s1 + $0x1d0] sm:$0xff]  }
  0x37   :  { %1114 = vmatpush3.bf16.msra.mxu0 %v440_v60  ;;  %v396_v5 = vmax.f32 %v994_v62, 0.0  ;;  %v397_v6 = vmax.f32 %v995_v63, 0.0  ;;  %v962_v7 = vunpack.c.l.bf16 %v1056_v59  ;;  %v963_v8 = vunpack.c.h.bf16 %v1056_v59  ;;  %v1037_v62 = vld [vmem:[%s1428_s1 + $0x110] sm:$0xff]  }
  0x38   :  { %1136 = vmatpush3.bf16.msra.mxu1 %v456_v1  ;;  %v447_v10 = vpack.c.bf16 %v365_v2, %v364_v61  ;;  %v348_v11 = vmax.f32 %v898_v3, 0.0  ;;  %v349_v12 = vmax.f32 %v899_v4, 0.0  ;;  %v926_v13 = vunpack.c.l.bf16 %v1047_v0  ;;  %v1053_v3 = vld [vmem:[%s1428_s1 + $0x190] sm:$0xff]  }
  0x39   :  { %v463_v15 = vpack.c.bf16 %v397_v6, %v396_v5  ;;  %v380_v16 = vmax.f32 %v962_v7, 0.0  ;;  %v381_v17 = vmax.f32 %v963_v8, 0.0  ;;  %v927_v18 = vunpack.c.h.bf16 %v1047_v0  ;;  %v1044_v8 = vld [vmem:[%s1428_s1 + $0x148] sm:$0xff]  }
  0x3a   :  { %1115 = vmatprep.subr.bf16.mxu0 %v447_v10  ;;  %v439_v20 = vpack.c.bf16 %v349_v12, %v348_v11  ;;  %v362_v21 = vmax.f32 %v926_v13, 0.0  ;;  %v990_v22 = vunpack.c.l.bf16 %v1063_v9  ;;  %v991_v23 = vunpack.c.h.bf16 %v1063_v9 }
  0x3b   :  { %1137 = vmatprep.subr.bf16.mxu1 %v463_v15  ;;  %v455_v25 = vpack.c.bf16 %v381_v17, %v380_v16  ;;  %v363_v26 = vmax.f32 %v927_v18, 0.0  ;;  %v894_v27 = vunpack.c.l.bf16 %v1039_v14  ;;  %v895_v28 = vunpack.c.h.bf16 %v1039_v14  ;;  %v1060_v17 = vld [vmem:[%s1428_s1 + $0x1c8] sm:$0xff]  }
  0x3c   :  { %1116 = vmatpush3.bf16.msra.mxu0 %v439_v20  ;;  %v394_v29 = vmax.f32 %v990_v22, 0.0  ;;  %v395_v30 = vmax.f32 %v991_v23, 0.0  ;;  %v958_v31 = vunpack.c.l.bf16 %v1055_v19  ;;  %v959_v32 = vunpack.c.h.bf16 %v1055_v19  ;;  %v1036_v22 = vld [vmem:[%s1428_s1 + $0x108] sm:$0xff]  }
  0x3d   :  { %1138 = vmatpush3.bf16.msra.mxu1 %v455_v25  ;;  %v446_v34 = vpack.c.bf16 %v363_v26, %v362_v21  ;;  %v346_v35 = vmax.f32 %v894_v27, 0.0  ;;  %v347_v36 = vmax.f32 %v895_v28, 0.0  ;;  %v922_v37 = vunpack.c.l.bf16 %v1046_v24  ;;  %v1052_v27 = vld [vmem:[%s1428_s1 + $0x188] sm:$0xff]  }
  0x3e   :  { %v462_v39 = vpack.c.bf16 %v395_v30, %v394_v29  ;;  %v378_v40 = vmax.f32 %v958_v31, 0.0  ;;  %v379_v41 = vmax.f32 %v959_v32, 0.0  ;;  %v923_v42 = vunpack.c.h.bf16 %v1046_v24  ;;  %v1043_v32 = vld [vmem:[%s1428_s1 + $0x140] sm:$0xff]  }
  0x3f   :  { %1117 = vmatprep.subr.bf16.mxu0 %v446_v34  ;;  %v438_v44 = vpack.c.bf16 %v347_v36, %v346_v35  ;;  %v360_v45 = vmax.f32 %v922_v37, 0.0  ;;  %v986_v46 = vunpack.c.l.bf16 %v1062_v33  ;;  %v987_v47 = vunpack.c.h.bf16 %v1062_v33 }
  0x40   :  { %1139 = vmatprep.subr.bf16.mxu1 %v462_v39  ;;  %v454_v49 = vpack.c.bf16 %v379_v41, %v378_v40  ;;  %v361_v50 = vmax.f32 %v923_v42, 0.0  ;;  %v890_v51 = vunpack.c.l.bf16 %v1038_v38  ;;  %v891_v52 = vunpack.c.h.bf16 %v1038_v38  ;;  %v1059_v41 = vld [vmem:[%s1428_s1 + $0x1c0] sm:$0xff]  }
  0x41   :  { %1118 = vmatpush3.bf16.msra.mxu0 %v438_v44  ;;  %v392_v53 = vmax.f32 %v986_v46, 0.0  ;;  %v393_v54 = vmax.f32 %v987_v47, 0.0  ;;  %v954_v55 = vunpack.c.l.bf16 %v1054_v43  ;;  %v955_v56 = vunpack.c.h.bf16 %v1054_v43  ;;  %v1035_v46 = vld [vmem:[%s1428_s1 + $0x100] sm:$0xff]  }
  0x42   :  { %1140 = vmatpush3.bf16.msra.mxu1 %v454_v49  ;;  %v445_v58 = vpack.c.bf16 %v361_v50, %v360_v45  ;;  %v344_v59 = vmax.f32 %v890_v51, 0.0  ;;  %v345_v60 = vmax.f32 %v891_v52, 0.0  ;;  %v918_v61 = vunpack.c.l.bf16 %v1045_v48  ;;  %v1051_v51 = vld [vmem:[%s1428_s1 + $0x180] sm:$0xff]  }
  0x43   :  { %v461_v63 = vpack.c.bf16 %v393_v54, %v392_v53  ;;  %v376_v0 = vmax.f32 %v954_v55, 0.0  ;;  %v377_v1 = vmax.f32 %v955_v56, 0.0  ;;  %v919_v2 = vunpack.c.h.bf16 %v1045_v48 }
  0x44   :  { %1119 = vmatprep.subr.bf16.mxu0 %v445_v58  ;;  %v437_v4 = vpack.c.bf16 %v345_v60, %v344_v59  ;;  %v358_v5 = vmax.f32 %v918_v61, 0.0  ;;  %v982_v6 = vunpack.c.l.bf16 %v1061_v57  ;;  %v983_v7 = vunpack.c.h.bf16 %v1061_v57  ;;  %v468_v60 = vld [vmem:[%s1429_s0 + $0x10] sm:$0xff] }
  0x45   :  { %1141 = vmatprep.subr.bf16.mxu1 %v461_v63  ;;  %v453_v9 = vpack.c.bf16 %v377_v1, %v376_v0  ;;  %v359_v10 = vmax.f32 %v919_v2, 0.0  ;;  %v886_v11 = vunpack.c.l.bf16 %v1037_v62  ;;  %v887_v12 = vunpack.c.h.bf16 %v1037_v62  ;;  %v472_v61 = vld [vmem:[%s1429_s0 + $0x30] sm:$0xff]  ;;  %v469_v2 = vld [vmem:[%s1429_s0 + $0x18] sm:$0xff] }
  0x46   :  { %1120 = vmatpush3.bf16.msra.mxu0 %v437_v4  ;;  %v390_v13 = vmax.f32 %v982_v6, 0.0  ;;  %v391_v14 = vmax.f32 %v983_v7, 0.0  ;;  %v950_v15 = vunpack.c.l.bf16 %v1053_v3  ;;  %v951_v16 = vunpack.c.h.bf16 %v1053_v3  ;;  %v473_v3 = vld [vmem:[%s1429_s0 + $0x38] sm:$0xff] }
  0x47   :  { %1142 = vmatpush3.bf16.msra.mxu1 %v453_v9  ;;  %v444_v18 = vpack.c.bf16 %v359_v10, %v358_v5  ;;  %v342_v19 = vmax.f32 %v886_v11, 0.0  ;;  %v343_v20 = vmax.f32 %v887_v12, 0.0  ;;  %v914_v21 = vunpack.c.l.bf16 %v1044_v8 }
  0x48   :  { %v460_v23 = vpack.c.bf16 %v391_v14, %v390_v13  ;;  %v374_v24 = vmax.f32 %v950_v15, 0.0  ;;  %v375_v25 = vmax.f32 %v951_v16, 0.0  ;;  %v915_v26 = vunpack.c.h.bf16 %v1044_v8 }
  0x49   :  { %1121 = vmatprep.subr.bf16.mxu0 %v444_v18  ;;  %v436_v28 = vpack.c.bf16 %v343_v20, %v342_v19  ;;  %v356_v29 = vmax.f32 %v914_v21, 0.0  ;;  %v978_v30 = vunpack.c.l.bf16 %v1060_v17  ;;  %v979_v31 = vunpack.c.h.bf16 %v1060_v17  ;;  %v707_v17 = vld [vmem:[%s1430_s2 + $0x8] sm:$0xff]  ;;  %v720_v18 = vld [vmem:[%s1431_s3] sm:$0xff] }
  0x4a   :  { %1143 = vmatprep.subr.bf16.mxu1 %v460_v23  ;;  %v452_v33 = vpack.c.bf16 %v375_v25, %v374_v24  ;;  %v357_v34 = vmax.f32 %v915_v26, 0.0  ;;  %v882_v35 = vunpack.c.l.bf16 %v1036_v22  ;;  %v883_v36 = vunpack.c.h.bf16 %v1036_v22 }
  0x4b   :  { %1122 = vmatpush3.bf16.msra.mxu0 %v436_v28  ;;  %v388_v37 = vmax.f32 %v978_v30, 0.0  ;;  %v389_v38 = vmax.f32 %v979_v31, 0.0  ;;  %v946_v39 = vunpack.c.l.bf16 %v1052_v27  ;;  %v947_v40 = vunpack.c.h.bf16 %v1052_v27 }
  0x4c   :  { %1144 = vmatpush3.bf16.msra.mxu1 %v452_v33  ;;  %v443_v42 = vpack.c.bf16 %v357_v34, %v356_v29  ;;  %v340_v43 = vmax.f32 %v882_v35, 0.0  ;;  %v341_v44 = vmax.f32 %v883_v36, 0.0  ;;  %v910_v45 = vunpack.c.l.bf16 %v1043_v32 }
  0x4d   :  { %v459_v47 = vpack.c.bf16 %v389_v38, %v388_v37  ;;  %v372_v48 = vmax.f32 %v946_v39, 0.0  ;;  %v373_v49 = vmax.f32 %v947_v40, 0.0  ;;  %v911_v50 = vunpack.c.h.bf16 %v1043_v32 }
  0x4e   :  { %1123 = vmatprep.subr.bf16.mxu0 %v443_v42  ;;  %v435_v52 = vpack.c.bf16 %v341_v44, %v340_v43  ;;  %v354_v53 = vmax.f32 %v910_v45, 0.0  ;;  %v974_v54 = vunpack.c.l.bf16 %v1059_v41  ;;  %v975_v55 = vunpack.c.h.bf16 %v1059_v41 }
  0x4f   :  { %1145 = vmatprep.subr.bf16.mxu1 %v459_v47  ;;  %v451_v56 = vpack.c.bf16 %v373_v49, %v372_v48  ;;  %v355_v57 = vmax.f32 %v911_v50, 0.0  ;;  %v878_v58 = vunpack.c.l.bf16 %v1035_v46  ;;  %v879_v59 = vunpack.c.h.bf16 %v1035_v46 }
  0x50   :  { %1124 = vmatpush3.bf16.msra.mxu0 %v435_v52  ;;  %v386_v62 = vmax.f32 %v974_v54, 0.0  ;;  %v387_v63 = vmax.f32 %v975_v55, 0.0  ;;  %v942_v0 = vunpack.c.l.bf16 %v1051_v51  ;;  %v943_v1 = vunpack.c.h.bf16 %v1051_v51  ;;  %v706_v51 = vld [vmem:[%s1430_s2] sm:$0xff] }
  0x51   :  { %1146 = vmatpush3.bf16.msra.mxu1 %v451_v56  ;;  %v442_v4 = vpack.c.bf16 %v355_v57, %v354_v53  ;;  %v338_v5 = vmax.f32 %v878_v58, 0.0  ;;  %v339_v6 = vmax.f32 %v879_v59, 0.0  ;;  %v745_v10 = vcombine.high %v468_v60, %v472_v61 }
  0x52   :  { %v458_v7 = vpack.c.bf16 %v387_v63, %v386_v62  ;;  %v370_v8 = vmax.f32 %v942_v0, 0.0  ;;  %v371_v9 = vmax.f32 %v943_v1, 0.0  ;;  %v747_v12 = vcombine.high %v469_v2, %v473_v3  ;;  %v721_v62 = vld [vmem:[%s1431_s3 + $0x8] sm:$0xff] }
  0x53   :  { %1125 = vmatprep.subr.bf16.mxu0 %v442_v4  ;;  %v434_v11 = vpack.c.bf16 %v339_v6, %v338_v5  ;;  %v744_v14 = vcombine.low %v468_v60, %v472_v61  ;;  %628 = vmatprep.mubr.bf16.mxu0 %v745_v10  ;;  %v746_v15 = vcombine.low %v469_v2, %v473_v3  ;;  %v1162_v16 = vmov 0  }
  0x54   :  { %1147 = vmatprep.subr.bf16.mxu1 %v458_v7  ;;  %v450_v13 = vpack.c.bf16 %v371_v9, %v370_v8  ;;  %669 = vmatprep.mubr.bf16.mxu1 %v747_v12 }
  0x55   :  { %1126 = vmatpush3.bf16.msra.mxu0 %v434_v11  ;;  %1157 = vset.pattern.permute.xlu1 %v1162_v16 }
  0x56   :  { %1148 = vmatpush3.bf16.msra.mxu1 %v450_v13  ;;  %1156 = vset.pattern.permute.xlu0 %v1162_v16 }
  0x57   :  { %715 = vperm.xlu1 %1157, %v707_v17  }
  0x58   :  { %629 = vmatmul.mubr.bf16.vlgmr.msra.gmra.mxu0 %v744_v14 }
  0x59   :  { %670 = vmatmul.mubr.bf16.vlgmr.msra.gmra.mxu1 %v746_v15 }
  0x5b   :  { %724 = vperm.xlu1 %1157, %v720_v18  }
  0xd2   :  { %v716_v63 = vpop.permute.xlu1 %715 }
  0xd6   :  { %v725_v0 = vpop.permute.xlu1 %724 }
  0xef   :  { %v1083_v19 = vpop.f32.mrf.mxu0 }
  0xf0   :  { %v1105_v20 = vpop.f32.mrf.mxu1 }
  0xf1   :  { %v1084_v21 = vpop.f32.mrf.mxu0 }
  0xf2   :  { %v1106_v22 = vpop.f32.mrf.mxu1  ;;  %v1085_v26 = vadd.f32 %v1084_v21, %v1083_v19 }
  0xf3   :  { %v1086_v23 = vpop.f32.mrf.mxu0  ;;  %v1107_v27 = vadd.f32 %v1106_v22, %v1105_v20 }
  0xf4   :  { %v1108_v24 = vpop.f32.mrf.mxu1 }
  0xf5   :  { %v1087_v25 = vpop.f32.mrf.mxu0  ;;  %v590_v32 = vadd.f32 %v1107_v27, %v1085_v26 }
  0xf6   :  { %v1109_v28 = vpop.f32.mrf.mxu1  ;;  %v1088_v33 = vadd.f32 %v1087_v25, %v1086_v23 }
  0xf7   :  { %v1110_v34 = vadd.f32 %v1109_v28, %v1108_v24 }
  0xf9   :  { %v593_v42 = vadd.f32 %v1110_v34, %v1088_v33 }
 0x118   :  { %v1127_v29 = vpop.f32.mrf.mxu0 }
 0x119   :  { %v1149_v30 = vpop.f32.mrf.mxu1 }
 0x11a   :  { %v1128_v31 = vpop.f32.mrf.mxu0 }
 0x11b   :  { %v1129_v35 = vadd.f32 %v1128_v31, %v1127_v29  ;;  %v1150_v36 = vpop.f32.mrf.mxu1 }
 0x11c   :  { %v1130_v37 = vpop.f32.mrf.mxu0  ;;  %v1151_v39 = vadd.f32 %v1150_v36, %v1149_v30 }
 0x11d   :  { %v631_v38 = vadd.f32 %v1129_v35, %v590_v32  ;;  %v1152_v40 = vpop.f32.mrf.mxu1 }
 0x11e   :  { %v1131_v41 = vpop.f32.mrf.mxu0 }
 0x11f   :  { %v1132_v43 = vadd.f32 %v1131_v41, %v1130_v37  ;;  %v1153_v44 = vpop.f32.mrf.mxu1  ;;  %v672_v45 = vadd.f32 %v1151_v39, %v631_v38 }
 0x120   :  { %v1154_v47 = vadd.f32 %v1153_v44, %v1152_v40 }
 0x121   :  { %v634_v46 = vadd.f32 %v1132_v43, %v593_v42  ;;  %v679_v48 = vsel %vm678_vm0, %v672_v45, 0.0 }
 0x122   :  { %680 = vadd.xlane.f32.xlu0 %v679_v48 }
 0x123   :  { %v675_v49 = vadd.f32 %v1154_v47, %v634_v46 }
 0x125   :  { %v682_v50 = vsel %vm678_vm0, %v675_v49, 0.0 }
 0x126   :  { %683 = vadd.xlane.f32.xlu0 %v682_v50 }
 0x13c   :  { %710 = vperm.xlu0 %1156, %v706_v51  }
 0x1ab   :  { %v681_v52 = vpop.xlane.xlu0 %680 }
 0x1ac   :  { %v686_v53 = vmul.f32 0.03125, %v681_v52 }
 0x1ae   :  { %v688_v54 = vsub.f32 %v672_v45, %v686_v53 }
 0x1af   :  { %v684_v55 = vpop.xlane.xlu0 %683 }
 0x1b0   :  { %v687_v56 = vmul.f32 0.03125, %v684_v55  ;;  %v690_v57 = vmul.f32 %v688_v54, %v688_v54 }
 0x1b2   :  { %v689_v58 = vsub.f32 %v675_v49, %v687_v56  ;;  %v692_v59 = vsel %vm678_vm0, %v690_v57, 0.0 }
 0x1b3   :  { %693 = vadd.xlane.f32.xlu1 %v692_v59 }
 0x1b4   :  { %v691_v60 = vmul.f32 %v689_v58, %v689_v58 }
 0x1b6   :  { %v695_v61 = vsel %vm678_vm0, %v691_v60, 0.0 }
 0x1b7   :  { %696 = vadd.xlane.f32.xlu1 %v695_v61  ;;  %v711_v8 = vpop.permute.xlu0 %710 }
 0x1c8   :  { %729 = vperm.xlu1 %1157, %v721_v62  }
 0x23c   :  { %v694_v1 = vpop.xlane.xlu1 %693 }
 0x23d   :  { %v698_v2 = vmul.f32 0.03125, %v694_v1 }
 0x23f   :  { %v700_v3 = vadd.f32 1e-05, %v698_v2 }
 0x240   :  { %v697_v4 = vpop.xlane.xlu1 %696 }
 0x241   :  { %1158 = vrsqrt.f32 %v700_v3  ;;  %v699_v5 = vmul.f32 0.03125, %v697_v4 }
 0x243   :  { %v701_v6 = vadd.f32 1e-05, %v699_v5 }
 0x244   :  { %v730_v15 = vpop.permute.xlu1 %729 }
 0x245   :  { %1160 = vrsqrt.f32 %v701_v6 }
 0x24e   :  { %v1159_v7 = vpop.eup %1158 }
 0x24f   :  { %v704_v9 = vmul.f32 %v1159_v7, %v688_v54 }
 0x251   :  { %v718_v10 = vmul.f32 %v711_v8, %v704_v9 }
 0x252   :  { %v1161_v11 = vpop.eup %1160 }
 0x253   :  { %v705_v12 = vmul.f32 %v1161_v11, %v689_v58  ;;  %v732_v13 = vadd.f32 %v725_v0, %v718_v10 }
 0x255   :  { %v719_v14 = vmul.f32 %v716_v63, %v705_v12  ;;  %734 = vst.msk [vmem:[%s1432_s4] sm:$0xff] %vm678_vm0, %v732_v13 }
 0x257   :  { %v733_v16 = vadd.f32 %v730_v15, %v719_v14 }
 0x259   :  { %735 = vst.msk [vmem:[%s1432_s4 + $0x8] sm:$0xff] %vm678_vm0, %v733_v16 }

// kernel: _lambda_.17
= control target key start
LH: loop header
LB: loop body
LE: loop exit
PB: predicated region body
PF: predicated region fallthrough
CT: control target
= control target key end

     0   :  { %s722_s1 = inlined_call_operand.vmem [shape: bf16[512,128], index: 1, kind: input, shape index: {}]   ;;  %s723_s0 = inlined_call_operand.vmem [shape: bf16[8,512], index: 0, kind: input, shape index: {}]   ;;  %s724_s2 = inlined_call_operand.vmem [shape: f32[8,1], index: 2, kind: input, shape index: {}]   ;;  %s725_s3 = inlined_call_operand.vmem [shape: f32[8,1], index: 3, kind: input, shape index: {}]   ;;  %s726_s4 = inlined_call_operand.vmem [shape: f32[8,128], index: 4, kind: output, shape index: {}]  }
   0x1   :  { %v515_v0 = vld [vmem:[%s722_s1 + $0x78] sm:$0xff]   ;;  %v514_v12 = vld [vmem:[%s722_s1 + $0x70] sm:$0xff]   ;;  %v513_v32 = vld [vmem:[%s722_s1 + $0x68] sm:$0xff]  }
   0x2   :  { %v531_v1 = vld [vmem:[%s722_s1 + $0xf8] sm:$0xff]   ;;  %v435_v3 = vunpack.c.l.bf16 %v515_v0  ;;  %v436_v4 = vunpack.c.h.bf16 %v515_v0  ;;  %v530_v17 = vld [vmem:[%s722_s1 + $0xf0] sm:$0xff]   ;;  %v431_v25 = vunpack.c.l.bf16 %v514_v12  ;;  %v432_v26 = vunpack.c.h.bf16 %v514_v12  ;;  %v529_v41 = vld [vmem:[%s722_s1 + $0xe8] sm:$0xff]  }
   0x3   :  { %v507_v2 = vld [vmem:[%s722_s1 + $0x38] sm:$0xff]   ;;  %v499_v5 = vunpack.c.l.bf16 %v531_v1  ;;  %v500_v6 = vunpack.c.h.bf16 %v531_v1  ;;  %v506_v22 = vld [vmem:[%s722_s1 + $0x30] sm:$0xff]   ;;  %v495_v30 = vunpack.c.l.bf16 %v530_v17  ;;  %v496_v31 = vunpack.c.h.bf16 %v530_v17  ;;  %v505_v46 = vld [vmem:[%s722_s1 + $0x28] sm:$0xff]  }
   0x4   :  { %v523_v7 = vld [vmem:[%s722_s1 + $0xb8] sm:$0xff]   ;;  %v403_v8 = vunpack.c.l.bf16 %v507_v2  ;;  %v404_v9 = vunpack.c.h.bf16 %v507_v2  ;;  %v176_v13 = vmax.f32 %v435_v3, 0.0  ;;  %v177_v14 = vmax.f32 %v436_v4, 0.0  ;;  %v522_v27 = vld [vmem:[%s722_s1 + $0xb0] sm:$0xff]   ;;  %v521_v51 = vld [vmem:[%s722_s1 + $0xa8] sm:$0xff]  }
   0x5   :  { %v467_v10 = vunpack.c.l.bf16 %v523_v7  ;;  %v468_v11 = vunpack.c.h.bf16 %v523_v7  ;;  %v208_v15 = vmax.f32 %v499_v5, 0.0  ;;  %v209_v16 = vmax.f32 %v500_v6, 0.0  ;;  %v512_v56 = vld [vmem:[%s722_s1 + $0x60] sm:$0xff]  }
   0x6   :  { %v160_v18 = vmax.f32 %v403_v8, 0.0  ;;  %v161_v19 = vmax.f32 %v404_v9, 0.0  ;;  %v225_v23 = vpack.c.bf16 %v177_v14, %v176_v13  ;;  %v174_v33 = vmax.f32 %v431_v25, 0.0  ;;  %v528_v1 = vld [vmem:[%s722_s1 + $0xe0] sm:$0xff]   ;;  %v527_v25 = vld [vmem:[%s722_s1 + $0xd8] sm:$0xff]  }
   0x7   :  { %v192_v20 = vmax.f32 %v467_v10, 0.0  ;;  %v193_v21 = vmax.f32 %v468_v11, 0.0  ;;  %v241_v24 = vpack.c.bf16 %v209_v16, %v208_v15  ;;  %v175_v34 = vmax.f32 %v432_v26, 0.0  ;;  %v504_v6 = vld [vmem:[%s722_s1 + $0x20] sm:$0xff]   ;;  %v511_v16 = vld [vmem:[%s722_s1 + $0x58] sm:$0xff]  }
   0x8   :  { %v217_v28 = vpack.c.bf16 %v161_v19, %v160_v18  ;;  %532 = vmatprep.subr.bf16.mxu0 %v225_v23  ;;  %v399_v35 = vunpack.c.l.bf16 %v506_v22  ;;  %v400_v36 = vunpack.c.h.bf16 %v506_v22  ;;  %v206_v37 = vmax.f32 %v495_v30, 0.0  ;;  %v520_v11 = vld [vmem:[%s722_s1 + $0xa0] sm:$0xff]   ;;  %v503_v30 = vld [vmem:[%s722_s1 + $0x18] sm:$0xff]  }
   0x9   :  { %v233_v29 = vpack.c.bf16 %v193_v21, %v192_v20  ;;  %554 = vmatprep.subr.bf16.mxu1 %v241_v24  ;;  %v207_v38 = vmax.f32 %v496_v31, 0.0  ;;  %v463_v39 = vunpack.c.l.bf16 %v522_v27  ;;  %v464_v40 = vunpack.c.h.bf16 %v522_v27 }
   0xa   :  { %533 = vmatpush3.bf16.msra.mxu0 %v217_v28  ;;  %v224_v42 = vpack.c.bf16 %v175_v34, %v174_v33  ;;  %v158_v43 = vmax.f32 %v399_v35, 0.0  ;;  %v159_v44 = vmax.f32 %v400_v36, 0.0  ;;  %v427_v45 = vunpack.c.l.bf16 %v513_v32  ;;  %v519_v35 = vld [vmem:[%s722_s1 + $0x98] sm:$0xff]  }
   0xb   :  { %555 = vmatpush3.bf16.msra.mxu1 %v233_v29  ;;  %v240_v47 = vpack.c.bf16 %v207_v38, %v206_v37  ;;  %v190_v48 = vmax.f32 %v463_v39, 0.0  ;;  %v191_v49 = vmax.f32 %v464_v40, 0.0  ;;  %v428_v50 = vunpack.c.h.bf16 %v513_v32  ;;  %v510_v40 = vld [vmem:[%s722_s1 + $0x50] sm:$0xff]  }
   0xc   :  { %534 = vmatprep.subr.bf16.mxu0 %v224_v42  ;;  %v216_v52 = vpack.c.bf16 %v159_v44, %v158_v43  ;;  %v172_v53 = vmax.f32 %v427_v45, 0.0  ;;  %v491_v54 = vunpack.c.l.bf16 %v529_v41  ;;  %v492_v55 = vunpack.c.h.bf16 %v529_v41 }
   0xd   :  { %556 = vmatprep.subr.bf16.mxu1 %v240_v47  ;;  %v232_v57 = vpack.c.bf16 %v191_v49, %v190_v48  ;;  %v173_v58 = vmax.f32 %v428_v50, 0.0  ;;  %v395_v59 = vunpack.c.l.bf16 %v505_v46  ;;  %v396_v60 = vunpack.c.h.bf16 %v505_v46  ;;  %v526_v49 = vld [vmem:[%s722_s1 + $0xd0] sm:$0xff]  }
   0xe   :  { %535 = vmatpush3.bf16.msra.mxu0 %v216_v52  ;;  %v204_v61 = vmax.f32 %v491_v54, 0.0  ;;  %v205_v62 = vmax.f32 %v492_v55, 0.0  ;;  %v459_v63 = vunpack.c.l.bf16 %v521_v51  ;;  %v460_v0 = vunpack.c.h.bf16 %v521_v51  ;;  %v502_v54 = vld [vmem:[%s722_s1 + $0x10] sm:$0xff]  }
   0xf   :  { %557 = vmatpush3.bf16.msra.mxu1 %v232_v57  ;;  %v223_v2 = vpack.c.bf16 %v173_v58, %v172_v53  ;;  %v156_v3 = vmax.f32 %v395_v59, 0.0  ;;  %v157_v4 = vmax.f32 %v396_v60, 0.0  ;;  %v423_v5 = vunpack.c.l.bf16 %v512_v56  ;;  %v518_v59 = vld [vmem:[%s722_s1 + $0x90] sm:$0xff]  }
  0x10   :  { %v239_v7 = vpack.c.bf16 %v205_v62, %v204_v61  ;;  %v188_v8 = vmax.f32 %v459_v63, 0.0  ;;  %v189_v9 = vmax.f32 %v460_v0, 0.0  ;;  %v424_v10 = vunpack.c.h.bf16 %v512_v56  ;;  %v509_v0 = vld [vmem:[%s722_s1 + $0x48] sm:$0xff]  }
  0x11   :  { %536 = vmatprep.subr.bf16.mxu0 %v223_v2  ;;  %v215_v12 = vpack.c.bf16 %v157_v4, %v156_v3  ;;  %v170_v13 = vmax.f32 %v423_v5, 0.0  ;;  %v487_v14 = vunpack.c.l.bf16 %v528_v1  ;;  %v488_v15 = vunpack.c.h.bf16 %v528_v1 }
  0x12   :  { %558 = vmatprep.subr.bf16.mxu1 %v239_v7  ;;  %v231_v17 = vpack.c.bf16 %v189_v9, %v188_v8  ;;  %v171_v18 = vmax.f32 %v424_v10, 0.0  ;;  %v391_v19 = vunpack.c.l.bf16 %v504_v6  ;;  %v392_v20 = vunpack.c.h.bf16 %v504_v6  ;;  %v525_v9 = vld [vmem:[%s722_s1 + $0xc8] sm:$0xff]  }
  0x13   :  { %537 = vmatpush3.bf16.msra.mxu0 %v215_v12  ;;  %v202_v21 = vmax.f32 %v487_v14, 0.0  ;;  %v203_v22 = vmax.f32 %v488_v15, 0.0  ;;  %v455_v23 = vunpack.c.l.bf16 %v520_v11  ;;  %v456_v24 = vunpack.c.h.bf16 %v520_v11  ;;  %v501_v14 = vld [vmem:[%s722_s1 + $0x8] sm:$0xff]  }
  0x14   :  { %559 = vmatpush3.bf16.msra.mxu1 %v231_v17  ;;  %v222_v26 = vpack.c.bf16 %v171_v18, %v170_v13  ;;  %v154_v27 = vmax.f32 %v391_v19, 0.0  ;;  %v155_v28 = vmax.f32 %v392_v20, 0.0  ;;  %v419_v29 = vunpack.c.l.bf16 %v511_v16  ;;  %v517_v19 = vld [vmem:[%s722_s1 + $0x88] sm:$0xff]  }
  0x15   :  { %v238_v31 = vpack.c.bf16 %v203_v22, %v202_v21  ;;  %v186_v32 = vmax.f32 %v455_v23, 0.0  ;;  %v187_v33 = vmax.f32 %v456_v24, 0.0  ;;  %v420_v34 = vunpack.c.h.bf16 %v511_v16  ;;  %v508_v24 = vld [vmem:[%s722_s1 + $0x40] sm:$0xff]  }
  0x16   :  { %538 = vmatprep.subr.bf16.mxu0 %v222_v26  ;;  %v214_v36 = vpack.c.bf16 %v155_v28, %v154_v27  ;;  %v168_v37 = vmax.f32 %v419_v29, 0.0  ;;  %v483_v38 = vunpack.c.l.bf16 %v527_v25  ;;  %v484_v39 = vunpack.c.h.bf16 %v527_v25 }
  0x17   :  { %560 = vmatprep.subr.bf16.mxu1 %v238_v31  ;;  %v230_v41 = vpack.c.bf16 %v187_v33, %v186_v32  ;;  %v169_v42 = vmax.f32 %v420_v34, 0.0  ;;  %v387_v43 = vunpack.c.l.bf16 %v503_v30  ;;  %v388_v44 = vunpack.c.h.bf16 %v503_v30  ;;  %v524_v33 = vld [vmem:[%s722_s1 + $0xc0] sm:$0xff]  }
  0x18   :  { %539 = vmatpush3.bf16.msra.mxu0 %v214_v36  ;;  %v200_v45 = vmax.f32 %v483_v38, 0.0  ;;  %v201_v46 = vmax.f32 %v484_v39, 0.0  ;;  %v451_v47 = vunpack.c.l.bf16 %v519_v35  ;;  %v452_v48 = vunpack.c.h.bf16 %v519_v35  ;;  %v374_v38 = vld [vmem:[%s722_s1] sm:$0xff]  }
  0x19   :  { %561 = vmatpush3.bf16.msra.mxu1 %v230_v41  ;;  %v221_v50 = vpack.c.bf16 %v169_v42, %v168_v37  ;;  %v152_v51 = vmax.f32 %v387_v43, 0.0  ;;  %v153_v52 = vmax.f32 %v388_v44, 0.0  ;;  %v415_v53 = vunpack.c.l.bf16 %v510_v40  ;;  %v516_v43 = vld [vmem:[%s722_s1 + $0x80] sm:$0xff]  }
  0x1a   :  { %v237_v55 = vpack.c.bf16 %v201_v46, %v200_v45  ;;  %v184_v56 = vmax.f32 %v451_v47, 0.0  ;;  %v185_v57 = vmax.f32 %v452_v48, 0.0  ;;  %v416_v58 = vunpack.c.h.bf16 %v510_v40 }
  0x1b   :  { %540 = vmatprep.subr.bf16.mxu0 %v221_v50  ;;  %v213_v60 = vpack.c.bf16 %v153_v52, %v152_v51  ;;  %v166_v61 = vmax.f32 %v415_v53, 0.0  ;;  %v479_v62 = vunpack.c.l.bf16 %v526_v49  ;;  %v480_v63 = vunpack.c.h.bf16 %v526_v49  ;;  %v242_v52 = vld [vmem:[%s723_s0] sm:$0xff] }
  0x1c   :  { %562 = vmatprep.subr.bf16.mxu1 %v237_v55  ;;  %v229_v1 = vpack.c.bf16 %v185_v57, %v184_v56  ;;  %v167_v2 = vmax.f32 %v416_v58, 0.0  ;;  %v383_v3 = vunpack.c.l.bf16 %v502_v54  ;;  %v384_v4 = vunpack.c.h.bf16 %v502_v54  ;;  %v243_v57 = vld [vmem:[%s723_s0 + $0x8] sm:$0xff] }
  0x1d   :  { %541 = vmatpush3.bf16.msra.mxu0 %v213_v60  ;;  %v198_v5 = vmax.f32 %v479_v62, 0.0  ;;  %v199_v6 = vmax.f32 %v480_v63, 0.0  ;;  %v447_v7 = vunpack.c.l.bf16 %v518_v59  ;;  %v448_v8 = vunpack.c.h.bf16 %v518_v59 }
  0x1e   :  { %563 = vmatpush3.bf16.msra.mxu1 %v229_v1  ;;  %v220_v10 = vpack.c.bf16 %v167_v2, %v166_v61  ;;  %v150_v11 = vmax.f32 %v383_v3, 0.0  ;;  %v151_v12 = vmax.f32 %v384_v4, 0.0  ;;  %v411_v13 = vunpack.c.l.bf16 %v509_v0 }
  0x1f   :  { %v236_v15 = vpack.c.bf16 %v199_v6, %v198_v5  ;;  %v182_v16 = vmax.f32 %v447_v7, 0.0  ;;  %v183_v17 = vmax.f32 %v448_v8, 0.0  ;;  %v412_v18 = vunpack.c.h.bf16 %v509_v0 }
  0x20   :  { %542 = vmatprep.subr.bf16.mxu0 %v220_v10  ;;  %v212_v20 = vpack.c.bf16 %v151_v12, %v150_v11  ;;  %v164_v21 = vmax.f32 %v411_v13, 0.0  ;;  %v475_v22 = vunpack.c.l.bf16 %v525_v9  ;;  %v476_v23 = vunpack.c.h.bf16 %v525_v9 }
  0x21   :  { %564 = vmatprep.subr.bf16.mxu1 %v236_v15  ;;  %v228_v25 = vpack.c.bf16 %v183_v17, %v182_v16  ;;  %v165_v26 = vmax.f32 %v412_v18, 0.0  ;;  %v379_v27 = vunpack.c.l.bf16 %v501_v14  ;;  %v380_v28 = vunpack.c.h.bf16 %v501_v14  ;;  %v350_v18 = vld [vmem:[%s724_s2] sm:$0xff] }
  0x22   :  { %543 = vmatpush3.bf16.msra.mxu0 %v212_v20  ;;  %v196_v29 = vmax.f32 %v475_v22, 0.0  ;;  %v197_v30 = vmax.f32 %v476_v23, 0.0  ;;  %v443_v31 = vunpack.c.l.bf16 %v517_v19  ;;  %v444_v32 = vunpack.c.h.bf16 %v517_v19  ;;  %v357_v19 = vld [vmem:[%s725_s3] sm:$0xff] }
  0x23   :  { %565 = vmatpush3.bf16.msra.mxu1 %v228_v25  ;;  %v219_v34 = vpack.c.bf16 %v165_v26, %v164_v21  ;;  %v148_v35 = vmax.f32 %v379_v27, 0.0  ;;  %v149_v36 = vmax.f32 %v380_v28, 0.0  ;;  %v407_v37 = vunpack.c.l.bf16 %v508_v24 }
  0x24   :  { %v235_v39 = vpack.c.bf16 %v197_v30, %v196_v29  ;;  %v180_v40 = vmax.f32 %v443_v31, 0.0  ;;  %v181_v41 = vmax.f32 %v444_v32, 0.0  ;;  %v408_v42 = vunpack.c.h.bf16 %v508_v24 }
  0x25   :  { %544 = vmatprep.subr.bf16.mxu0 %v219_v34  ;;  %v211_v44 = vpack.c.bf16 %v149_v36, %v148_v35  ;;  %v162_v45 = vmax.f32 %v407_v37, 0.0  ;;  %v471_v46 = vunpack.c.l.bf16 %v524_v33  ;;  %v472_v47 = vunpack.c.h.bf16 %v524_v33 }
  0x26   :  { %566 = vmatprep.subr.bf16.mxu1 %v235_v39  ;;  %v227_v48 = vpack.c.bf16 %v181_v41, %v180_v40  ;;  %v163_v49 = vmax.f32 %v408_v42, 0.0  ;;  %v375_v50 = vunpack.c.l.bf16 %v374_v38  ;;  %v376_v51 = vunpack.c.h.bf16 %v374_v38 }
  0x27   :  { %545 = vmatpush3.bf16.msra.mxu0 %v211_v44  ;;  %v194_v53 = vmax.f32 %v471_v46, 0.0  ;;  %v195_v54 = vmax.f32 %v472_v47, 0.0  ;;  %v439_v55 = vunpack.c.l.bf16 %v516_v43  ;;  %v440_v56 = vunpack.c.h.bf16 %v516_v43 }
  0x28   :  { %567 = vmatpush3.bf16.msra.mxu1 %v227_v48  ;;  %v218_v58 = vpack.c.bf16 %v163_v49, %v162_v45  ;;  %v146_v59 = vmax.f32 %v375_v50, 0.0  ;;  %v147_v60 = vmax.f32 %v376_v51, 0.0  ;;  %v370_v0 = vcombine.high %v242_v52, %v242_v52 }
  0x29   :  { %v234_v61 = vpack.c.bf16 %v195_v54, %v194_v53  ;;  %v178_v62 = vmax.f32 %v439_v55, 0.0  ;;  %v179_v63 = vmax.f32 %v440_v56, 0.0  ;;  %v372_v2 = vcombine.high %v243_v57, %v243_v57 }
  0x2a   :  { %546 = vmatprep.subr.bf16.mxu0 %v218_v58  ;;  %v210_v1 = vpack.c.bf16 %v147_v60, %v146_v59  ;;  %v369_v4 = vcombine.low %v242_v52, %v242_v52  ;;  %290 = vmatprep.mubr.bf16.mxu0 %v370_v0  ;;  %v371_v5 = vcombine.low %v243_v57, %v243_v57  ;;  %v585_v17 = vmov 0  }
  0x2b   :  { %568 = vmatprep.subr.bf16.mxu1 %v234_v61  ;;  %v226_v3 = vpack.c.bf16 %v179_v63, %v178_v62  ;;  %330 = vmatprep.mubr.bf16.mxu1 %v372_v2 }
  0x2c   :  { %547 = vmatpush3.bf16.msra.mxu0 %v210_v1  ;;  %577 = vset.pattern.permute.xlu1 %v585_v17 }
  0x2d   :  { %569 = vmatpush3.bf16.msra.mxu1 %v226_v3  ;;  %578 = vset.pattern.permute.xlu0 %v585_v17 }
  0x2e   :  { %353 = vperm.xlu1 %577, %v350_v18  }
  0x2f   :  { %291 = vmatmul.mubr.bf16.vlgmr.msra.gmra.mxu0 %v369_v4 }
  0x30   :  { %331 = vmatmul.mubr.bf16.vlgmr.msra.gmra.mxu1 %v371_v5 }
  0x32   :  { %360 = vperm.xlu1 %577, %v357_v19  }
  0xa9   :  { %v354_v27 = vpop.permute.xlu1 %353 }
  0xad   :  { %v361_v31 = vpop.permute.xlu1 %360 }
  0xef   :  { %v548_v6 = vpop.f32.mrf.mxu0 }
  0xf0   :  { %v570_v7 = vpop.f32.mrf.mxu1 }
  0xf1   :  { %v549_v8 = vpop.f32.mrf.mxu0 }
  0xf2   :  { %v550_v9 = vadd.f32 %v549_v8, %v548_v6  ;;  %v571_v10 = vpop.f32.mrf.mxu1 }
  0xf3   :  { %v572_v11 = vadd.f32 %v571_v10, %v570_v7  ;;  %v551_v12 = vpop.f32.mrf.mxu0 }
  0xf4   :  { %v573_v13 = vpop.f32.mrf.mxu1 }
  0xf5   :  { %v552_v14 = vpop.f32.mrf.mxu0  ;;  %v333_v15 = vadd.f32 %v572_v11, %v550_v9 }
  0xf6   :  { %v574_v16 = vpop.f32.mrf.mxu1 }
  0xf7   :  { %338 = vadd.xlane.f32.xlu0 %v333_v15 }
 0x180   :  { %v339_v20 = vpop.xlane.xlu0 %338 }
 0x181   :  { %v341_v21 = vmul.f32 0.0078125, %v339_v20 }
 0x183   :  { %v342_v22 = vsub.f32 %v333_v15, %v341_v21 }
 0x185   :  { %v343_v23 = vmul.f32 %v342_v22, %v342_v22 }
 0x187   :  { %344 = vadd.xlane.f32.xlu0 %v343_v23 }
 0x210   :  { %v345_v24 = vpop.xlane.xlu0 %344 }
 0x211   :  { %v346_v25 = vmul.f32 0.0078125, %v345_v24 }
 0x213   :  { %v347_v26 = vadd.f32 1e-05, %v346_v25 }
 0x215   :  { %583 = vrsqrt.f32 %v347_v26 }
 0x222   :  { %v584_v28 = vpop.eup %583 }
 0x223   :  { %v349_v29 = vmul.f32 %v584_v28, %v342_v22 }
 0x225   :  { %v356_v30 = vmul.f32 %v354_v27, %v349_v29 }
 0x227   :  { %v363_v32 = vadd.f32 %v361_v31, %v356_v30 }
 0x229   :  { %364 = vst [vmem:[%s726_s4] sm:$0xff] %v363_v32 }

// kernel: _lambda_.18
= control target key start
LH: loop header
LB: loop body
LE: loop exit
PB: predicated region body
PF: predicated region fallthrough
CT: control target
= control target key end

     0   :  { %vm495_vm0 = vcmask 1043456   ;;  %s812_s1 = inlined_call_operand.vmem [shape: bf16[256,512], index: 1, kind: input, shape index: {}]   ;;  %s813_s0 = inlined_call_operand.vmem [shape: bf16[4,256], index: 0, kind: input, shape index: {}]   ;;  %s814_s2 = inlined_call_operand.vmem [shape: f32[4,1], index: 2, kind: input, shape index: {}]   ;;  %s815_s3 = inlined_call_operand.vmem [shape: f32[4,1], index: 3, kind: input, shape index: {}]   ;;  %s816_s4 = inlined_call_operand.vmem [shape: f32[4,512], index: 4, kind: output, shape index: {}]  }
   0x1   :  { %v45_v0 = vld [vmem:[%s812_s1 + $0xe0] sm:$0xff]  ;;  %v47_v1 = vld [vmem:[%s812_s1 + $0xf0] sm:$0xff]  ;;  %v46_v2 = vld [vmem:[%s812_s1 + $0xe8] sm:$0xff] }
   0x2   :  { %v138_v3 = vunpack.c.h.bf16 %v45_v0  ;;  %v142_v4 = vunpack.c.h.bf16 %v47_v1  ;;  %v48_v5 = vld [vmem:[%s812_s1 + $0xf8] sm:$0xff]  ;;  %v140_v6 = vunpack.c.h.bf16 %v46_v2  ;;  %v137_v7 = vunpack.c.l.bf16 %v45_v0  ;;  %v41_v12 = vld [vmem:[%s812_s1 + $0xc0] sm:$0xff]  ;;  %v43_v13 = vld [vmem:[%s812_s1 + $0xd0] sm:$0xff] }
   0x3   :  { %v144_v8 = vunpack.c.h.bf16 %v48_v5  ;;  %v141_v9 = vunpack.c.l.bf16 %v47_v1  ;;  %v139_v10 = vunpack.c.l.bf16 %v46_v2  ;;  %v143_v11 = vunpack.c.l.bf16 %v48_v5  ;;  %v42_v14 = vld [vmem:[%s812_s1 + $0xc8] sm:$0xff]  ;;  %v44_v19 = vld [vmem:[%s812_s1 + $0xd8] sm:$0xff]  ;;  %v37_v32 = vld [vmem:[%s812_s1 + $0xa0] sm:$0xff] }
   0x4   :  { %v266_v15 = vmax.f32 %v138_v3, 0.0  ;;  %v270_v16 = vmax.f32 %v142_v4, 0.0  ;;  %v268_v17 = vmax.f32 %v140_v6, 0.0  ;;  %v265_v18 = vmax.f32 %v137_v7, 0.0  ;;  %v39_v33 = vld [vmem:[%s812_s1 + $0xb0] sm:$0xff]  ;;  %v38_v42 = vld [vmem:[%s812_s1 + $0xa8] sm:$0xff] }
   0x5   :  { %v272_v20 = vmax.f32 %v144_v8, 0.0  ;;  %v269_v21 = vmax.f32 %v141_v9, 0.0  ;;  %v267_v22 = vmax.f32 %v139_v10, 0.0  ;;  %v271_v23 = vmax.f32 %v143_v11, 0.0  ;;  %v40_v43 = vld [vmem:[%s812_s1 + $0xb8] sm:$0xff]  ;;  %v33_v56 = vld [vmem:[%s812_s1 + $0x80] sm:$0xff] }
   0x6   :  { %v366_v24 = vpack.c.bf16 %v270_v16, %v266_v15  ;;  %v130_v25 = vunpack.c.h.bf16 %v41_v12  ;;  %v134_v26 = vunpack.c.h.bf16 %v43_v13  ;;  %v132_v27 = vunpack.c.h.bf16 %v42_v14  ;;  %v35_v61 = vld [vmem:[%s812_s1 + $0x90] sm:$0xff]  ;;  %v34_v62 = vld [vmem:[%s812_s1 + $0x88] sm:$0xff]  ;;  %v36_v3 = vld [vmem:[%s812_s1 + $0x98] sm:$0xff] }
   0x7   :  { %v368_v28 = vpack.c.bf16 %v272_v20, %v268_v17  ;;  %v365_v29 = vpack.c.bf16 %v269_v21, %v265_v18  ;;  %v367_v30 = vpack.c.bf16 %v271_v23, %v267_v22  ;;  %v136_v31 = vunpack.c.h.bf16 %v44_v19  ;;  %v29_v16 = vld [vmem:[%s812_s1 + $0x60] sm:$0xff]  ;;  %v31_v21 = vld [vmem:[%s812_s1 + $0x70] sm:$0xff] }
   0x8   :  { %413 = vmatprep.subr.bf16.mxu0 %v366_v24  ;;  %v258_v34 = vmax.f32 %v130_v25, 0.0  ;;  %v262_v35 = vmax.f32 %v134_v26, 0.0  ;;  %v260_v36 = vmax.f32 %v132_v27, 0.0  ;;  %v129_v37 = vunpack.c.l.bf16 %v41_v12  ;;  %v30_v26 = vld [vmem:[%s812_s1 + $0x68] sm:$0xff]  ;;  %v32_v27 = vld [vmem:[%s812_s1 + $0x78] sm:$0xff] }
   0x9   :  { %454 = vmatprep.subr.bf16.mxu1 %v368_v28  ;;  %414 = vmatpush1.bf16.msra.mxu0 %v365_v29  ;;  %v264_v38 = vmax.f32 %v136_v31, 0.0  ;;  %v133_v39 = vunpack.c.l.bf16 %v43_v13  ;;  %v131_v40 = vunpack.c.l.bf16 %v42_v14  ;;  %v135_v41 = vunpack.c.l.bf16 %v44_v19 }
   0xa   :  { %455 = vmatpush1.bf16.msra.mxu1 %v367_v30  ;;  %v362_v44 = vpack.c.bf16 %v262_v35, %v258_v34  ;;  %v257_v45 = vmax.f32 %v129_v37, 0.0  ;;  %v122_v46 = vunpack.c.h.bf16 %v37_v32  ;;  %v126_v47 = vunpack.c.h.bf16 %v39_v33 }
   0xb   :  { %v364_v48 = vpack.c.bf16 %v264_v38, %v260_v36  ;;  %v261_v49 = vmax.f32 %v133_v39, 0.0  ;;  %v259_v50 = vmax.f32 %v131_v40, 0.0  ;;  %v263_v51 = vmax.f32 %v135_v41, 0.0  ;;  %v25_v40 = vld [vmem:[%s812_s1 + $0x40] sm:$0xff] }
   0xc   :  { %415 = vmatprep.subr.bf16.mxu0 %v362_v44  ;;  %v250_v52 = vmax.f32 %v122_v46, 0.0  ;;  %v254_v53 = vmax.f32 %v126_v47, 0.0  ;;  %v124_v54 = vunpack.c.h.bf16 %v38_v42  ;;  %v128_v55 = vunpack.c.h.bf16 %v40_v43 }
   0xd   :  { %456 = vmatprep.subr.bf16.mxu1 %v364_v48  ;;  %v361_v57 = vpack.c.bf16 %v261_v49, %v257_v45  ;;  %v363_v58 = vpack.c.bf16 %v263_v51, %v259_v50  ;;  %v121_v59 = vunpack.c.l.bf16 %v37_v32  ;;  %v125_v60 = vunpack.c.l.bf16 %v39_v33  ;;  %v27_v45 = vld [vmem:[%s812_s1 + $0x50] sm:$0xff]  ;;  %v26_v50 = vld [vmem:[%s812_s1 + $0x48] sm:$0xff]  ;;  %v28_v51 = vld [vmem:[%s812_s1 + $0x58] sm:$0xff] }
   0xe   :  { %v358_v63 = vpack.c.bf16 %v254_v53, %v250_v52  ;;  %v252_v0 = vmax.f32 %v124_v54, 0.0  ;;  %v256_v1 = vmax.f32 %v128_v55, 0.0  ;;  %v123_v2 = vunpack.c.l.bf16 %v38_v42 }
   0xf   :  { %416 = vmatpush1.bf16.msra.mxu0 %v361_v57  ;;  %457 = vmatpush1.bf16.msra.mxu1 %v363_v58  ;;  %v249_v4 = vmax.f32 %v121_v59, 0.0  ;;  %v253_v5 = vmax.f32 %v125_v60, 0.0  ;;  %v127_v6 = vunpack.c.l.bf16 %v40_v43  ;;  %v114_v7 = vunpack.c.h.bf16 %v33_v56 }
  0x10   :  { %417 = vmatprep.subr.bf16.mxu0 %v358_v63  ;;  %v360_v8 = vpack.c.bf16 %v256_v1, %v252_v0  ;;  %v251_v9 = vmax.f32 %v123_v2, 0.0  ;;  %v118_v10 = vunpack.c.h.bf16 %v35_v61  ;;  %v116_v11 = vunpack.c.h.bf16 %v34_v62  ;;  %v21_v0 = vld [vmem:[%s812_s1 + $0x20] sm:$0xff] }
  0x11   :  { %v357_v12 = vpack.c.bf16 %v253_v5, %v249_v4  ;;  %v255_v13 = vmax.f32 %v127_v6, 0.0  ;;  %v242_v14 = vmax.f32 %v114_v7, 0.0  ;;  %v120_v15 = vunpack.c.h.bf16 %v36_v3  ;;  %v23_v5 = vld [vmem:[%s812_s1 + $0x30] sm:$0xff] }
  0x12   :  { %458 = vmatprep.subr.bf16.mxu1 %v360_v8  ;;  %v246_v17 = vmax.f32 %v118_v10, 0.0  ;;  %v244_v18 = vmax.f32 %v116_v11, 0.0  ;;  %v113_v19 = vunpack.c.l.bf16 %v33_v56  ;;  %v117_v20 = vunpack.c.l.bf16 %v35_v61  ;;  %v22_v10 = vld [vmem:[%s812_s1 + $0x28] sm:$0xff]  ;;  %v24_v11 = vld [vmem:[%s812_s1 + $0x38] sm:$0xff] }
  0x13   :  { %418 = vmatpush1.bf16.msra.mxu0 %v357_v12  ;;  %v359_v22 = vpack.c.bf16 %v255_v13, %v251_v9  ;;  %v248_v23 = vmax.f32 %v120_v15, 0.0  ;;  %v115_v24 = vunpack.c.l.bf16 %v34_v62  ;;  %v119_v25 = vunpack.c.l.bf16 %v36_v3 }
  0x14   :  { %v354_v28 = vpack.c.bf16 %v246_v17, %v242_v14  ;;  %v241_v29 = vmax.f32 %v113_v19, 0.0  ;;  %v245_v30 = vmax.f32 %v117_v20, 0.0  ;;  %v106_v31 = vunpack.c.h.bf16 %v29_v16 }
  0x15   :  { %459 = vmatpush1.bf16.msra.mxu1 %v359_v22  ;;  %v356_v32 = vpack.c.bf16 %v248_v23, %v244_v18  ;;  %v243_v33 = vmax.f32 %v115_v24, 0.0  ;;  %v247_v34 = vmax.f32 %v119_v25, 0.0  ;;  %v110_v35 = vunpack.c.h.bf16 %v31_v21  ;;  %v17_v24 = vld [vmem:[%s812_s1] sm:$0xff] }
  0x16   :  { %419 = vmatprep.subr.bf16.mxu0 %v354_v28  ;;  %v353_v36 = vpack.c.bf16 %v245_v30, %v241_v29  ;;  %v234_v37 = vmax.f32 %v106_v31, 0.0  ;;  %v108_v38 = vunpack.c.h.bf16 %v30_v26  ;;  %v112_v39 = vunpack.c.h.bf16 %v32_v27  ;;  %v19_v29 = vld [vmem:[%s812_s1 + $0x10] sm:$0xff] }
  0x17   :  { %460 = vmatprep.subr.bf16.mxu1 %v356_v32  ;;  %v355_v41 = vpack.c.bf16 %v247_v34, %v243_v33  ;;  %v238_v42 = vmax.f32 %v110_v35, 0.0  ;;  %v105_v43 = vunpack.c.l.bf16 %v29_v16  ;;  %v109_v44 = vunpack.c.l.bf16 %v31_v21  ;;  %v18_v34 = vld [vmem:[%s812_s1 + $0x8] sm:$0xff]  ;;  %v20_v35 = vld [vmem:[%s812_s1 + $0x18] sm:$0xff] }
  0x18   :  { %420 = vmatpush1.bf16.msra.mxu0 %v353_v36  ;;  %v236_v46 = vmax.f32 %v108_v38, 0.0  ;;  %v240_v47 = vmax.f32 %v112_v39, 0.0  ;;  %v107_v48 = vunpack.c.l.bf16 %v30_v26  ;;  %v111_v49 = vunpack.c.l.bf16 %v32_v27 }
  0x19   :  { %461 = vmatpush1.bf16.msra.mxu1 %v355_v41  ;;  %v350_v52 = vpack.c.bf16 %v238_v42, %v234_v37  ;;  %v233_v53 = vmax.f32 %v105_v43, 0.0  ;;  %v237_v54 = vmax.f32 %v109_v44, 0.0  ;;  %v98_v55 = vunpack.c.h.bf16 %v25_v40 }
  0x1a   :  { %v352_v56 = vpack.c.bf16 %v240_v47, %v236_v46  ;;  %v235_v57 = vmax.f32 %v107_v48, 0.0  ;;  %v239_v58 = vmax.f32 %v111_v49, 0.0  ;;  %v102_v59 = vunpack.c.h.bf16 %v27_v45  ;;  %v77_v48 = vld [vmem:[%s812_s1 + $0x1e0] sm:$0xff] }
  0x1b   :  { %421 = vmatprep.subr.bf16.mxu0 %v350_v52  ;;  %v349_v60 = vpack.c.bf16 %v237_v54, %v233_v53  ;;  %v226_v61 = vmax.f32 %v98_v55, 0.0  ;;  %v100_v62 = vunpack.c.h.bf16 %v26_v50  ;;  %v104_v63 = vunpack.c.h.bf16 %v28_v51  ;;  %v79_v53 = vld [vmem:[%s812_s1 + $0x1f0] sm:$0xff] }
  0x1c   :  { %462 = vmatprep.subr.bf16.mxu1 %v352_v56  ;;  %v351_v1 = vpack.c.bf16 %v239_v58, %v235_v57  ;;  %v230_v2 = vmax.f32 %v102_v59, 0.0  ;;  %v97_v3 = vunpack.c.l.bf16 %v25_v40  ;;  %v101_v4 = vunpack.c.l.bf16 %v27_v45  ;;  %v78_v58 = vld [vmem:[%s812_s1 + $0x1e8] sm:$0xff]  ;;  %v80_v59 = vld [vmem:[%s812_s1 + $0x1f8] sm:$0xff] }
  0x1d   :  { %422 = vmatpush1.bf16.msra.mxu0 %v349_v60  ;;  %v228_v6 = vmax.f32 %v100_v62, 0.0  ;;  %v232_v7 = vmax.f32 %v104_v63, 0.0  ;;  %v99_v8 = vunpack.c.l.bf16 %v26_v50  ;;  %v103_v9 = vunpack.c.l.bf16 %v28_v51 }
  0x1e   :  { %463 = vmatpush1.bf16.msra.mxu1 %v351_v1  ;;  %v346_v12 = vpack.c.bf16 %v230_v2, %v226_v61  ;;  %v225_v13 = vmax.f32 %v97_v3, 0.0  ;;  %v229_v14 = vmax.f32 %v101_v4, 0.0  ;;  %v90_v15 = vunpack.c.h.bf16 %v21_v0 }
  0x1f   :  { %v348_v16 = vpack.c.bf16 %v232_v7, %v228_v6  ;;  %v227_v17 = vmax.f32 %v99_v8, 0.0  ;;  %v231_v18 = vmax.f32 %v103_v9, 0.0  ;;  %v94_v19 = vunpack.c.h.bf16 %v23_v5  ;;  %v73_v8 = vld [vmem:[%s812_s1 + $0x1c0] sm:$0xff] }
  0x20   :  { %423 = vmatprep.subr.bf16.mxu0 %v346_v12  ;;  %v345_v20 = vpack.c.bf16 %v229_v14, %v225_v13  ;;  %v218_v21 = vmax.f32 %v90_v15, 0.0  ;;  %v92_v22 = vunpack.c.h.bf16 %v22_v10  ;;  %v96_v23 = vunpack.c.h.bf16 %v24_v11  ;;  %v75_v13 = vld [vmem:[%s812_s1 + $0x1d0] sm:$0xff] }
  0x21   :  { %464 = vmatprep.subr.bf16.mxu1 %v348_v16  ;;  %v347_v25 = vpack.c.bf16 %v231_v18, %v227_v17  ;;  %v222_v26 = vmax.f32 %v94_v19, 0.0  ;;  %v89_v27 = vunpack.c.l.bf16 %v21_v0  ;;  %v93_v28 = vunpack.c.l.bf16 %v23_v5  ;;  %v74_v18 = vld [vmem:[%s812_s1 + $0x1c8] sm:$0xff]  ;;  %v76_v19 = vld [vmem:[%s812_s1 + $0x1d8] sm:$0xff] }
  0x22   :  { %424 = vmatpush1.bf16.msra.mxu0 %v345_v20  ;;  %v220_v30 = vmax.f32 %v92_v22, 0.0  ;;  %v224_v31 = vmax.f32 %v96_v23, 0.0  ;;  %v91_v32 = vunpack.c.l.bf16 %v22_v10  ;;  %v95_v33 = vunpack.c.l.bf16 %v24_v11 }
  0x23   :  { %465 = vmatpush1.bf16.msra.mxu1 %v347_v25  ;;  %v342_v36 = vpack.c.bf16 %v222_v26, %v218_v21  ;;  %v217_v37 = vmax.f32 %v89_v27, 0.0  ;;  %v221_v38 = vmax.f32 %v93_v28, 0.0  ;;  %v82_v39 = vunpack.c.h.bf16 %v17_v24 }
  0x24   :  { %v344_v40 = vpack.c.bf16 %v224_v31, %v220_v30  ;;  %v219_v41 = vmax.f32 %v91_v32, 0.0  ;;  %v223_v42 = vmax.f32 %v95_v33, 0.0  ;;  %v86_v43 = vunpack.c.h.bf16 %v19_v29  ;;  %v69_v32 = vld [vmem:[%s812_s1 + $0x1a0] sm:$0xff] }
  0x25   :  { %425 = vmatprep.subr.bf16.mxu0 %v342_v36  ;;  %v341_v44 = vpack.c.bf16 %v221_v38, %v217_v37  ;;  %v210_v45 = vmax.f32 %v82_v39, 0.0  ;;  %v84_v46 = vunpack.c.h.bf16 %v18_v34  ;;  %v88_v47 = vunpack.c.h.bf16 %v20_v35  ;;  %v71_v37 = vld [vmem:[%s812_s1 + $0x1b0] sm:$0xff] }
  0x26   :  { %466 = vmatprep.subr.bf16.mxu1 %v344_v40  ;;  %v343_v49 = vpack.c.bf16 %v223_v42, %v219_v41  ;;  %v214_v50 = vmax.f32 %v86_v43, 0.0  ;;  %v81_v51 = vunpack.c.l.bf16 %v17_v24  ;;  %v85_v52 = vunpack.c.l.bf16 %v19_v29  ;;  %v70_v42 = vld [vmem:[%s812_s1 + $0x1a8] sm:$0xff]  ;;  %v72_v43 = vld [vmem:[%s812_s1 + $0x1b8] sm:$0xff] }
  0x27   :  { %426 = vmatpush1.bf16.msra.mxu0 %v341_v44  ;;  %v212_v54 = vmax.f32 %v84_v46, 0.0  ;;  %v216_v55 = vmax.f32 %v88_v47, 0.0  ;;  %v83_v56 = vunpack.c.l.bf16 %v18_v34  ;;  %v87_v57 = vunpack.c.l.bf16 %v20_v35 }
  0x28   :  { %467 = vmatpush1.bf16.msra.mxu1 %v343_v49  ;;  %v338_v60 = vpack.c.bf16 %v214_v50, %v210_v45  ;;  %v209_v61 = vmax.f32 %v81_v51, 0.0  ;;  %v213_v62 = vmax.f32 %v85_v52, 0.0  ;;  %v202_v63 = vunpack.c.h.bf16 %v77_v48 }
  0x29   :  { %v340_v0 = vpack.c.bf16 %v216_v55, %v212_v54  ;;  %v211_v1 = vmax.f32 %v83_v56, 0.0  ;;  %v215_v2 = vmax.f32 %v87_v57, 0.0  ;;  %v206_v3 = vunpack.c.h.bf16 %v79_v53  ;;  %v65_v56 = vld [vmem:[%s812_s1 + $0x180] sm:$0xff] }
  0x2a   :  { %427 = vmatprep.subr.bf16.mxu0 %v338_v60  ;;  %v337_v4 = vpack.c.bf16 %v213_v62, %v209_v61  ;;  %v330_v5 = vmax.f32 %v202_v63, 0.0  ;;  %v204_v6 = vunpack.c.h.bf16 %v78_v58  ;;  %v208_v7 = vunpack.c.h.bf16 %v80_v59  ;;  %v67_v61 = vld [vmem:[%s812_s1 + $0x190] sm:$0xff] }
  0x2b   :  { %468 = vmatprep.subr.bf16.mxu1 %v340_v0  ;;  %v339_v9 = vpack.c.bf16 %v215_v2, %v211_v1  ;;  %v334_v10 = vmax.f32 %v206_v3, 0.0  ;;  %v201_v11 = vunpack.c.l.bf16 %v77_v48  ;;  %v205_v12 = vunpack.c.l.bf16 %v79_v53  ;;  %v66_v2 = vld [vmem:[%s812_s1 + $0x188] sm:$0xff]  ;;  %v68_v3 = vld [vmem:[%s812_s1 + $0x198] sm:$0xff] }
  0x2c   :  { %428 = vmatpush1.bf16.msra.mxu0 %v337_v4  ;;  %v332_v14 = vmax.f32 %v204_v6, 0.0  ;;  %v336_v15 = vmax.f32 %v208_v7, 0.0  ;;  %v203_v16 = vunpack.c.l.bf16 %v78_v58  ;;  %v207_v17 = vunpack.c.l.bf16 %v80_v59 }
  0x2d   :  { %469 = vmatpush1.bf16.msra.mxu1 %v339_v9  ;;  %v398_v20 = vpack.c.bf16 %v334_v10, %v330_v5  ;;  %v329_v21 = vmax.f32 %v201_v11, 0.0  ;;  %v333_v22 = vmax.f32 %v205_v12, 0.0  ;;  %v194_v23 = vunpack.c.h.bf16 %v73_v8 }
  0x2e   :  { %v400_v24 = vpack.c.bf16 %v336_v15, %v332_v14  ;;  %v331_v25 = vmax.f32 %v203_v16, 0.0  ;;  %v335_v26 = vmax.f32 %v207_v17, 0.0  ;;  %v198_v27 = vunpack.c.h.bf16 %v75_v13  ;;  %v61_v16 = vld [vmem:[%s812_s1 + $0x160] sm:$0xff] }
  0x2f   :  { %429 = vmatprep.subr.bf16.mxu0 %v398_v20  ;;  %v397_v28 = vpack.c.bf16 %v333_v22, %v329_v21  ;;  %v322_v29 = vmax.f32 %v194_v23, 0.0  ;;  %v196_v30 = vunpack.c.h.bf16 %v74_v18  ;;  %v200_v31 = vunpack.c.h.bf16 %v76_v19  ;;  %v63_v21 = vld [vmem:[%s812_s1 + $0x170] sm:$0xff] }
  0x30   :  { %470 = vmatprep.subr.bf16.mxu1 %v400_v24  ;;  %v399_v33 = vpack.c.bf16 %v335_v26, %v331_v25  ;;  %v326_v34 = vmax.f32 %v198_v27, 0.0  ;;  %v193_v35 = vunpack.c.l.bf16 %v73_v8  ;;  %v197_v36 = vunpack.c.l.bf16 %v75_v13  ;;  %v62_v26 = vld [vmem:[%s812_s1 + $0x168] sm:$0xff]  ;;  %v64_v27 = vld [vmem:[%s812_s1 + $0x178] sm:$0xff] }
  0x31   :  { %430 = vmatpush2.bf16.msra.mxu0 %v397_v28  ;;  %v324_v38 = vmax.f32 %v196_v30, 0.0  ;;  %v328_v39 = vmax.f32 %v200_v31, 0.0  ;;  %v195_v40 = vunpack.c.l.bf16 %v74_v18  ;;  %v199_v41 = vunpack.c.l.bf16 %v76_v19 }
  0x32   :  { %471 = vmatpush2.bf16.msra.mxu1 %v399_v33  ;;  %v394_v44 = vpack.c.bf16 %v326_v34, %v322_v29  ;;  %v321_v45 = vmax.f32 %v193_v35, 0.0  ;;  %v325_v46 = vmax.f32 %v197_v36, 0.0  ;;  %v186_v47 = vunpack.c.h.bf16 %v69_v32 }
  0x33   :  { %v396_v48 = vpack.c.bf16 %v328_v39, %v324_v38  ;;  %v323_v49 = vmax.f32 %v195_v40, 0.0  ;;  %v327_v50 = vmax.f32 %v199_v41, 0.0  ;;  %v190_v51 = vunpack.c.h.bf16 %v71_v37  ;;  %v57_v40 = vld [vmem:[%s812_s1 + $0x140] sm:$0xff] }
  0x34   :  { %431 = vmatprep.subr.bf16.mxu0 %v394_v44  ;;  %v393_v52 = vpack.c.bf16 %v325_v46, %v321_v45  ;;  %v314_v53 = vmax.f32 %v186_v47, 0.0  ;;  %v188_v54 = vunpack.c.h.bf16 %v70_v42  ;;  %v192_v55 = vunpack.c.h.bf16 %v72_v43  ;;  %v59_v45 = vld [vmem:[%s812_s1 + $0x150] sm:$0xff] }
  0x35   :  { %472 = vmatprep.subr.bf16.mxu1 %v396_v48  ;;  %v395_v57 = vpack.c.bf16 %v327_v50, %v323_v49  ;;  %v318_v58 = vmax.f32 %v190_v51, 0.0  ;;  %v185_v59 = vunpack.c.l.bf16 %v69_v32  ;;  %v189_v60 = vunpack.c.l.bf16 %v71_v37  ;;  %v58_v50 = vld [vmem:[%s812_s1 + $0x148] sm:$0xff]  ;;  %v60_v51 = vld [vmem:[%s812_s1 + $0x158] sm:$0xff] }
  0x36   :  { %432 = vmatpush2.bf16.msra.mxu0 %v393_v52  ;;  %v316_v62 = vmax.f32 %v188_v54, 0.0  ;;  %v320_v63 = vmax.f32 %v192_v55, 0.0  ;;  %v187_v0 = vunpack.c.l.bf16 %v70_v42  ;;  %v191_v1 = vunpack.c.l.bf16 %v72_v43 }
  0x37   :  { %473 = vmatpush2.bf16.msra.mxu1 %v395_v57  ;;  %v390_v4 = vpack.c.bf16 %v318_v58, %v314_v53  ;;  %v313_v5 = vmax.f32 %v185_v59, 0.0  ;;  %v317_v6 = vmax.f32 %v189_v60, 0.0  ;;  %v178_v7 = vunpack.c.h.bf16 %v65_v56 }
  0x38   :  { %v392_v8 = vpack.c.bf16 %v320_v63, %v316_v62  ;;  %v315_v9 = vmax.f32 %v187_v0, 0.0  ;;  %v319_v10 = vmax.f32 %v191_v1, 0.0  ;;  %v182_v11 = vunpack.c.h.bf16 %v67_v61  ;;  %v53_v0 = vld [vmem:[%s812_s1 + $0x120] sm:$0xff] }
  0x39   :  { %433 = vmatprep.subr.bf16.mxu0 %v390_v4  ;;  %v389_v12 = vpack.c.bf16 %v317_v6, %v313_v5  ;;  %v306_v13 = vmax.f32 %v178_v7, 0.0  ;;  %v180_v14 = vunpack.c.h.bf16 %v66_v2  ;;  %v184_v15 = vunpack.c.h.bf16 %v68_v3  ;;  %v55_v5 = vld [vmem:[%s812_s1 + $0x130] sm:$0xff] }
  0x3a   :  { %474 = vmatprep.subr.bf16.mxu1 %v392_v8  ;;  %v391_v17 = vpack.c.bf16 %v319_v10, %v315_v9  ;;  %v310_v18 = vmax.f32 %v182_v11, 0.0  ;;  %v177_v19 = vunpack.c.l.bf16 %v65_v56  ;;  %v181_v20 = vunpack.c.l.bf16 %v67_v61  ;;  %v54_v10 = vld [vmem:[%s812_s1 + $0x128] sm:$0xff]  ;;  %v56_v11 = vld [vmem:[%s812_s1 + $0x138] sm:$0xff] }
  0x3b   :  { %434 = vmatpush2.bf16.msra.mxu0 %v389_v12  ;;  %v308_v22 = vmax.f32 %v180_v14, 0.0  ;;  %v312_v23 = vmax.f32 %v184_v15, 0.0  ;;  %v179_v24 = vunpack.c.l.bf16 %v66_v2  ;;  %v183_v25 = vunpack.c.l.bf16 %v68_v3 }
  0x3c   :  { %475 = vmatpush2.bf16.msra.mxu1 %v391_v17  ;;  %v386_v28 = vpack.c.bf16 %v310_v18, %v306_v13  ;;  %v305_v29 = vmax.f32 %v177_v19, 0.0  ;;  %v309_v30 = vmax.f32 %v181_v20, 0.0  ;;  %v170_v31 = vunpack.c.h.bf16 %v61_v16 }
  0x3d   :  { %v388_v32 = vpack.c.bf16 %v312_v23, %v308_v22  ;;  %v307_v33 = vmax.f32 %v179_v24, 0.0  ;;  %v311_v34 = vmax.f32 %v183_v25, 0.0  ;;  %v174_v35 = vunpack.c.h.bf16 %v63_v21  ;;  %v49_v24 = vld [vmem:[%s812_s1 + $0x100] sm:$0xff] }
  0x3e   :  { %435 = vmatprep.subr.bf16.mxu0 %v386_v28  ;;  %v385_v36 = vpack.c.bf16 %v309_v30, %v305_v29  ;;  %v298_v37 = vmax.f32 %v170_v31, 0.0  ;;  %v172_v38 = vunpack.c.h.bf16 %v62_v26  ;;  %v176_v39 = vunpack.c.h.bf16 %v64_v27  ;;  %v51_v29 = vld [vmem:[%s812_s1 + $0x110] sm:$0xff] }
  0x3f   :  { %476 = vmatprep.subr.bf16.mxu1 %v388_v32  ;;  %v387_v41 = vpack.c.bf16 %v311_v34, %v307_v33  ;;  %v302_v42 = vmax.f32 %v174_v35, 0.0  ;;  %v169_v43 = vunpack.c.l.bf16 %v61_v16  ;;  %v173_v44 = vunpack.c.l.bf16 %v63_v21  ;;  %v50_v34 = vld [vmem:[%s812_s1 + $0x108] sm:$0xff]  ;;  %v52_v35 = vld [vmem:[%s812_s1 + $0x118] sm:$0xff] }
  0x40   :  { %436 = vmatpush2.bf16.msra.mxu0 %v385_v36  ;;  %v300_v46 = vmax.f32 %v172_v38, 0.0  ;;  %v304_v47 = vmax.f32 %v176_v39, 0.0  ;;  %v171_v48 = vunpack.c.l.bf16 %v62_v26  ;;  %v175_v49 = vunpack.c.l.bf16 %v64_v27 }
  0x41   :  { %477 = vmatpush2.bf16.msra.mxu1 %v387_v41  ;;  %v382_v52 = vpack.c.bf16 %v302_v42, %v298_v37  ;;  %v297_v53 = vmax.f32 %v169_v43, 0.0  ;;  %v301_v54 = vmax.f32 %v173_v44, 0.0  ;;  %v162_v55 = vunpack.c.h.bf16 %v57_v40 }
  0x42   :  { %v384_v56 = vpack.c.bf16 %v304_v47, %v300_v46  ;;  %v299_v57 = vmax.f32 %v171_v48, 0.0  ;;  %v303_v58 = vmax.f32 %v175_v49, 0.0  ;;  %v166_v59 = vunpack.c.h.bf16 %v59_v45  ;;  %v565_v48 = vld.sshfl [vmem:[%s813_s0] sm:$0x33 pattern:$0x76325410] }
  0x43   :  { %437 = vmatprep.subr.bf16.mxu0 %v382_v52  ;;  %v381_v60 = vpack.c.bf16 %v301_v54, %v297_v53  ;;  %v290_v61 = vmax.f32 %v162_v55, 0.0  ;;  %v164_v62 = vunpack.c.h.bf16 %v58_v50  ;;  %v168_v63 = vunpack.c.h.bf16 %v60_v51 }
  0x44   :  { %478 = vmatprep.subr.bf16.mxu1 %v384_v56  ;;  %v383_v1 = vpack.c.bf16 %v303_v58, %v299_v57  ;;  %v294_v2 = vmax.f32 %v166_v59, 0.0  ;;  %v161_v3 = vunpack.c.l.bf16 %v57_v40  ;;  %v165_v4 = vunpack.c.l.bf16 %v59_v45 }
  0x45   :  { %438 = vmatpush2.bf16.msra.mxu0 %v381_v60  ;;  %v292_v6 = vmax.f32 %v164_v62, 0.0  ;;  %v296_v7 = vmax.f32 %v168_v63, 0.0  ;;  %v163_v8 = vunpack.c.l.bf16 %v58_v50  ;;  %v167_v9 = vunpack.c.l.bf16 %v60_v51 }
  0x46   :  { %479 = vmatpush2.bf16.msra.mxu1 %v383_v1  ;;  %v378_v12 = vpack.c.bf16 %v294_v2, %v290_v61  ;;  %v289_v13 = vmax.f32 %v161_v3, 0.0  ;;  %v293_v14 = vmax.f32 %v165_v4, 0.0  ;;  %v154_v15 = vunpack.c.h.bf16 %v53_v0 }
  0x47   :  { %v380_v16 = vpack.c.bf16 %v296_v7, %v292_v6  ;;  %v291_v17 = vmax.f32 %v163_v8, 0.0  ;;  %v295_v18 = vmax.f32 %v167_v9, 0.0  ;;  %v158_v19 = vunpack.c.h.bf16 %v55_v5 }
  0x48   :  { %439 = vmatprep.subr.bf16.mxu0 %v378_v12  ;;  %v377_v20 = vpack.c.bf16 %v293_v14, %v289_v13  ;;  %v282_v21 = vmax.f32 %v154_v15, 0.0  ;;  %v156_v22 = vunpack.c.h.bf16 %v54_v10  ;;  %v160_v23 = vunpack.c.h.bf16 %v56_v11 }
  0x49   :  { %480 = vmatprep.subr.bf16.mxu1 %v380_v16  ;;  %v379_v25 = vpack.c.bf16 %v295_v18, %v291_v17  ;;  %v286_v26 = vmax.f32 %v158_v19, 0.0  ;;  %v153_v27 = vunpack.c.l.bf16 %v53_v0  ;;  %v157_v28 = vunpack.c.l.bf16 %v55_v5  ;;  %v531_v18 = vld [vmem:[%s814_s2] sm:$0xf] }
  0x4a   :  { %440 = vmatpush2.bf16.msra.mxu0 %v377_v20  ;;  %v284_v30 = vmax.f32 %v156_v22, 0.0  ;;  %v288_v31 = vmax.f32 %v160_v23, 0.0  ;;  %v155_v32 = vunpack.c.l.bf16 %v54_v10  ;;  %v159_v33 = vunpack.c.l.bf16 %v56_v11  ;;  %v541_v19 = vld [vmem:[%s815_s3] sm:$0xf] }
  0x4b   :  { %481 = vmatpush2.bf16.msra.mxu1 %v379_v25  ;;  %v374_v36 = vpack.c.bf16 %v286_v26, %v282_v21  ;;  %v281_v37 = vmax.f32 %v153_v27, 0.0  ;;  %v285_v38 = vmax.f32 %v157_v28, 0.0  ;;  %v146_v39 = vunpack.c.h.bf16 %v49_v24 }
  0x4c   :  { %v376_v40 = vpack.c.bf16 %v288_v31, %v284_v30  ;;  %v283_v41 = vmax.f32 %v155_v32, 0.0  ;;  %v287_v42 = vmax.f32 %v159_v33, 0.0  ;;  %v150_v43 = vunpack.c.h.bf16 %v51_v29 }
  0x4d   :  { %441 = vmatprep.subr.bf16.mxu0 %v374_v36  ;;  %v373_v44 = vpack.c.bf16 %v285_v38, %v281_v37  ;;  %v274_v45 = vmax.f32 %v146_v39, 0.0  ;;  %v148_v46 = vunpack.c.h.bf16 %v50_v34  ;;  %v152_v47 = vunpack.c.h.bf16 %v52_v35 }
  0x4e   :  { %482 = vmatprep.subr.bf16.mxu1 %v376_v40  ;;  %v375_v49 = vpack.c.bf16 %v287_v42, %v283_v41  ;;  %v278_v50 = vmax.f32 %v150_v43, 0.0  ;;  %v145_v51 = vunpack.c.l.bf16 %v49_v24  ;;  %v149_v52 = vunpack.c.l.bf16 %v51_v29 }
  0x4f   :  { %442 = vmatpush2.bf16.msra.mxu0 %v373_v44  ;;  %v276_v53 = vmax.f32 %v148_v46, 0.0  ;;  %v280_v54 = vmax.f32 %v152_v47, 0.0  ;;  %v147_v55 = vunpack.c.l.bf16 %v50_v34  ;;  %v151_v56 = vunpack.c.l.bf16 %v52_v35 }
  0x50   :  { %483 = vmatpush2.bf16.msra.mxu1 %v375_v49  ;;  %v370_v57 = vpack.c.bf16 %v278_v50, %v274_v45  ;;  %v273_v58 = vmax.f32 %v145_v51, 0.0  ;;  %v277_v59 = vmax.f32 %v149_v52, 0.0  ;;  %v410_v60 = vcombine.high %v565_v48, %v565_v48 }
  0x51   :  { %v372_v61 = vpack.c.bf16 %v280_v54, %v276_v53  ;;  %v275_v62 = vmax.f32 %v147_v55, 0.0  ;;  %v279_v63 = vmax.f32 %v151_v56, 0.0  ;;  %v571_v17 = vmov 0  }
  0x52   :  { %443 = vmatprep.subr.bf16.mxu0 %v370_v57  ;;  %v369_v0 = vpack.c.bf16 %v277_v59, %v273_v58  ;;  %445 = vmatprep.mubr.bf16.mxu0 %v410_v60 }
  0x53   :  { %484 = vmatprep.subr.bf16.mxu1 %v372_v61  ;;  %v371_v1 = vpack.c.bf16 %v279_v63, %v275_v62  ;;  %486 = vmatprep.mubr.bf16.mxu1 %v410_v60 }
  0x54   :  { %444 = vmatpush2.bf16.msra.mxu0 %v369_v0  ;;  %567 = vset.pattern.permute.xlu1 %v571_v17 }
  0x55   :  { %485 = vmatpush2.bf16.msra.mxu1 %v371_v1  ;;  %568 = vset.pattern.permute.xlu0 %v571_v17 }
  0x56   :  { %534 = vperm.xlu1 %567, %v531_v18  }
  0x57   :  { %446 = vmatmul.mubr.bf16.vlgmr.msra.gmra.mxu0 %v565_v48 }
  0x58   :  { %487 = vmatmul.mubr.bf16.vlgmr.msra.gmra.mxu1 %v565_v48 }
  0x5a   :  { %544 = vperm.xlu1 %567, %v541_v19  }
  0xd1   :  { %v535_v40 = vpop.permute.xlu1 %534 }
  0xd5   :  { %v545_v50 = vpop.permute.xlu1 %544 }
 0x117   :  { %v447_v2 = vpop.f32.mrf.mxu0 }
 0x118   :  { %v488_v3 = vpop.f32.mrf.mxu1  ;;  %v496_v5 = vsel %vm495_vm0, %v447_v2, 0.0 }
 0x119   :  { %v449_v4 = vpop.f32.mrf.mxu0  ;;  %v499_v6 = vsel %vm495_vm0, %v488_v3, 0.0 }
 0x11a   :  { %v497_v7 = vsel %vm495_vm0, %v449_v4, 0.0  ;;  %v490_v8 = vpop.f32.mrf.mxu1 }
 0x11b   :  { %v498_v9 = vadd.f32 %v497_v7, %v496_v5  ;;  %v451_v10 = vpop.f32.mrf.mxu0  ;;  %v501_v15 = vsel %vm495_vm0, %v490_v8, 0.0 }
 0x11c   :  { %v492_v11 = vpop.f32.mrf.mxu1 }
 0x11d   :  { %v452_v12 = vpop.f32.mrf.mxu0  ;;  %v500_v13 = vadd.f32 %v499_v6, %v498_v9 }
 0x11e   :  { %v493_v14 = vpop.f32.mrf.mxu1 }
 0x11f   :  { %v502_v16 = vadd.f32 %v501_v15, %v500_v13 }
 0x121   :  { %503 = vadd.xlane.f32.xlu0 %v502_v16 }
 0x1aa   :  { %v504_v20 = vpop.xlane.xlu0 %503 }
 0x1ab   :  { %v506_v21 = vmul.f32 0.001953125, %v504_v20 }
 0x1ad   :  { %v507_v22 = vsub.f32 %v447_v2, %v506_v21  ;;  %v508_v23 = vsub.f32 %v449_v4, %v506_v21  ;;  %v509_v24 = vsub.f32 %v488_v3, %v506_v21  ;;  %v510_v25 = vsub.f32 %v490_v8, %v506_v21 }
 0x1af   :  { %v511_v26 = vmul.f32 %v507_v22, %v507_v22  ;;  %v512_v27 = vmul.f32 %v508_v23, %v508_v23  ;;  %v513_v28 = vmul.f32 %v509_v24, %v509_v24  ;;  %v514_v29 = vmul.f32 %v510_v25, %v510_v25 }
 0x1b1   :  { %v515_v30 = vsel %vm495_vm0, %v511_v26, 0.0  ;;  %v516_v31 = vsel %vm495_vm0, %v512_v27, 0.0  ;;  %v518_v33 = vsel %vm495_vm0, %v513_v28, 0.0  ;;  %v520_v35 = vsel %vm495_vm0, %v514_v29, 0.0 }
 0x1b2   :  { %v517_v32 = vadd.f32 %v516_v31, %v515_v30 }
 0x1b4   :  { %v519_v34 = vadd.f32 %v518_v33, %v517_v32 }
 0x1b6   :  { %v521_v36 = vadd.f32 %v520_v35, %v519_v34 }
 0x1b8   :  { %522 = vadd.xlane.f32.xlu0 %v521_v36 }
 0x241   :  { %v523_v37 = vpop.xlane.xlu0 %522 }
 0x242   :  { %v524_v38 = vmul.f32 0.001953125, %v523_v37 }
 0x244   :  { %v525_v39 = vadd.f32 1e-05, %v524_v38 }
 0x246   :  { %569 = vrsqrt.f32 %v525_v39 }
 0x253   :  { %v570_v41 = vpop.eup %569 }
 0x254   :  { %v527_v42 = vmul.f32 %v570_v41, %v507_v22  ;;  %v528_v43 = vmul.f32 %v570_v41, %v508_v23  ;;  %v529_v44 = vmul.f32 %v570_v41, %v509_v24  ;;  %v530_v45 = vmul.f32 %v570_v41, %v510_v25 }
 0x256   :  { %v537_v46 = vmul.f32 %v535_v40, %v527_v42  ;;  %v538_v47 = vmul.f32 %v535_v40, %v528_v43  ;;  %v539_v48 = vmul.f32 %v535_v40, %v529_v44  ;;  %v540_v49 = vmul.f32 %v535_v40, %v530_v45 }
 0x258   :  { %v547_v51 = vadd.f32 %v545_v50, %v537_v46  ;;  %v548_v52 = vadd.f32 %v545_v50, %v538_v47  ;;  %v549_v53 = vadd.f32 %v545_v50, %v539_v48  ;;  %v550_v54 = vadd.f32 %v545_v50, %v540_v49 }
 0x25a   :  { %v555_v55 = vcombine.low %v547_v51, %v548_v52  ;;  %v556_v56 = vcombine.low %v549_v53, %v550_v54 }
 0x25c   :  { %559 = vst [vmem:[%s816_s4] sm:$0xff] %v555_v55  ;;  %560 = vst [vmem:[%s816_s4 + $0x8] sm:$0xff] %v556_v56 }

// kernel: _lambda_.19
= control target key start
LH: loop header
LB: loop body
LE: loop exit
PB: predicated region body
PF: predicated region fallthrough
CT: control target
= control target key end

     0   :  { %s1346_s18 = smov 0   ;;  %s1348_s19 = smov 0   ;;  %s1635_s0 = inlined_call_operand.vmem [shape: bf16[4,128], index: 0, kind: input, shape index: {}]   ;;  %s1636_s1 = inlined_call_operand.vmem [shape: bf16[128,2048], index: 1, kind: input, shape index: {}]   ;;  %s1637_s2 = inlined_call_operand.vmem [shape: f32[4,1], index: 2, kind: input, shape index: {}]   ;;  %s1638_s3 = inlined_call_operand.vmem [shape: bf16[3,4], index: 3, kind: input, shape index: {}]   ;;  %s1639_s4 = inlined_call_operand.vmem [shape: f32[3,1], index: 4, kind: input, shape index: {}]   ;;  %s1640_s5 = inlined_call_operand.vmem [shape: f32[3,2048], index: 5, kind: output, shape index: {}]  }
   0x1   :  { %s1350_s20 = smov 0  }
   0x2 LB: > { %s1227_s21 = sadd.s32 4294967295, %s1313_s20   ;;  %s1363_s22 = sadd.s32 1, %s1313_s20   ;;  %s1313_s20 = sphi %s1350_s20, %s1643_s20   ;;  %s1309_s19 = sphi %s1348_s19, %s1642_s19   ;;  %s1305_s18 = sphi %s1346_s18, %s1641_s18  }
   0x3   : > { %s40_s23 = ssub.s32 %s1313_s20, %s1363_s22  ;;  %s43_s24 = sadd.s32 1, %s1309_s19 }
   0x4   : > { %p41_p0 = scmp.eq.s32.totalorder %s40_s23, 0  ;;  %p50_p1 = scmp.ne.s32.totalorder %s1309_s19, %s1305_s18 }
   0x5   : > { %p51_p2 = scmp.eq.s32.totalorder %s1313_s20, 0  ;;  %p1230_p4 = scmp.ge.s32.totalorder %s1313_s20, 2 }
   0x6   : > { %s1372_s25 = scalar_select %p41_p0, %s1309_s19, %s43_s24  }
   0x7   : > { %p52_p3 = por %p51_p2, %p50_p1  ;;  %177 = sbr.rel (%p1230_p4) target bundleno = 48 (0x30), region = 32 }
   0xc   : > { %180 = sbr.rel (!%p52_p3) target bundleno = 48 (0x30), region = 36  ;;  %s182_s26 = sand.u32 (%p52_p3), 1, %s1309_s19  }
   0xd   : > { %s1248_s27 = sshll.u32 (%p52_p3), %s1313_s20, 5  ;;  %s1231_s28 = sshll.u32 (%p52_p3), %s182_s26, 9 }
   0xe   : > { %s1380_s6 = scalar_lea.vmem (%p52_p3), %s1636_s1, %s1248_s27  ;;  %s1385_s7 = scalar_lea.vmem (%p52_p3), [#allocation2], %s1231_s28 }
   0xf   : > { %v200_v0 = vld [vmem:[%s1380_s6] sm:$0xff] (%p52_p3)  ;;  %v202_v1 = vld [vmem:[%s1380_s6 + $0x8] sm:$0xff] (%p52_p3)  ;;  %v204_v2 = vld [vmem:[%s1380_s6 + $0x10] sm:$0xff] (%p52_p3) }
  0x10   : > { %201 = vst [vmem:[%s1385_s7] sm:$0xff] (%p52_p3), %v200_v0  ;;  %203 = vst [vmem:[%s1385_s7 + $0x8] sm:$0xff] (%p52_p3), %v202_v1  ;;  %v206_v3 = vld [vmem:[%s1380_s6 + $0x18] sm:$0xff] (%p52_p3)  ;;  %v208_v4 = vld [vmem:[%s1380_s6 + $0x40] sm:$0xff] (%p52_p3) }
  0x11   : > { %205 = vst [vmem:[%s1385_s7 + $0x10] sm:$0xff] %v204_v2  ;;  %v210_v5 = vld [vmem:[%s1380_s6 + $0x48] sm:$0xff]  ;;  %207 = vst [vmem:[%s1385_s7 + $0x18] sm:$0xff] %v206_v3  ;;  %v212_v6 = vld [vmem:[%s1380_s6 + $0x50] sm:$0xff] }
  0x12   : > { %209 = vst [vmem:[%s1385_s7 + $0x20] sm:$0xff] %v208_v4  ;;  %211 = vst [vmem:[%s1385_s7 + $0x28] sm:$0xff] %v210_v5  ;;  %v214_v7 = vld [vmem:[%s1380_s6 + $0x58] sm:$0xff]  ;;  %v216_v8 = vld [vmem:[%s1380_s6 + $0x80] sm:$0xff] }
  0x13   : > { %213 = vst [vmem:[%s1385_s7 + $0x30] sm:$0xff] %v212_v6  ;;  %215 = vst [vmem:[%s1385_s7 + $0x38] sm:$0xff] %v214_v7  ;;  %v218_v9 = vld [vmem:[%s1380_s6 + $0x88] sm:$0xff]  ;;  %v220_v10 = vld [vmem:[%s1380_s6 + $0x90] sm:$0xff] }
  0x14   : > { %217 = vst [vmem:[%s1385_s7 + $0x40] sm:$0xff] %v216_v8  ;;  %v222_v11 = vld [vmem:[%s1380_s6 + $0x98] sm:$0xff]  ;;  %219 = vst [vmem:[%s1385_s7 + $0x48] sm:$0xff] %v218_v9  ;;  %v224_v12 = vld [vmem:[%s1380_s6 + $0xc0] sm:$0xff] }
  0x15   : > { %221 = vst [vmem:[%s1385_s7 + $0x50] sm:$0xff] %v220_v10  ;;  %223 = vst [vmem:[%s1385_s7 + $0x58] sm:$0xff] %v222_v11  ;;  %v226_v13 = vld [vmem:[%s1380_s6 + $0xc8] sm:$0xff]  ;;  %v228_v14 = vld [vmem:[%s1380_s6 + $0xd0] sm:$0xff] }
  0x16   : > { %225 = vst [vmem:[%s1385_s7 + $0x60] sm:$0xff] %v224_v12  ;;  %227 = vst [vmem:[%s1385_s7 + $0x68] sm:$0xff] %v226_v13  ;;  %v230_v15 = vld [vmem:[%s1380_s6 + $0xd8] sm:$0xff]  ;;  %v232_v16 = vld [vmem:[%s1380_s6 + $0x100] sm:$0xff] }
  0x17   : > { %229 = vst [vmem:[%s1385_s7 + $0x70] sm:$0xff] %v228_v14  ;;  %v234_v17 = vld [vmem:[%s1380_s6 + $0x108] sm:$0xff]  ;;  %231 = vst [vmem:[%s1385_s7 + $0x78] sm:$0xff] %v230_v15  ;;  %v236_v18 = vld [vmem:[%s1380_s6 + $0x110] sm:$0xff] }
  0x18   : > { %233 = vst [vmem:[%s1385_s7 + $0x80] sm:$0xff] %v232_v16  ;;  %235 = vst [vmem:[%s1385_s7 + $0x88] sm:$0xff] %v234_v17  ;;  %v238_v19 = vld [vmem:[%s1380_s6 + $0x118] sm:$0xff]  ;;  %v240_v20 = vld [vmem:[%s1380_s6 + $0x140] sm:$0xff] }
  0x19   : > { %237 = vst [vmem:[%s1385_s7 + $0x90] sm:$0xff] %v236_v18  ;;  %239 = vst [vmem:[%s1385_s7 + $0x98] sm:$0xff] %v238_v19  ;;  %v242_v21 = vld [vmem:[%s1380_s6 + $0x148] sm:$0xff]  ;;  %v244_v22 = vld [vmem:[%s1380_s6 + $0x150] sm:$0xff] }
  0x1a   : > { %241 = vst [vmem:[%s1385_s7 + $0xa0] sm:$0xff] %v240_v20  ;;  %v246_v23 = vld [vmem:[%s1380_s6 + $0x158] sm:$0xff]  ;;  %243 = vst [vmem:[%s1385_s7 + $0xa8] sm:$0xff] %v242_v21  ;;  %v248_v24 = vld [vmem:[%s1380_s6 + $0x180] sm:$0xff] }
  0x1b   : > { %245 = vst [vmem:[%s1385_s7 + $0xb0] sm:$0xff] %v244_v22  ;;  %247 = vst [vmem:[%s1385_s7 + $0xb8] sm:$0xff] %v246_v23  ;;  %v250_v25 = vld [vmem:[%s1380_s6 + $0x188] sm:$0xff]  ;;  %v252_v26 = vld [vmem:[%s1380_s6 + $0x190] sm:$0xff] }
  0x1c   : > { %249 = vst [vmem:[%s1385_s7 + $0xc0] sm:$0xff] %v248_v24  ;;  %251 = vst [vmem:[%s1385_s7 + $0xc8] sm:$0xff] %v250_v25  ;;  %v254_v27 = vld [vmem:[%s1380_s6 + $0x198] sm:$0xff]  ;;  %v256_v28 = vld [vmem:[%s1380_s6 + $0x1c0] sm:$0xff] }
  0x1d   : > { %253 = vst [vmem:[%s1385_s7 + $0xd0] sm:$0xff] %v252_v26  ;;  %v258_v29 = vld [vmem:[%s1380_s6 + $0x1c8] sm:$0xff]  ;;  %255 = vst [vmem:[%s1385_s7 + $0xd8] sm:$0xff] %v254_v27  ;;  %v260_v30 = vld [vmem:[%s1380_s6 + $0x1d0] sm:$0xff] }
  0x1e   : > { %257 = vst [vmem:[%s1385_s7 + $0xe0] sm:$0xff] %v256_v28  ;;  %259 = vst [vmem:[%s1385_s7 + $0xe8] sm:$0xff] %v258_v29  ;;  %v262_v31 = vld [vmem:[%s1380_s6 + $0x1d8] sm:$0xff]  ;;  %v264_v32 = vld [vmem:[%s1380_s6 + $0x200] sm:$0xff] }
  0x1f   : > { %261 = vst [vmem:[%s1385_s7 + $0xf0] sm:$0xff] %v260_v30  ;;  %263 = vst [vmem:[%s1385_s7 + $0xf8] sm:$0xff] %v262_v31  ;;  %v266_v33 = vld [vmem:[%s1380_s6 + $0x208] sm:$0xff]  ;;  %v268_v34 = vld [vmem:[%s1380_s6 + $0x210] sm:$0xff] }
  0x20   : > { %265 = vst [vmem:[%s1385_s7 + $0x100] sm:$0xff] %v264_v32  ;;  %v270_v35 = vld [vmem:[%s1380_s6 + $0x218] sm:$0xff]  ;;  %267 = vst [vmem:[%s1385_s7 + $0x108] sm:$0xff] %v266_v33  ;;  %v272_v36 = vld [vmem:[%s1380_s6 + $0x240] sm:$0xff] }
  0x21   : > { %269 = vst [vmem:[%s1385_s7 + $0x110] sm:$0xff] %v268_v34  ;;  %271 = vst [vmem:[%s1385_s7 + $0x118] sm:$0xff] %v270_v35  ;;  %v274_v37 = vld [vmem:[%s1380_s6 + $0x248] sm:$0xff]  ;;  %v276_v38 = vld [vmem:[%s1380_s6 + $0x250] sm:$0xff] }
  0x22   : > { %273 = vst [vmem:[%s1385_s7 + $0x120] sm:$0xff] %v272_v36  ;;  %275 = vst [vmem:[%s1385_s7 + $0x128] sm:$0xff] %v274_v37  ;;  %v278_v39 = vld [vmem:[%s1380_s6 + $0x258] sm:$0xff]  ;;  %v280_v40 = vld [vmem:[%s1380_s6 + $0x280] sm:$0xff] }
  0x23   : > { %277 = vst [vmem:[%s1385_s7 + $0x130] sm:$0xff] %v276_v38  ;;  %v282_v41 = vld [vmem:[%s1380_s6 + $0x288] sm:$0xff]  ;;  %279 = vst [vmem:[%s1385_s7 + $0x138] sm:$0xff] %v278_v39  ;;  %v284_v42 = vld [vmem:[%s1380_s6 + $0x290] sm:$0xff] }
  0x24   : > { %281 = vst [vmem:[%s1385_s7 + $0x140] sm:$0xff] %v280_v40  ;;  %283 = vst [vmem:[%s1385_s7 + $0x148] sm:$0xff] %v282_v41  ;;  %v286_v43 = vld [vmem:[%s1380_s6 + $0x298] sm:$0xff]  ;;  %v288_v44 = vld [vmem:[%s1380_s6 + $0x2c0] sm:$0xff] }
  0x25   : > { %285 = vst [vmem:[%s1385_s7 + $0x150] sm:$0xff] %v284_v42  ;;  %287 = vst [vmem:[%s1385_s7 + $0x158] sm:$0xff] %v286_v43  ;;  %v290_v45 = vld [vmem:[%s1380_s6 + $0x2c8] sm:$0xff]  ;;  %v292_v46 = vld [vmem:[%s1380_s6 + $0x2d0] sm:$0xff] }
  0x26   : > { %289 = vst [vmem:[%s1385_s7 + $0x160] sm:$0xff] %v288_v44  ;;  %v294_v47 = vld [vmem:[%s1380_s6 + $0x2d8] sm:$0xff]  ;;  %291 = vst [vmem:[%s1385_s7 + $0x168] sm:$0xff] %v290_v45  ;;  %v296_v48 = vld [vmem:[%s1380_s6 + $0x300] sm:$0xff] }
  0x27   : > { %293 = vst [vmem:[%s1385_s7 + $0x170] sm:$0xff] %v292_v46  ;;  %295 = vst [vmem:[%s1385_s7 + $0x178] sm:$0xff] %v294_v47  ;;  %v298_v49 = vld [vmem:[%s1380_s6 + $0x308] sm:$0xff]  ;;  %v300_v50 = vld [vmem:[%s1380_s6 + $0x310] sm:$0xff] }
  0x28   : > { %297 = vst [vmem:[%s1385_s7 + $0x180] sm:$0xff] %v296_v48  ;;  %299 = vst [vmem:[%s1385_s7 + $0x188] sm:$0xff] %v298_v49  ;;  %v302_v51 = vld [vmem:[%s1380_s6 + $0x318] sm:$0xff]  ;;  %v304_v52 = vld [vmem:[%s1380_s6 + $0x340] sm:$0xff] }
  0x29   : > { %301 = vst [vmem:[%s1385_s7 + $0x190] sm:$0xff] %v300_v50  ;;  %v306_v53 = vld [vmem:[%s1380_s6 + $0x348] sm:$0xff]  ;;  %303 = vst [vmem:[%s1385_s7 + $0x198] sm:$0xff] %v302_v51  ;;  %v308_v54 = vld [vmem:[%s1380_s6 + $0x350] sm:$0xff] }
  0x2a   : > { %305 = vst [vmem:[%s1385_s7 + $0x1a0] sm:$0xff] %v304_v52  ;;  %307 = vst [vmem:[%s1385_s7 + $0x1a8] sm:$0xff] %v306_v53  ;;  %v310_v55 = vld [vmem:[%s1380_s6 + $0x358] sm:$0xff]  ;;  %v312_v56 = vld [vmem:[%s1380_s6 + $0x380] sm:$0xff] }
  0x2b   : > { %309 = vst [vmem:[%s1385_s7 + $0x1b0] sm:$0xff] %v308_v54  ;;  %311 = vst [vmem:[%s1385_s7 + $0x1b8] sm:$0xff] %v310_v55  ;;  %v314_v57 = vld [vmem:[%s1380_s6 + $0x388] sm:$0xff]  ;;  %v316_v58 = vld [vmem:[%s1380_s6 + $0x390] sm:$0xff] }
  0x2c   : > { %313 = vst [vmem:[%s1385_s7 + $0x1c0] sm:$0xff] %v312_v56  ;;  %v318_v59 = vld [vmem:[%s1380_s6 + $0x398] sm:$0xff]  ;;  %315 = vst [vmem:[%s1385_s7 + $0x1c8] sm:$0xff] %v314_v57  ;;  %v320_v60 = vld [vmem:[%s1380_s6 + $0x3c0] sm:$0xff] }
  0x2d   : > { %317 = vst [vmem:[%s1385_s7 + $0x1d0] sm:$0xff] %v316_v58  ;;  %319 = vst [vmem:[%s1385_s7 + $0x1d8] sm:$0xff] %v318_v59  ;;  %v322_v61 = vld [vmem:[%s1380_s6 + $0x3c8] sm:$0xff]  ;;  %v324_v62 = vld [vmem:[%s1380_s6 + $0x3d0] sm:$0xff] }
  0x2e   : > { %321 = vst [vmem:[%s1385_s7 + $0x1e0] sm:$0xff] %v320_v60  ;;  %323 = vst [vmem:[%s1385_s7 + $0x1e8] sm:$0xff] %v322_v61  ;;  %v326_v63 = vld [vmem:[%s1380_s6 + $0x3d8] sm:$0xff] }
  0x2f   : > { %325 = vst [vmem:[%s1385_s7 + $0x1f0] sm:$0xff] %v324_v62  ;;  %327 = vst [vmem:[%s1385_s7 + $0x1f8] sm:$0xff] %v326_v63 }
  0x30 PF: > { %p1234_p5 = scmp.ge.s32.totalorder %s1313_s20, 1  ;;  %p332_p6 = scmp.lt.s32.totalorder %s1313_s20, 3 }
  0x32   : > { %p333_p7 = pnand %p1234_p5, %p332_p6 }
  0x33   : > { %s339_s8 = sand.u32 (!%p333_p7), 1, %s1305_s18   ;;  %s1236_s23 = sshll.u32 (!%p333_p7), %s1227_s21, 3 }
  0x34   : > { %336 = sbr.rel (%p333_p7) target bundleno = 563 (0x233), region = 59  ;;  %s1235_s11 = sshll.u32 (!%p333_p7), %s339_s8, 9 }
  0x35   : > { %s1521_s12 = scalar_lea.vmem (!%p333_p7), [#allocation2], %s1235_s11  ;;  %p368_p8 = scmp.lt.s32.totalorder (!%p333_p7), %s1236_s23, 15 }
  0x39   : > { %v759_v0 = vld [vmem:[%s1637_s2] sm:$0xf]  ;;  %v1315_v1 = vmov 0   ;;  %v431_v4 = vld [vmem:[%s1521_s12 + $0x1c8] sm:$0xff]  ;;  %vm948_vm0 = vcmask 1041408   ;;  %vm944_vm1 = vcmask 31744  }
  0x3a   : > { %797 = vmatprep.mubr.bf16.mxu0 %v1315_v1  ;;  %838 = vmatprep.mubr.bf16.mxu1 %v1315_v1  ;;  %v430_v2 = vld [vmem:[%s1521_s12 + $0x1c0] sm:$0xff]  ;;  %v435_v7 = vld [vmem:[%s1521_s12 + $0x1e8] sm:$0xff]  ;;  %v553_v8 = vunpack.c.h.bf16 %v431_v4  ;;  %v552_v13 = vunpack.c.l.bf16 %v431_v4  ;;  %s1645_s23 = smov (!%p368_p8, %s1236_s23), 15 }
  0x3b   : > { %1274 = vset.pattern.permute.xlu0 %v1315_v1  ;;  %v434_v3 = vld [vmem:[%s1521_s12 + $0x1e0] sm:$0xff]  ;;  %v551_v5 = vunpack.c.h.bf16 %v430_v2  ;;  %v550_v9 = vunpack.c.l.bf16 %v430_v2  ;;  %v561_v11 = vunpack.c.h.bf16 %v435_v7  ;;  %v560_v14 = vunpack.c.l.bf16 %v435_v7  ;;  %v423_v17 = vld [vmem:[%s1521_s12 + $0x188] sm:$0xff]  ;;  %s1237_s24 = sshll.u32 %s1645_s23, 2 }
  0x3c   : > { %762 = vperm.xlu0 %1274, %v759_v0   ;;  %v559_v6 = vunpack.c.h.bf16 %v434_v3  ;;  %v938_v10 = vld [vmem:[%s1639_s4] sm:$0x7]  ;;  %v558_v12 = vunpack.c.l.bf16 %v434_v3  ;;  %v681_v20 = vmax.f32 %v553_v8, 0.0  ;;  %v427_v22 = vld [vmem:[%s1521_s12 + $0x1a8] sm:$0xff]  ;;  %v680_v25 = vmax.f32 %v552_v13, 0.0  ;;  %s371_s28 = scalar_lea.vmem %s1640_s5, %s1237_s24 }
  0x3d   : > { %v422_v15 = vld [vmem:[%s1521_s12 + $0x180] sm:$0xff]  ;;  %v679_v18 = vmax.f32 %v551_v5, 0.0  ;;  %v678_v21 = vmax.f32 %v550_v9, 0.0  ;;  %v689_v23 = vmax.f32 %v561_v11, 0.0  ;;  %v688_v26 = vmax.f32 %v560_v14, 0.0  ;;  %v415_v45 = vld [vmem:[%s1521_s12 + $0x148] sm:$0xff] }
  0x3e   : > { %v426_v16 = vld [vmem:[%s1521_s12 + $0x1a0] sm:$0xff]  ;;  %v687_v19 = vmax.f32 %v559_v6, 0.0  ;;  %v686_v24 = vmax.f32 %v558_v12, 0.0  ;;  %v535_v28 = vunpack.c.h.bf16 %v422_v15  ;;  %v537_v30 = vunpack.c.h.bf16 %v423_v17  ;;  %v419_v46 = vld [vmem:[%s1521_s12 + $0x168] sm:$0xff] }
  0x3f   : > { %v543_v29 = vunpack.c.h.bf16 %v426_v16  ;;  %v753_v31 = vpack.c.bf16 %v689_v23, %v681_v20  ;;  %v752_v33 = vpack.c.bf16 %v688_v26, %v680_v25  ;;  %v545_v34 = vunpack.c.h.bf16 %v427_v22  ;;  %v414_v35 = vld [vmem:[%s1521_s12 + $0x140] sm:$0xff]  ;;  %v407_v2 = vld [vmem:[%s1521_s12 + $0x108] sm:$0xff] }
  0x40   : > { %941 = vperm.xlu0 %1274, %v938_v10   ;;  %v751_v27 = vpack.c.bf16 %v687_v19, %v679_v18  ;;  %v750_v32 = vpack.c.bf16 %v686_v24, %v678_v21  ;;  %v418_v36 = vld [vmem:[%s1521_s12 + $0x160] sm:$0xff]  ;;  %v663_v37 = vmax.f32 %v535_v28, 0.0  ;;  %v665_v39 = vmax.f32 %v537_v30, 0.0  ;;  %v411_v7 = vld [vmem:[%s1521_s12 + $0x128] sm:$0xff] }
  0x41   : > { %v671_v38 = vmax.f32 %v543_v29, 0.0  ;;  %v534_v40 = vunpack.c.l.bf16 %v422_v15  ;;  %806 = vmatprep.subr.bf16.mxu1 %v753_v31  ;;  %v673_v41 = vmax.f32 %v545_v34, 0.0  ;;  %v542_v42 = vunpack.c.l.bf16 %v426_v16  ;;  %v406_v59 = vld [vmem:[%s1521_s12 + $0x100] sm:$0xff]  ;;  %v399_v30 = vld [vmem:[%s1521_s12 + $0xc8] sm:$0xff] }
  0x42   : > { %765 = vmatprep.subr.bf16.mxu0 %v751_v27  ;;  %v536_v43 = vunpack.c.l.bf16 %v423_v17  ;;  %v544_v44 = vunpack.c.l.bf16 %v427_v22  ;;  %807 = vmatpush1.bf16.msra.mxu1 %v752_v33  ;;  %v519_v49 = vunpack.c.h.bf16 %v414_v35  ;;  %v527_v50 = vunpack.c.h.bf16 %v418_v36  ;;  %v410_v0 = vld [vmem:[%s1521_s12 + $0x120] sm:$0xff]  ;;  %v403_v31 = vld [vmem:[%s1521_s12 + $0xe8] sm:$0xff] }
  0x43   : > { %766 = vmatpush1.bf16.msra.mxu0 %v750_v32  ;;  %v743_v47 = vpack.c.bf16 %v671_v38, %v663_v37  ;;  %v662_v48 = vmax.f32 %v534_v40, 0.0  ;;  %v745_v51 = vpack.c.bf16 %v673_v41, %v665_v39  ;;  %v670_v52 = vmax.f32 %v542_v42, 0.0  ;;  %v398_v20 = vld [vmem:[%s1521_s12 + $0xc0] sm:$0xff] }
  0x44   : > { %v664_v53 = vmax.f32 %v536_v43, 0.0  ;;  %v672_v54 = vmax.f32 %v544_v44, 0.0  ;;  %v647_v55 = vmax.f32 %v519_v49, 0.0  ;;  %v655_v56 = vmax.f32 %v527_v50, 0.0  ;;  %v402_v25 = vld [vmem:[%s1521_s12 + $0xe0] sm:$0xff] }
  0x45   : > { %767 = vmatprep.subr.bf16.mxu0 %v743_v47  ;;  %v521_v57 = vunpack.c.h.bf16 %v415_v45  ;;  %v529_v58 = vunpack.c.h.bf16 %v419_v46  ;;  %808 = vmatprep.subr.bf16.mxu1 %v745_v51  ;;  %v742_v60 = vpack.c.bf16 %v670_v52, %v662_v48  ;;  %v518_v62 = vunpack.c.l.bf16 %v414_v35  ;;  %v390_v44 = vld [vmem:[%s1521_s12 + $0x80] sm:$0xff] }
  0x46   : > { %v744_v61 = vpack.c.bf16 %v672_v54, %v664_v53  ;;  %v526_v63 = vunpack.c.l.bf16 %v418_v36  ;;  %v735_v3 = vpack.c.bf16 %v655_v56, %v647_v55  ;;  %v520_v6 = vunpack.c.l.bf16 %v415_v45  ;;  %v394_v49 = vld [vmem:[%s1521_s12 + $0xa0] sm:$0xff]  ;;  %v391_v54 = vld [vmem:[%s1521_s12 + $0x88] sm:$0xff] }
  0x47   : > { %v649_v4 = vmax.f32 %v521_v57, 0.0  ;;  %v657_v5 = vmax.f32 %v529_v58, 0.0  ;;  %768 = vmatpush1.bf16.msra.mxu0 %v742_v60  ;;  %v646_v8 = vmax.f32 %v518_v62, 0.0  ;;  %v528_v10 = vunpack.c.l.bf16 %v419_v46  ;;  %v395_v55 = vld [vmem:[%s1521_s12 + $0xa8] sm:$0xff] }
  0x48   : > { %809 = vmatpush1.bf16.msra.mxu1 %v744_v61  ;;  %v654_v9 = vmax.f32 %v526_v63, 0.0  ;;  %v503_v11 = vunpack.c.h.bf16 %v406_v59  ;;  %769 = vmatprep.subr.bf16.mxu0 %v735_v3  ;;  %v648_v13 = vmax.f32 %v520_v6, 0.0  ;;  %v511_v14 = vunpack.c.h.bf16 %v410_v0 }
  0x49   : > { %v737_v12 = vpack.c.bf16 %v657_v5, %v649_v4  ;;  %v505_v15 = vunpack.c.h.bf16 %v407_v2  ;;  %v656_v17 = vmax.f32 %v528_v10, 0.0  ;;  %v513_v19 = vunpack.c.h.bf16 %v411_v7  ;;  %v382_v5 = vld [vmem:[%s1521_s12 + $0x40] sm:$0xff] }
  0x4a   : > { %v734_v16 = vpack.c.bf16 %v654_v9, %v646_v8  ;;  %v631_v18 = vmax.f32 %v503_v11, 0.0  ;;  %v639_v21 = vmax.f32 %v511_v14, 0.0  ;;  %v502_v23 = vunpack.c.l.bf16 %v406_v59  ;;  %v386_v10 = vld [vmem:[%s1521_s12 + $0x60] sm:$0xff] }
  0x4b   : > { %810 = vmatprep.subr.bf16.mxu1 %v737_v12  ;;  %v633_v22 = vmax.f32 %v505_v15, 0.0  ;;  %v510_v24 = vunpack.c.l.bf16 %v410_v0  ;;  %v736_v26 = vpack.c.bf16 %v656_v17, %v648_v13  ;;  %v641_v27 = vmax.f32 %v513_v19, 0.0  ;;  %v383_v15 = vld [vmem:[%s1521_s12 + $0x48] sm:$0xff] }
  0x4c   : > { %770 = vmatpush1.bf16.msra.mxu0 %v734_v16  ;;  %v504_v28 = vunpack.c.l.bf16 %v407_v2  ;;  %v512_v29 = vunpack.c.l.bf16 %v411_v7  ;;  %v727_v32 = vpack.c.bf16 %v639_v21, %v631_v18  ;;  %v630_v33 = vmax.f32 %v502_v23, 0.0  ;;  %v387_v16 = vld [vmem:[%s1521_s12 + $0x68] sm:$0xff] }
  0x4d   : > { %v638_v34 = vmax.f32 %v510_v24, 0.0  ;;  %v487_v35 = vunpack.c.h.bf16 %v398_v20  ;;  %811 = vmatpush1.bf16.msra.mxu1 %v736_v26  ;;  %v729_v36 = vpack.c.bf16 %v641_v27, %v633_v22  ;;  %v495_v39 = vunpack.c.h.bf16 %v402_v25 }
  0x4e   : > { %v632_v37 = vmax.f32 %v504_v28, 0.0  ;;  %v640_v38 = vmax.f32 %v512_v29, 0.0  ;;  %771 = vmatprep.subr.bf16.mxu0 %v727_v32  ;;  %v489_v42 = vunpack.c.h.bf16 %v399_v30  ;;  %v497_v43 = vunpack.c.h.bf16 %v403_v31  ;;  %v374_v29 = vld [vmem:[%s1521_s12] sm:$0xff] }
  0x4f   : > { %v726_v40 = vpack.c.bf16 %v638_v34, %v630_v33  ;;  %v615_v41 = vmax.f32 %v487_v35, 0.0  ;;  %812 = vmatprep.subr.bf16.mxu1 %v729_v36  ;;  %v623_v46 = vmax.f32 %v495_v39, 0.0  ;;  %v486_v47 = vunpack.c.l.bf16 %v398_v20  ;;  %v378_v34 = vld [vmem:[%s1521_s12 + $0x20] sm:$0xff]  ;;  %v375_v39 = vld [vmem:[%s1521_s12 + $0x8] sm:$0xff] }
  0x50   : > { %v728_v45 = vpack.c.bf16 %v640_v38, %v632_v37  ;;  %v494_v48 = vunpack.c.l.bf16 %v402_v25  ;;  %v617_v50 = vmax.f32 %v489_v42, 0.0  ;;  %v625_v51 = vmax.f32 %v497_v43, 0.0 }
  0x51   : > { %772 = vmatpush1.bf16.msra.mxu0 %v726_v40  ;;  %v488_v52 = vunpack.c.l.bf16 %v399_v30  ;;  %v496_v53 = vunpack.c.l.bf16 %v403_v31  ;;  %v719_v56 = vpack.c.bf16 %v623_v46, %v615_v41  ;;  %v614_v57 = vmax.f32 %v486_v47, 0.0  ;;  %v379_v40 = vld [vmem:[%s1521_s12 + $0x28] sm:$0xff] }
  0x52   : > { %813 = vmatpush1.bf16.msra.mxu1 %v728_v45  ;;  %v622_v58 = vmax.f32 %v494_v48, 0.0  ;;  %v471_v59 = vunpack.c.h.bf16 %v390_v44  ;;  %v721_v60 = vpack.c.bf16 %v625_v51, %v617_v50  ;;  %v479_v63 = vunpack.c.h.bf16 %v394_v49 }
  0x53   : > { %v616_v61 = vmax.f32 %v488_v52, 0.0  ;;  %v624_v62 = vmax.f32 %v496_v53, 0.0  ;;  %773 = vmatprep.subr.bf16.mxu0 %v719_v56  ;;  %v473_v3 = vunpack.c.h.bf16 %v391_v54  ;;  %v481_v4 = vunpack.c.h.bf16 %v395_v55  ;;  %v432_v53 = vld [vmem:[%s1521_s12 + $0x1d0] sm:$0xff] }
  0x54   : > { %v718_v0 = vpack.c.bf16 %v622_v58, %v614_v57  ;;  %v599_v2 = vmax.f32 %v471_v59, 0.0  ;;  %814 = vmatprep.subr.bf16.mxu1 %v721_v60  ;;  %v607_v7 = vmax.f32 %v479_v63, 0.0  ;;  %v470_v8 = vunpack.c.l.bf16 %v390_v44 }
  0x55   : > { %v720_v6 = vpack.c.bf16 %v624_v62, %v616_v61  ;;  %v478_v9 = vunpack.c.l.bf16 %v394_v49  ;;  %v601_v11 = vmax.f32 %v473_v3, 0.0  ;;  %v609_v12 = vmax.f32 %v481_v4, 0.0  ;;  %v436_v62 = vld [vmem:[%s1521_s12 + $0x1f0] sm:$0xff]  ;;  %v433_v4 = vld [vmem:[%s1521_s12 + $0x1d8] sm:$0xff] }
  0x56   : > { %774 = vmatpush1.bf16.msra.mxu0 %v718_v0  ;;  %v472_v13 = vunpack.c.l.bf16 %v391_v54  ;;  %v480_v14 = vunpack.c.l.bf16 %v395_v55  ;;  %v711_v17 = vpack.c.bf16 %v607_v7, %v599_v2  ;;  %v598_v18 = vmax.f32 %v470_v8, 0.0 }
  0x57   : > { %815 = vmatpush1.bf16.msra.mxu1 %v720_v6  ;;  %v606_v19 = vmax.f32 %v478_v9, 0.0  ;;  %v455_v20 = vunpack.c.h.bf16 %v382_v5  ;;  %v713_v21 = vpack.c.bf16 %v609_v12, %v601_v11  ;;  %v463_v24 = vunpack.c.h.bf16 %v386_v10  ;;  %v437_v9 = vld [vmem:[%s1521_s12 + $0x1f8] sm:$0xff] }
  0x58   : > { %v600_v22 = vmax.f32 %v472_v13, 0.0  ;;  %v608_v23 = vmax.f32 %v480_v14, 0.0  ;;  %775 = vmatprep.subr.bf16.mxu0 %v711_v17  ;;  %v457_v27 = vunpack.c.h.bf16 %v383_v15  ;;  %v465_v28 = vunpack.c.h.bf16 %v387_v16  ;;  %v424_v14 = vld [vmem:[%s1521_s12 + $0x190] sm:$0xff] }
  0x59   : > { %v710_v25 = vpack.c.bf16 %v606_v19, %v598_v18  ;;  %v583_v26 = vmax.f32 %v455_v20, 0.0  ;;  %816 = vmatprep.subr.bf16.mxu1 %v713_v21  ;;  %v591_v31 = vmax.f32 %v463_v24, 0.0  ;;  %v454_v32 = vunpack.c.l.bf16 %v382_v5  ;;  %v1566_v19 = vld [vmem:[%s1635_s0] sm:$0x3]  ;;  %v428_v24 = vld [vmem:[%s1521_s12 + $0x1b0] sm:$0xff] }
  0x5a   : > { %v712_v30 = vpack.c.bf16 %v608_v23, %v600_v22  ;;  %v462_v33 = vunpack.c.l.bf16 %v386_v10  ;;  %v585_v35 = vmax.f32 %v457_v27, 0.0  ;;  %v593_v36 = vmax.f32 %v465_v28, 0.0 }
  0x5b   : > { %776 = vmatpush1.bf16.msra.mxu0 %v710_v25  ;;  %v456_v37 = vunpack.c.l.bf16 %v383_v15  ;;  %v464_v38 = vunpack.c.l.bf16 %v387_v16  ;;  %v703_v41 = vpack.c.bf16 %v591_v31, %v583_v26  ;;  %v582_v42 = vmax.f32 %v454_v32, 0.0 }
  0x5c   : > { %817 = vmatpush1.bf16.msra.mxu1 %v712_v30  ;;  %v590_v43 = vmax.f32 %v462_v33, 0.0  ;;  %v439_v44 = vunpack.c.h.bf16 %v374_v29  ;;  %v705_v45 = vpack.c.bf16 %v593_v36, %v585_v35  ;;  %v447_v48 = vunpack.c.h.bf16 %v378_v34 }
  0x5d   : > { %v584_v46 = vmax.f32 %v456_v37, 0.0  ;;  %v592_v47 = vmax.f32 %v464_v38, 0.0  ;;  %777 = vmatprep.subr.bf16.mxu0 %v703_v41  ;;  %v441_v51 = vunpack.c.h.bf16 %v375_v39  ;;  %v449_v52 = vunpack.c.h.bf16 %v379_v40 }
  0x5e   : > { %v702_v49 = vpack.c.bf16 %v590_v43, %v582_v42  ;;  %v567_v50 = vmax.f32 %v439_v44, 0.0  ;;  %818 = vmatprep.subr.bf16.mxu1 %v705_v45  ;;  %v575_v55 = vmax.f32 %v447_v48, 0.0  ;;  %v438_v56 = vunpack.c.l.bf16 %v374_v29  ;;  %v425_v29 = vld [vmem:[%s1521_s12 + $0x198] sm:$0xff]  ;;  %v420_v48 = vld [vmem:[%s1521_s12 + $0x170] sm:$0xff] }
  0x5f   : > { %v704_v54 = vpack.c.bf16 %v592_v47, %v584_v46  ;;  %v446_v57 = vunpack.c.l.bf16 %v378_v34  ;;  %v569_v58 = vmax.f32 %v441_v51, 0.0  ;;  %v577_v59 = vmax.f32 %v449_v52, 0.0  ;;  %v429_v34 = vld [vmem:[%s1521_s12 + $0x1b8] sm:$0xff] }
  0x60   : > { %778 = vmatpush1.bf16.msra.mxu0 %v702_v49  ;;  %v440_v60 = vunpack.c.l.bf16 %v375_v39  ;;  %v448_v61 = vunpack.c.l.bf16 %v379_v40  ;;  %v695_v63 = vpack.c.bf16 %v575_v55, %v567_v50  ;;  %v566_v0 = vmax.f32 %v438_v56, 0.0  ;;  %v416_v39 = vld [vmem:[%s1521_s12 + $0x150] sm:$0xff] }
  0x61   : > { %819 = vmatpush1.bf16.msra.mxu1 %v704_v54  ;;  %v574_v2 = vmax.f32 %v446_v57, 0.0  ;;  %v554_v3 = vunpack.c.l.bf16 %v432_v53  ;;  %v697_v5 = vpack.c.bf16 %v577_v59, %v569_v58  ;;  %v555_v8 = vunpack.c.h.bf16 %v432_v53  ;;  %v417_v53 = vld [vmem:[%s1521_s12 + $0x158] sm:$0xff] }
  0x62   : > { %v568_v6 = vmax.f32 %v440_v60, 0.0  ;;  %v576_v7 = vmax.f32 %v448_v61, 0.0  ;;  %779 = vmatprep.subr.bf16.mxu0 %v695_v63  ;;  %v562_v11 = vunpack.c.l.bf16 %v436_v62  ;;  %v563_v12 = vunpack.c.h.bf16 %v436_v62  ;;  %v421_v58 = vld [vmem:[%s1521_s12 + $0x178] sm:$0xff]  ;;  %v408_v63 = vld [vmem:[%s1521_s12 + $0x110] sm:$0xff] }
  0x63   : > { %v694_v10 = vpack.c.bf16 %v574_v2, %v566_v0  ;;  %v682_v13 = vmax.f32 %v554_v3, 0.0  ;;  %820 = vmatprep.subr.bf16.mxu1 %v697_v5  ;;  %v683_v16 = vmax.f32 %v555_v8, 0.0  ;;  %v556_v17 = vunpack.c.l.bf16 %v433_v4 }
  0x64   : > { %v696_v15 = vpack.c.bf16 %v576_v7, %v568_v6  ;;  %v557_v18 = vunpack.c.h.bf16 %v433_v4  ;;  %v690_v20 = vmax.f32 %v562_v11, 0.0  ;;  %v691_v21 = vmax.f32 %v563_v12, 0.0 }
  0x65   : > { %780 = vmatpush1.bf16.msra.mxu0 %v694_v10  ;;  %v564_v22 = vunpack.c.l.bf16 %v437_v9  ;;  %v565_v23 = vunpack.c.h.bf16 %v437_v9  ;;  %v684_v25 = vmax.f32 %v556_v17, 0.0  ;;  %v538_v27 = vunpack.c.l.bf16 %v424_v14  ;;  %v412_v9 = vld [vmem:[%s1521_s12 + $0x130] sm:$0xff] }
  0x66   : > { %821 = vmatpush1.bf16.msra.mxu1 %v696_v15  ;;  %v685_v26 = vmax.f32 %v557_v18, 0.0  ;;  %v539_v28 = vunpack.c.h.bf16 %v424_v14  ;;  %v755_v30 = vpack.c.bf16 %v691_v21, %v683_v16  ;;  %v754_v33 = vpack.c.bf16 %v690_v20, %v682_v13  ;;  %v409_v14 = vld [vmem:[%s1521_s12 + $0x118] sm:$0xff] }
  0x67   : > { %v692_v31 = vmax.f32 %v564_v22, 0.0  ;;  %v693_v32 = vmax.f32 %v565_v23, 0.0  ;;  %v546_v35 = vunpack.c.l.bf16 %v428_v24  ;;  %v547_v36 = vunpack.c.h.bf16 %v428_v24  ;;  %v413_v20 = vld [vmem:[%s1521_s12 + $0x138] sm:$0xff] }
  0x68   : > { %798 = vmatmul.mubr.bf16.vlgmr.msra.gmra.mxu0 %v1566_v19  ;;  %v666_v37 = vmax.f32 %v538_v27, 0.0  ;;  %v667_v38 = vmax.f32 %v539_v28, 0.0  ;;  %847 = vmatprep.subr.bf16.mxu0 %v755_v30  ;;  %v540_v42 = vunpack.c.l.bf16 %v425_v29  ;;  %v541_v43 = vunpack.c.h.bf16 %v425_v29 }
  0x69   : > { %839 = vmatmul.mubr.bf16.vlgmr.msra.gmra.mxu1 %v1566_v19  ;;  %v757_v40 = vpack.c.bf16 %v693_v32, %v685_v26  ;;  %v756_v41 = vpack.c.bf16 %v692_v31, %v684_v25  ;;  %848 = vmatpush1.bf16.msra.mxu0 %v754_v33  ;;  %v674_v44 = vmax.f32 %v546_v35, 0.0  ;;  %v675_v45 = vmax.f32 %v547_v36, 0.0  ;;  %v400_v25 = vld [vmem:[%s1521_s12 + $0xd0] sm:$0xff] }
  0x6a   : > { %v548_v46 = vunpack.c.l.bf16 %v429_v34  ;;  %v549_v47 = vunpack.c.h.bf16 %v429_v34  ;;  %879 = vmatprep.mubr.bf16.mxu0 %v1315_v1  ;;  %v668_v49 = vmax.f32 %v540_v42, 0.0  ;;  %v669_v50 = vmax.f32 %v541_v43, 0.0  ;;  %920 = vmatprep.mubr.bf16.mxu1 %v1315_v1  ;;  %v404_v34 = vld [vmem:[%s1521_s12 + $0xf0] sm:$0xff] }
  0x6b   : > { %888 = vmatprep.subr.bf16.mxu1 %v757_v40  ;;  %v522_v51 = vunpack.c.l.bf16 %v416_v39  ;;  %v523_v52 = vunpack.c.h.bf16 %v416_v39  ;;  %v747_v54 = vpack.c.bf16 %v675_v45, %v667_v38  ;;  %v746_v57 = vpack.c.bf16 %v674_v44, %v666_v37  ;;  %v401_v39 = vld [vmem:[%s1521_s12 + $0xd8] sm:$0xff] }
  0x6c   : > { %889 = vmatpush1.bf16.msra.mxu1 %v756_v41  ;;  %v676_v55 = vmax.f32 %v548_v46, 0.0  ;;  %v677_v56 = vmax.f32 %v549_v47, 0.0  ;;  %v530_v59 = vunpack.c.l.bf16 %v420_v48  ;;  %v531_v60 = vunpack.c.h.bf16 %v420_v48  ;;  %v405_v44 = vld [vmem:[%s1521_s12 + $0xf8] sm:$0xff] }
  0x6d   : > { %v650_v61 = vmax.f32 %v522_v51, 0.0  ;;  %v651_v62 = vmax.f32 %v523_v52, 0.0  ;;  %849 = vmatprep.subr.bf16.mxu0 %v747_v54  ;;  %v524_v3 = vunpack.c.l.bf16 %v417_v53  ;;  %v525_v4 = vunpack.c.h.bf16 %v417_v53 }
  0x6e   : > { %v749_v0 = vpack.c.bf16 %v677_v56, %v669_v50  ;;  %v748_v2 = vpack.c.bf16 %v676_v55, %v668_v49  ;;  %850 = vmatpush1.bf16.msra.mxu0 %v746_v57  ;;  %v658_v5 = vmax.f32 %v530_v59, 0.0  ;;  %v659_v6 = vmax.f32 %v531_v60, 0.0  ;;  %v392_v49 = vld [vmem:[%s1521_s12 + $0x90] sm:$0xff] }
  0x6f   : > { %v532_v7 = vunpack.c.l.bf16 %v421_v58  ;;  %v533_v8 = vunpack.c.h.bf16 %v421_v58  ;;  %v652_v10 = vmax.f32 %v524_v3, 0.0  ;;  %v653_v11 = vmax.f32 %v525_v4, 0.0  ;;  %v396_v58 = vld [vmem:[%s1521_s12 + $0xb0] sm:$0xff] }
  0x70   : > { %890 = vmatprep.subr.bf16.mxu1 %v749_v0  ;;  %v506_v12 = vunpack.c.l.bf16 %v408_v63  ;;  %v507_v13 = vunpack.c.h.bf16 %v408_v63  ;;  %v739_v15 = vpack.c.bf16 %v659_v6, %v651_v62  ;;  %v738_v18 = vpack.c.bf16 %v658_v5, %v650_v61  ;;  %v393_v63 = vld [vmem:[%s1521_s12 + $0x98] sm:$0xff] }
  0x71   : > { %891 = vmatpush1.bf16.msra.mxu1 %v748_v2  ;;  %v660_v16 = vmax.f32 %v532_v7, 0.0  ;;  %v661_v17 = vmax.f32 %v533_v8, 0.0  ;;  %v514_v21 = vunpack.c.l.bf16 %v412_v9  ;;  %v515_v22 = vunpack.c.h.bf16 %v412_v9  ;;  %v397_v5 = vld [vmem:[%s1521_s12 + $0xb8] sm:$0xff] }
  0x72   : > { %v634_v23 = vmax.f32 %v506_v12, 0.0  ;;  %v635_v24 = vmax.f32 %v507_v13, 0.0  ;;  %851 = vmatprep.subr.bf16.mxu0 %v739_v15  ;;  %v508_v28 = vunpack.c.l.bf16 %v409_v14  ;;  %v509_v29 = vunpack.c.h.bf16 %v409_v14 }
  0x73   : > { %v741_v26 = vpack.c.bf16 %v661_v17, %v653_v11  ;;  %v740_v27 = vpack.c.bf16 %v660_v16, %v652_v10  ;;  %852 = vmatpush1.bf16.msra.mxu0 %v738_v18  ;;  %v642_v30 = vmax.f32 %v514_v21, 0.0  ;;  %v643_v31 = vmax.f32 %v515_v22, 0.0  ;;  %v384_v10 = vld [vmem:[%s1521_s12 + $0x50] sm:$0xff] }
  0x74   : > { %v516_v32 = vunpack.c.l.bf16 %v413_v20  ;;  %v517_v33 = vunpack.c.h.bf16 %v413_v20  ;;  %v636_v35 = vmax.f32 %v508_v28, 0.0  ;;  %v637_v36 = vmax.f32 %v509_v29, 0.0  ;;  %v388_v20 = vld [vmem:[%s1521_s12 + $0x70] sm:$0xff] }
  0x75   : > { %892 = vmatprep.subr.bf16.mxu1 %v741_v26  ;;  %v490_v37 = vunpack.c.l.bf16 %v400_v25  ;;  %v491_v38 = vunpack.c.h.bf16 %v400_v25  ;;  %v731_v40 = vpack.c.bf16 %v643_v31, %v635_v24  ;;  %v730_v43 = vpack.c.bf16 %v642_v30, %v634_v23  ;;  %v385_v25 = vld [vmem:[%s1521_s12 + $0x58] sm:$0xff] }
  0x76   : > { %893 = vmatpush1.bf16.msra.mxu1 %v740_v27  ;;  %v644_v41 = vmax.f32 %v516_v32, 0.0  ;;  %v645_v42 = vmax.f32 %v517_v33, 0.0  ;;  %v498_v45 = vunpack.c.l.bf16 %v404_v34  ;;  %v499_v46 = vunpack.c.h.bf16 %v404_v34  ;;  %v389_v30 = vld [vmem:[%s1521_s12 + $0x78] sm:$0xff] }
  0x77   : > { %v618_v47 = vmax.f32 %v490_v37, 0.0  ;;  %v619_v48 = vmax.f32 %v491_v38, 0.0  ;;  %853 = vmatprep.subr.bf16.mxu0 %v731_v40  ;;  %v492_v52 = vunpack.c.l.bf16 %v401_v39  ;;  %v493_v53 = vunpack.c.h.bf16 %v401_v39 }
  0x78   : > { %v733_v50 = vpack.c.bf16 %v645_v42, %v637_v36  ;;  %v732_v51 = vpack.c.bf16 %v644_v41, %v636_v35  ;;  %854 = vmatpush1.bf16.msra.mxu0 %v730_v43  ;;  %v626_v54 = vmax.f32 %v498_v45, 0.0  ;;  %v627_v55 = vmax.f32 %v499_v46, 0.0  ;;  %v376_v35 = vld [vmem:[%s1521_s12 + $0x10] sm:$0xff] }
  0x79   : > { %v500_v56 = vunpack.c.l.bf16 %v405_v44  ;;  %v501_v57 = vunpack.c.h.bf16 %v405_v44  ;;  %v620_v59 = vmax.f32 %v492_v52, 0.0  ;;  %v621_v60 = vmax.f32 %v493_v53, 0.0  ;;  %v380_v44 = vld [vmem:[%s1521_s12 + $0x30] sm:$0xff] }
  0x7a   : > { %894 = vmatprep.subr.bf16.mxu1 %v733_v50  ;;  %v474_v61 = vunpack.c.l.bf16 %v392_v49  ;;  %v475_v62 = vunpack.c.h.bf16 %v392_v49  ;;  %v723_v0 = vpack.c.bf16 %v627_v55, %v619_v48  ;;  %v722_v4 = vpack.c.bf16 %v626_v54, %v618_v47  ;;  %v377_v49 = vld [vmem:[%s1521_s12 + $0x18] sm:$0xff] }
  0x7b   : > { %895 = vmatpush1.bf16.msra.mxu1 %v732_v51  ;;  %v628_v2 = vmax.f32 %v500_v56, 0.0  ;;  %v629_v3 = vmax.f32 %v501_v57, 0.0  ;;  %v482_v6 = vunpack.c.l.bf16 %v396_v58  ;;  %v483_v7 = vunpack.c.h.bf16 %v396_v58  ;;  %v381_v54 = vld [vmem:[%s1521_s12 + $0x38] sm:$0xff] }
  0x7c   : > { %v602_v8 = vmax.f32 %v474_v61, 0.0  ;;  %v603_v9 = vmax.f32 %v475_v62, 0.0  ;;  %855 = vmatprep.subr.bf16.mxu0 %v723_v0  ;;  %v476_v13 = vunpack.c.l.bf16 %v393_v63  ;;  %v477_v14 = vunpack.c.h.bf16 %v393_v63 }
  0x7d   : > { %v725_v11 = vpack.c.bf16 %v629_v3, %v621_v60  ;;  %v724_v12 = vpack.c.bf16 %v628_v2, %v620_v59  ;;  %856 = vmatpush1.bf16.msra.mxu0 %v722_v4  ;;  %v610_v15 = vmax.f32 %v482_v6, 0.0  ;;  %v611_v16 = vmax.f32 %v483_v7, 0.0 }
  0x7e   : > { %v484_v17 = vunpack.c.l.bf16 %v397_v5  ;;  %v485_v18 = vunpack.c.h.bf16 %v397_v5  ;;  %v604_v21 = vmax.f32 %v476_v13, 0.0  ;;  %v605_v22 = vmax.f32 %v477_v14, 0.0 }
  0x7f   : > { %896 = vmatprep.subr.bf16.mxu1 %v725_v11  ;;  %v458_v23 = vunpack.c.l.bf16 %v384_v10  ;;  %v459_v24 = vunpack.c.h.bf16 %v384_v10  ;;  %v715_v26 = vpack.c.bf16 %v611_v16, %v603_v9  ;;  %v714_v29 = vpack.c.bf16 %v610_v15, %v602_v8 }
  0x80   : > { %897 = vmatpush1.bf16.msra.mxu1 %v724_v12  ;;  %v612_v27 = vmax.f32 %v484_v17, 0.0  ;;  %v613_v28 = vmax.f32 %v485_v18, 0.0  ;;  %v466_v31 = vunpack.c.l.bf16 %v388_v20  ;;  %v467_v32 = vunpack.c.h.bf16 %v388_v20 }
  0x81   : > { %v586_v33 = vmax.f32 %v458_v23, 0.0  ;;  %v587_v34 = vmax.f32 %v459_v24, 0.0  ;;  %857 = vmatprep.subr.bf16.mxu0 %v715_v26  ;;  %v460_v38 = vunpack.c.l.bf16 %v385_v25  ;;  %v461_v39 = vunpack.c.h.bf16 %v385_v25 }
  0x82   : > { %v717_v36 = vpack.c.bf16 %v613_v28, %v605_v22  ;;  %v716_v37 = vpack.c.bf16 %v612_v27, %v604_v21  ;;  %858 = vmatpush1.bf16.msra.mxu0 %v714_v29  ;;  %v594_v40 = vmax.f32 %v466_v31, 0.0  ;;  %v595_v41 = vmax.f32 %v467_v32, 0.0  ;;  %v929_v31 = vld [vmem:[%s1638_s3] sm:$0x3] }
  0x83   : > { %v468_v42 = vunpack.c.l.bf16 %v389_v30  ;;  %v469_v43 = vunpack.c.h.bf16 %v389_v30  ;;  %v588_v45 = vmax.f32 %v460_v38, 0.0  ;;  %v589_v46 = vmax.f32 %v461_v39, 0.0 }
  0x84   : > { %898 = vmatprep.subr.bf16.mxu1 %v717_v36  ;;  %v442_v47 = vunpack.c.l.bf16 %v376_v35  ;;  %v443_v48 = vunpack.c.h.bf16 %v376_v35  ;;  %v707_v50 = vpack.c.bf16 %v595_v41, %v587_v34  ;;  %v706_v53 = vpack.c.bf16 %v594_v40, %v586_v33 }
  0x85   : > { %899 = vmatpush1.bf16.msra.mxu1 %v716_v37  ;;  %v596_v51 = vmax.f32 %v468_v42, 0.0  ;;  %v597_v52 = vmax.f32 %v469_v43, 0.0  ;;  %v450_v55 = vunpack.c.l.bf16 %v380_v44  ;;  %v451_v56 = vunpack.c.h.bf16 %v380_v44 }
  0x86   : > { %v570_v57 = vmax.f32 %v442_v47, 0.0  ;;  %v571_v58 = vmax.f32 %v443_v48, 0.0  ;;  %859 = vmatprep.subr.bf16.mxu0 %v707_v50  ;;  %v444_v61 = vunpack.c.l.bf16 %v377_v49  ;;  %v445_v62 = vunpack.c.h.bf16 %v377_v49 }
  0x87   : > { %v709_v59 = vpack.c.bf16 %v597_v52, %v589_v46  ;;  %v708_v60 = vpack.c.bf16 %v596_v51, %v588_v45  ;;  %860 = vmatpush1.bf16.msra.mxu0 %v706_v53  ;;  %v578_v63 = vmax.f32 %v450_v55, 0.0  ;;  %v579_v0 = vmax.f32 %v451_v56, 0.0 }
  0x88   : > { %v452_v2 = vunpack.c.l.bf16 %v381_v54  ;;  %v453_v3 = vunpack.c.h.bf16 %v381_v54  ;;  %v572_v4 = vmax.f32 %v444_v61, 0.0  ;;  %v573_v5 = vmax.f32 %v445_v62, 0.0 }
  0x89   : > { %900 = vmatprep.subr.bf16.mxu1 %v709_v59  ;;  %v699_v6 = vpack.c.bf16 %v579_v0, %v571_v58  ;;  %v698_v9 = vpack.c.bf16 %v578_v63, %v570_v57 }
  0x8a   : > { %901 = vmatpush1.bf16.msra.mxu1 %v708_v60  ;;  %v580_v7 = vmax.f32 %v452_v2, 0.0  ;;  %v581_v8 = vmax.f32 %v453_v3, 0.0 }
  0x8b   : > { %861 = vmatprep.subr.bf16.mxu0 %v699_v6 }
  0x8c   : > { %v701_v10 = vpack.c.bf16 %v581_v8, %v573_v5  ;;  %v700_v11 = vpack.c.bf16 %v580_v7, %v572_v4  ;;  %862 = vmatpush1.bf16.msra.mxu0 %v698_v9 }
  0x8e   : > { %902 = vmatprep.subr.bf16.mxu1 %v701_v10 }
  0x8f   : > { %903 = vmatpush1.bf16.msra.mxu1 %v700_v11  ;;  %880 = vmatmul.mubr.bf16.vlgmr.msra.gmra.mxu0 %v1566_v19 }
  0x90   : > { %1005 = vmatprep.mubr.bf16.mxu0 %v1315_v1 }
  0x92   : > { %921 = vmatmul.mubr.bf16.vlgmr.msra.gmra.mxu1 %v1566_v19 }
  0x93   : > { %1046 = vmatprep.mubr.bf16.mxu1 %v1315_v1 }
  0xb7   : > { %v763_v12 = vpop.permute.xlu0 %762 }
  0xbb   : > { %v942_v49 = vpop.permute.xlu0 %941 }
 0x128   : > { %v799_v13 = vpop.f32.mrf.mxu0 }
 0x129   : > { %v840_v14 = vpop.f32.mrf.mxu1  ;;  %v800_v15 = vadd.f32 %v799_v13, %v763_v12 }
 0x12a   : > { %v801_v16 = vpop.f32.mrf.mxu0  ;;  %v841_v17 = vadd.f32 %v840_v14, %v763_v12 }
 0x12b   : > { %v802_v18 = vadd.f32 %v801_v16, %v763_v12  ;;  %v842_v20 = vpop.f32.mrf.mxu1  ;;  %v930_v21 = vpack.c.bf16 %v800_v15, %v800_v15 }
 0x12c   : > { %v843_v22 = vadd.f32 %v842_v20, %v763_v12  ;;  %v803_v23 = vpop.f32.mrf.mxu0  ;;  %v932_v24 = vpack.c.bf16 %v841_v17, %v841_v17 }
 0x12d   : > { %v931_v25 = vpack.c.bf16 %v802_v18, %v802_v18  ;;  %v844_v26 = vpop.f32.mrf.mxu1  ;;  %v950_v27 = vsel %vm948_vm0, %v930_v21, 0 }
 0x12e   : > { %v933_v19 = vpack.c.bf16 %v843_v22, %v843_v22  ;;  %v804_v28 = vpop.f32.mrf.mxu0  ;;  %v956_v29 = vsel %vm948_vm0, %v932_v24, 0 }
 0x12f   : > { %v845_v30 = vpop.f32.mrf.mxu1  ;;  %1238 = vmatprep.subr.msk.bf16.mxu0 %vm948_vm0, %v931_v25 }
 0x130   : > { %1240 = vmatprep.subr.msk.bf16.mxu1 %vm948_vm0, %v933_v19  ;;  %988 = vmatpush1.bf16.msra.mxu0 %v950_v27 }
 0x131   : > { %1029 = vmatpush1.bf16.msra.mxu1 %v956_v29 }
 0x133   : > { %1239 = vmatmul.mubr.msk.bf16.vlgmr.msra.gmra.mxu0 %vm944_vm1, %v929_v31 }
 0x134   : > { %1241 = vmatmul.mubr.msk.bf16.vlgmr.msra.gmra.mxu1 %vm944_vm1, %v929_v31  ;;  %1087 = vmatprep.mubr.bf16.mxu0 %v1315_v1 }
 0x135   : > { %1128 = vmatprep.mubr.bf16.mxu1 %v1315_v1 }
 0x14f   : > { %v881_v32 = vpop.f32.mrf.mxu0 }
 0x150   : > { %v882_v33 = vadd.f32 %v881_v32, %v763_v12 }
 0x151   : > { %v883_v35 = vpop.f32.mrf.mxu0 }
 0x152   : > { %v922_v34 = vpop.f32.mrf.mxu1  ;;  %v934_v36 = vpack.c.bf16 %v882_v33, %v882_v33  ;;  %v884_v38 = vadd.f32 %v883_v35, %v763_v12 }
 0x153   : > { %v923_v37 = vadd.f32 %v922_v34, %v763_v12  ;;  %v885_v40 = vpop.f32.mrf.mxu0 }
 0x154   : > { %v924_v39 = vpop.f32.mrf.mxu1  ;;  %v935_v42 = vpack.c.bf16 %v884_v38, %v884_v38  ;;  %v962_v46 = vsel %vm948_vm0, %v934_v36, 0 }
 0x155   : > { %v936_v41 = vpack.c.bf16 %v923_v37, %v923_v37  ;;  %v925_v43 = vadd.f32 %v924_v39, %v763_v12  ;;  %v886_v45 = vpop.f32.mrf.mxu0 }
 0x156   : > { %v926_v44 = vpop.f32.mrf.mxu1  ;;  %1242 = vmatprep.subr.msk.bf16.mxu0 %vm948_vm0, %v935_v42 }
 0x157   : > { %v937_v47 = vpack.c.bf16 %v925_v43, %v925_v43  ;;  %1070 = vmatpush1.bf16.msra.mxu0 %v962_v46  ;;  %v968_v48 = vsel %vm948_vm0, %v936_v41, 0 }
 0x158   : > { %v927_v1 = vpop.f32.mrf.mxu1 }
 0x159   : > { %1244 = vmatprep.subr.msk.bf16.mxu1 %vm948_vm0, %v937_v47 }
 0x15a   : > { %1111 = vmatpush1.bf16.msra.mxu1 %v968_v48  ;;  %1243 = vmatmul.mubr.msk.bf16.vlgmr.msra.gmra.mxu0 %vm944_vm1, %v929_v31 }
 0x15d   : > { %1245 = vmatmul.mubr.msk.bf16.vlgmr.msra.gmra.mxu1 %vm944_vm1, %v929_v31 }
 0x1f3   : > { %v1007_v50 = vpop.f32.mrf.mxu0 }
 0x1f4   : > { %v1008_v51 = vadd.f32 %v1007_v50, %v942_v49  ;;  %v1048_v52 = vpop.f32.mrf.mxu1 }
 0x1f5   : > { %v1049_v53 = vadd.f32 %v1048_v52, %v942_v49  ;;  %v1009_v54 = vpop.f32.mrf.mxu0 }
 0x1f6   : > { %1275 = vtanh.f32 %v1008_v51  ;;  %v1010_v55 = vadd.f32 %v1009_v54, %v942_v49  ;;  %v1050_v56 = vpop.f32.mrf.mxu1 }
 0x1f7   : > { %1277 = vtanh.f32 %v1049_v53  ;;  %v1051_v57 = vadd.f32 %v1050_v56, %v942_v49  ;;  %v1011_v58 = vpop.f32.mrf.mxu0 }
 0x1f8   : > { %1279 = vtanh.f32 %v1010_v55  ;;  %v1052_v59 = vpop.f32.mrf.mxu1 }
 0x1f9   : > { %1281 = vtanh.f32 %v1051_v57  ;;  %v1012_v60 = vpop.f32.mrf.mxu0 }
 0x1fa   : > { %v1053_v61 = vpop.f32.mrf.mxu1 }
 0x203   : > { %v1276_v62 = vpop.eup %1275 }
 0x204   : > { %v1278_v63 = vpop.eup %1277 }
 0x205   : > { %v1280_v0 = vpop.eup %1279 }
 0x206   : > { %v1282_v2 = vpop.eup %1281  ;;  %v1153_v3 = vcombine.low %v1276_v62, %v1280_v0 }
 0x207   : > { %v1154_v4 = vcombine.low %v1278_v63, %v1282_v2 }
 0x208   : > { %1161 = vst [vmem:[%s371_s28] sm:$0x77] %v1153_v3 }
 0x209   : > { %1162 = vst [vmem:[%s371_s28 + $0x8] sm:$0x77] %v1154_v4 }
 0x21a   : > { %v1089_v5 = vpop.f32.mrf.mxu0 }
 0x21b   : > { %v1090_v6 = vadd.f32 %v1089_v5, %v942_v49 }
 0x21c   : > { %v1091_v8 = vpop.f32.mrf.mxu0 }
 0x21d   : > { %v1130_v7 = vpop.f32.mrf.mxu1  ;;  %v1092_v10 = vadd.f32 %v1091_v8, %v942_v49  ;;  %1283 = vtanh.f32 %v1090_v6 }
 0x21e   : > { %v1131_v9 = vadd.f32 %v1130_v7, %v942_v49  ;;  %v1093_v12 = vpop.f32.mrf.mxu0 }
 0x21f   : > { %v1132_v11 = vpop.f32.mrf.mxu1 }
 0x220   : > { %1285 = vtanh.f32 %v1131_v9  ;;  %v1133_v13 = vadd.f32 %v1132_v11, %v942_v49  ;;  %v1094_v15 = vpop.f32.mrf.mxu0 }
 0x221   : > { %1287 = vtanh.f32 %v1092_v10  ;;  %v1134_v14 = vpop.f32.mrf.mxu1 }
 0x222   : > { %1289 = vtanh.f32 %v1133_v13 }
 0x223   : > { %v1135_v16 = vpop.f32.mrf.mxu1 }
 0x22a   : > { %v1284_v17 = vpop.eup %1283 }
 0x22d   : > { %v1286_v18 = vpop.eup %1285 }
 0x22e   : > { %v1288_v20 = vpop.eup %1287 }
 0x22f   : > { %v1290_v21 = vpop.eup %1289  ;;  %v1155_v22 = vcombine.low %v1284_v17, %v1288_v20 }
 0x230   : > { %v1156_v23 = vcombine.low %v1286_v18, %v1290_v21 }
 0x231   : > { %1163 = vst [vmem:[%s371_s28 + $0x10] sm:$0x77] %v1155_v22 }
 0x232   : > { %1164 = vst [vmem:[%s371_s28 + $0x18] sm:$0x77] %v1156_v23 }
 0x233 PF: > { %p12_p9 = scmp.ge.s32.totalorder %s1363_s22, 4   ;;  %s1641_s18 = smov %s1309_s19 }
 0x234   : > { %s1642_s19 = smov %s1372_s25  ;;  %s1643_s20 = smov %s1363_s22 }
 0x235   :  { %14 = sbr.rel (!%p12_p9) target bundleno = 2 (0x2), region = 98 }

</bundles_post_ra>
